<compile_context>
chip_gen: v7x
topology: tpu7x:2x2x1
jax: 0.10.0
libtpu: 0.0.40
codegen_flags: <defaults>
</compile_context>

<pallas_src>
import functools
import math

import jax
import jax.numpy as jnp
from jax.experimental import pallas as pl
from jax.experimental.pallas import tpu as pltpu


def _cross_attn_kernel(x_ref, y_ref,
                       wq_ref, bq_ref,
                       wk_ref, bk_ref,
                       wv_ref, bv_ref,
                       wo_ref, bo_ref,
                       o_ref,
                       acc_ref,
                       *, n_heads: int, d_head: int, scale: float, matmul_dtype):
    # x_ref: (1, TQ, De)   y_ref: (1, Skv, Dc)   o_ref: (1, TQ, De)
    # acc_ref: VMEM scratch (TQ, De) f32 accumulator (replaces the head concat).
    x = x_ref[0]                      # (TQ,  De)  in matmul_dtype
    y = y_ref[0]                      # (Skv, Dc)  in matmul_dtype

    # Input projections: MXU matmuls with f32 accumulation, f32 bias add.
    q = jnp.dot(x, wq_ref[...], preferred_element_type=jnp.float32) + bq_ref[...]
    k = jnp.dot(y, wk_ref[...], preferred_element_type=jnp.float32) + bk_ref[...]
    v = jnp.dot(y, wv_ref[...], preferred_element_type=jnp.float32) + bv_ref[...]

    # Fold the 1/sqrt(d_head) scale into q once (one VPU pass over (TQ, De)).
    q = q * scale

    qm = q.astype(matmul_dtype)
    km = k.astype(matmul_dtype)
    vm = v.astype(matmul_dtype)

    for h in range(n_heads):
        lo = h * d_head
        hi = lo + d_head
        qh = qm[:, lo:hi]             # (TQ,  d_head)
        kh = km[:, lo:hi]             # (Skv, d_head)
        vh = vm[:, lo:hi]             # (Skv, d_head)

        # (TQ, Skv) scores: contract last axis of both -> no kh.T relayout.
        s = jax.lax.dot_general(qh, kh, (((1,), (1,)), ((), ())),
                                preferred_element_type=jnp.float32)

        # f32 softmax (max-subtracted); reciprocal routed to the EUP.
        s = s - jnp.max(s, axis=-1, keepdims=True)
        p = jnp.exp(s)
        p = p * pl.reciprocal(jnp.sum(p, axis=-1, keepdims=True), approx=True)

        # Write this head's output straight into its accumulator slice.
        acc_ref[:, lo:hi] = jnp.dot(p.astype(matmul_dtype), vh,
                                    preferred_element_type=jnp.float32)

    # Output projection on the concatenated-heads accumulator.
    out = jnp.dot(acc_ref[...].astype(matmul_dtype), wo_ref[...],
                  preferred_element_type=jnp.float32) + bo_ref[...]
    o_ref[0] = out.astype(o_ref.dtype)


def cross_attention(x, y, params, *, n_heads: int, tq: int = 128, matmul_dtype=None):
    """params = (wq, bq, wk, bk, wv, bv, wo, bo); weights stored (d_in, d_out)."""
    B, Sq, De = x.shape
    _, Skv, Dc = y.shape
    assert De % n_heads == 0, "d_embed must be divisible by n_heads"
    d_head = De // n_heads
    out_dtype = x.dtype

    if matmul_dtype is None:
        matmul_dtype = x.dtype
    matmul_dtype = jnp.dtype(matmul_dtype)

    # Cast MXU operands once in the wrapper (narrow HBM->VMEM traffic).
    # Biases stay f32 and are added after f32 accumulation.
    wq, bq, wk, bk, wv, bv, wo, bo = params
    x = x.astype(matmul_dtype)
    y = y.astype(matmul_dtype)
    wq, wk, wv, wo = (w.astype(matmul_dtype) for w in (wq, wk, wv, wo))
    bq, bk, bv, bo = (b.astype(jnp.float32) for b in (bq, bk, bv, bo))

    # Query-tile size: multiple of 8 sublanes, dividing Sq.
    tq = min(tq, Sq)
    if Sq % tq != 0:
        tq = Sq                        # fallback: one tile per batch element
    grid = (B, Sq // tq)

    kernel = functools.partial(
        _cross_attn_kernel,
        n_heads=n_heads, d_head=d_head,
        scale=1.0 / math.sqrt(d_head),
        matmul_dtype=matmul_dtype)

    const = lambda shape: pl.BlockSpec(shape, lambda b, qi: (0,) * len(shape))

    return pl.pallas_call(
        kernel,
        out_shape=jax.ShapeDtypeStruct((B, Sq, De), out_dtype),
        grid=grid,
        in_specs=[
            pl.BlockSpec((1, tq, De), lambda b, qi: (b, qi, 0)),    # x q-tile
            pl.BlockSpec((1, Skv, Dc), lambda b, qi: (b, 0, 0)),    # y (per batch)
            const((De, De)), const((1, De)),                        # wq, bq
            const((Dc, De)), const((1, De)),                        # wk, bk
            const((Dc, De)), const((1, De)),                        # wv, bv
            const((De, De)), const((1, De)),                        # wo, bo
        ],
        out_specs=pl.BlockSpec((1, tq, De), lambda b, qi: (b, qi, 0)),
        scratch_shapes=[pltpu.VMEM((tq, De), jnp.float32)],
        compiler_params=pltpu.CompilerParams(
            dimension_semantics=("parallel", "parallel"),
            vmem_limit_bytes=64 * 1024 * 1024,
        ),
    )(x, y, wq, bq, wk, bk, wv, bv, wo, bo)


def _reference(x, y, params, *, n_heads: int):
    """Pure-JAX f32 reference mirroring the PyTorch forward exactly."""
    wq, bq, wk, bk, wv, bv, wo, bo = params
    B, Sq, De = x.shape
    d_head = De // n_heads
    q = x @ wq + bq
    k = y @ wk + bk
    v = y @ wv + bv
    q = q.reshape(B, -1, n_heads, d_head).transpose(0, 2, 1, 3)
    k = k.reshape(B, -1, n_heads, d_head).transpose(0, 2, 1, 3)
    v = v.reshape(B, -1, n_heads, d_head).transpose(0, 2, 1, 3)
    s = jnp.einsum('bhqd,bhkd->bhqk', q, k) / math.sqrt(d_head)
    w = jax.nn.softmax(s, axis=-1)
    o = jnp.einsum('bhqk,bhkd->bhqd', w, v)
    o = o.transpose(0, 2, 1, 3).reshape(B, Sq, De)
    return o @ wo + bo


if __name__ == "__main__":
    # Small, TPU-layout-friendly shapes consistent with the module's forward pass:
    # lane-dense d_embed (128), two query tiles per batch (Sq=256, TQ=128).
    batch, seq_q, seq_kv = 2, 256, 32
    d_embed, d_cross, n_heads = 128, 64, 4

    key = jax.random.PRNGKey(0)
    keys = jax.random.split(key, 10)

    x = jax.random.normal(keys[0], (batch, seq_q, d_embed), dtype=jnp.float32)
    y = jax.random.normal(keys[1], (batch, seq_kv, d_cross), dtype=jnp.float32)

    # Deterministic parameter init (nn.Linear weight (out, in) stored transposed).
    def init_linear(kw, kb, d_in, d_out):
        w = jax.random.normal(kw, (d_in, d_out), dtype=jnp.float32) / math.sqrt(d_in)
        b = jax.random.normal(kb, (1, d_out), dtype=jnp.float32) * 0.02
        return w, b

    wq, bq = init_linear(keys[2], keys[3], d_embed, d_embed)
    wk, bk = init_linear(keys[4], keys[5], d_cross, d_embed)
    wv, bv = init_linear(keys[6], keys[7], d_cross, d_embed)
    wo, bo = init_linear(keys[8], keys[9], d_embed, d_embed)
    params = (wq, bq, wk, bk, wv, bv, wo, bo)

    ref = _reference(x, y, params, n_heads=n_heads)

    # f32 MXU operands (tolerance accounts for the approx EUP reciprocal).
    out_f32 = jax.block_until_ready(
        cross_attention(x, y, params, n_heads=n_heads, tq=128))
    assert out_f32.shape == (batch, seq_q, d_embed)
    assert jnp.allclose(out_f32, ref, atol=1e-2, rtol=1e-2), "f32 kernel mismatch"

    # bf16 MXU operands (v6e/v7x fast path), f32 accumulation + f32 softmax.
    out_bf16 = jax.block_until_ready(
        cross_attention(x, y, params, n_heads=n_heads, tq=128,
                        matmul_dtype=jnp.bfloat16))
    assert out_bf16.dtype == jnp.float32
    assert jnp.allclose(out_bf16, ref, atol=1e-1, rtol=1e-1), "bf16 kernel mismatch"

    print("KERNEL_OK")
</pallas_src>

<mosaic_0001>
module attributes {stable_mosaic.version = 11 : i64} {
  func.func @_cross_attn_kernel(%arg0: i32, %arg1: i32, %arg2: memref<1x128x128xf32, #tpu.memory_space<vmem>>, %arg3: memref<1x32x64xf32, #tpu.memory_space<vmem>>, %arg4: memref<128x128xf32, #tpu.memory_space<vmem>>, %arg5: memref<1x128xf32, #tpu.memory_space<vmem>>, %arg6: memref<64x128xf32, #tpu.memory_space<vmem>>, %arg7: memref<1x128xf32, #tpu.memory_space<vmem>>, %arg8: memref<64x128xf32, #tpu.memory_space<vmem>>, %arg9: memref<1x128xf32, #tpu.memory_space<vmem>>, %arg10: memref<128x128xf32, #tpu.memory_space<vmem>>, %arg11: memref<1x128xf32, #tpu.memory_space<vmem>>, %arg12: memref<1x128x128xf32, #tpu.memory_space<vmem>>, %arg13: memref<128x128xf32, #tpu.memory_space<vmem>>) attributes {dimension_semantics = [#tpu.dimension_semantics<parallel>, #tpu.dimension_semantics<parallel>], iteration_bounds = array<i64: 2, 2>, scalar_prefetch = 0 : i64, scratch_operands = 1 : i64, tpu.core_type = #tpu.core_type<tc>, window_params = [{transform_indices = @transform_0, window_bounds = array<i64: 1, 128, 128>}, {transform_indices = @transform_1, window_bounds = array<i64: 1, 32, 64>}, {pipeline_mode = #tpu.pipeline_mode<synchronous>, transform_indices = @transform_2, window_bounds = array<i64: 128, 128>}, {pipeline_mode = #tpu.pipeline_mode<synchronous>, transform_indices = @transform_3, window_bounds = array<i64: 1, 128>}, {pipeline_mode = #tpu.pipeline_mode<synchronous>, transform_indices = @transform_4, window_bounds = array<i64: 64, 128>}, {pipeline_mode = #tpu.pipeline_mode<synchronous>, transform_indices = @transform_5, window_bounds = array<i64: 1, 128>}, {pipeline_mode = #tpu.pipeline_mode<synchronous>, transform_indices = @transform_6, window_bounds = array<i64: 64, 128>}, {pipeline_mode = #tpu.pipeline_mode<synchronous>, transform_indices = @transform_7, window_bounds = array<i64: 1, 128>}, {pipeline_mode = #tpu.pipeline_mode<synchronous>, transform_indices = @transform_8, window_bounds = array<i64: 128, 128>}, {pipeline_mode = #tpu.pipeline_mode<synchronous>, transform_indices = @transform_9, window_bounds = array<i64: 1, 128>}, {transform_indices = @transform_10, window_bounds = array<i64: 1, 128, 128>}]} {
    %c0 = arith.constant 0 : index
    %c0_0 = arith.constant 0 : index
    %c0_1 = arith.constant 0 : index
    %0 = vector.load %arg2[%c0, %c0_0, %c0_1] : memref<1x128x128xf32, #tpu.memory_space<vmem>>, vector<1x128x128xf32>
    %1 = vector.shape_cast %0 : vector<1x128x128xf32> to vector<128x128xf32>
    %c0_2 = arith.constant 0 : index
    %c0_3 = arith.constant 0 : index
    %c0_4 = arith.constant 0 : index
    %2 = vector.load %arg3[%c0_2, %c0_3, %c0_4] : memref<1x32x64xf32, #tpu.memory_space<vmem>>, vector<1x32x64xf32>
    %3 = vector.shape_cast %2 : vector<1x32x64xf32> to vector<32x64xf32>
    %c0_5 = arith.constant 0 : index
    %c0_6 = arith.constant 0 : index
    %4 = vector.load %arg4[%c0_5, %c0_6] : memref<128x128xf32, #tpu.memory_space<vmem>>, vector<128x128xf32>
    %cst = arith.constant dense<0.000000e+00> : vector<128x128xf32>
    %5 = tpu.matmul %1, %4, %cst {dimension_numbers = #tpu.dot_dimension_numbers<[1], [0], [0], [1], [0, 0, 1, 1], [], []>} : vector<128x128xf32>, vector<128x128xf32>, vector<128x128xf32> -> vector<128x128xf32>
    %c0_7 = arith.constant 0 : index
    %c0_8 = arith.constant 0 : index
    %6 = vector.load %arg5[%c0_7, %c0_8] : memref<1x128xf32, #tpu.memory_space<vmem>>, vector<1x128xf32>
    %7 = vector.broadcast %6 : vector<1x128xf32> to vector<128x128xf32>
    %8 = arith.addf %5, %7 : vector<128x128xf32>
    %c0_9 = arith.constant 0 : index
    %c0_10 = arith.constant 0 : index
    %9 = vector.load %arg6[%c0_9, %c0_10] : memref<64x128xf32, #tpu.memory_space<vmem>>, vector<64x128xf32>
    %cst_11 = arith.constant dense<0.000000e+00> : vector<32x128xf32>
    %10 = tpu.matmul %3, %9, %cst_11 {dimension_numbers = #tpu.dot_dimension_numbers<[1], [0], [0], [1], [0, 0, 1, 1], [], []>} : vector<32x64xf32>, vector<64x128xf32>, vector<32x128xf32> -> vector<32x128xf32>
    %c0_12 = arith.constant 0 : index
    %c0_13 = arith.constant 0 : index
    %11 = vector.load %arg7[%c0_12, %c0_13] : memref<1x128xf32, #tpu.memory_space<vmem>>, vector<1x128xf32>
    %12 = vector.broadcast %11 : vector<1x128xf32> to vector<32x128xf32>
    %13 = arith.addf %10, %12 : vector<32x128xf32>
    %c0_14 = arith.constant 0 : index
    %c0_15 = arith.constant 0 : index
    %14 = vector.load %arg8[%c0_14, %c0_15] : memref<64x128xf32, #tpu.memory_space<vmem>>, vector<64x128xf32>
    %cst_16 = arith.constant dense<0.000000e+00> : vector<32x128xf32>
    %15 = tpu.matmul %3, %14, %cst_16 {dimension_numbers = #tpu.dot_dimension_numbers<[1], [0], [0], [1], [0, 0, 1, 1], [], []>} : vector<32x64xf32>, vector<64x128xf32>, vector<32x128xf32> -> vector<32x128xf32>
    %c0_17 = arith.constant 0 : index
    %c0_18 = arith.constant 0 : index
    %16 = vector.load %arg9[%c0_17, %c0_18] : memref<1x128xf32, #tpu.memory_space<vmem>>, vector<1x128xf32>
    %17 = vector.broadcast %16 : vector<1x128xf32> to vector<32x128xf32>
    %18 = arith.addf %15, %17 : vector<32x128xf32>
    %cst_19 = arith.constant 0.176776692 : f32
    %19 = vector.broadcast %cst_19 : f32 to vector<128x128xf32>
    %20 = arith.mulf %8, %19 : vector<128x128xf32>
    %21 = vector.extract_strided_slice %20 {offsets = [0, 0], sizes = [128, 32], strides = [1, 1]} : vector<128x128xf32> to vector<128x32xf32>
    %22 = vector.extract_strided_slice %13 {offsets = [0, 0], sizes = [32, 32], strides = [1, 1]} : vector<32x128xf32> to vector<32x32xf32>
    %23 = vector.extract_strided_slice %18 {offsets = [0, 0], sizes = [32, 32], strides = [1, 1]} : vector<32x128xf32> to vector<32x32xf32>
    %cst_20 = arith.constant dense<0.000000e+00> : vector<128x32xf32>
    %24 = tpu.matmul %21, %22, %cst_20 {dimension_numbers = #tpu.dot_dimension_numbers<[1], [1], [0], [0], [0, 0, 1, 0], [], []>} : vector<128x32xf32>, vector<32x32xf32>, vector<128x32xf32> -> vector<128x32xf32>
    %cst_21 = arith.constant dense<0xFF800000> : vector<128xf32>
    %25 = vector.multi_reduction <maximumf>, %24, %cst_21 [1] : vector<128x32xf32> to vector<128xf32>
    %26 = vector.shape_cast %25 : vector<128xf32> to vector<128x1xf32>
    %27 = vector.broadcast %26 : vector<128x1xf32> to vector<128x32xf32>
    %28 = arith.subf %24, %27 : vector<128x32xf32>
    %29 = math.exp %28 : vector<128x32xf32>
    %cst_22 = arith.constant dense<0.000000e+00> : vector<128xf32>
    %30 = vector.multi_reduction <add>, %29, %cst_22 [1] : vector<128x32xf32> to vector<128xf32>
    %31 = vector.shape_cast %30 : vector<128xf32> to vector<128x1xf32>
    %32 = tpu.reciprocal %31 {approx = true} : vector<128x1xf32> -> vector<128x1xf32>
    %33 = vector.broadcast %32 : vector<128x1xf32> to vector<128x32xf32>
    %34 = arith.mulf %29, %33 : vector<128x32xf32>
    %cst_23 = arith.constant dense<0.000000e+00> : vector<128x32xf32>
    %35 = tpu.matmul %34, %23, %cst_23 {dimension_numbers = #tpu.dot_dimension_numbers<[1], [0], [0], [1], [0, 0, 1, 1], [], []>} : vector<128x32xf32>, vector<32x32xf32>, vector<128x32xf32> -> vector<128x32xf32>
    %c0_24 = arith.constant 0 : index
    %c0_25 = arith.constant 0 : index
    %36 = vector.load %arg13[%c0_24, %c0_25] : memref<128x128xf32, #tpu.memory_space<vmem>>, vector<128x32xf32>
    tpu.vector_store %arg13[%c0_24, %c0_25], %35 {strides = array<i32>} : memref<128x128xf32, #tpu.memory_space<vmem>>, vector<128x32xf32>,
    %37 = vector.extract_strided_slice %20 {offsets = [0, 32], sizes = [128, 32], strides = [1, 1]} : vector<128x128xf32> to vector<128x32xf32>
    %38 = vector.extract_strided_slice %13 {offsets = [0, 32], sizes = [32, 32], strides = [1, 1]} : vector<32x128xf32> to vector<32x32xf32>
    %39 = vector.extract_strided_slice %18 {offsets = [0, 32], sizes = [32, 32], strides = [1, 1]} : vector<32x128xf32> to vector<32x32xf32>
    %cst_26 = arith.constant dense<0.000000e+00> : vector<128x32xf32>
    %40 = tpu.matmul %37, %38, %cst_26 {dimension_numbers = #tpu.dot_dimension_numbers<[1], [1], [0], [0], [0, 0, 1, 0], [], []>} : vector<128x32xf32>, vector<32x32xf32>, vector<128x32xf32> -> vector<128x32xf32>
    %cst_27 = arith.constant dense<0xFF800000> : vector<128xf32>
    %41 = vector.multi_reduction <maximumf>, %40, %cst_27 [1] : vector<128x32xf32> to vector<128xf32>
    %42 = vector.shape_cast %41 : vector<128xf32> to vector<128x1xf32>
    %43 = vector.broadcast %42 : vector<128x1xf32> to vector<128x32xf32>
    %44 = arith.subf %40, %43 : vector<128x32xf32>
    %45 = math.exp %44 : vector<128x32xf32>
    %cst_28 = arith.constant dense<0.000000e+00> : vector<128xf32>
    %46 = vector.multi_reduction <add>, %45, %cst_28 [1] : vector<128x32xf32> to vector<128xf32>
    %47 = vector.shape_cast %46 : vector<128xf32> to vector<128x1xf32>
    %48 = tpu.reciprocal %47 {approx = true} : vector<128x1xf32> -> vector<128x1xf32>
    %49 = vector.broadcast %48 : vector<128x1xf32> to vector<128x32xf32>
    %50 = arith.mulf %45, %49 : vector<128x32xf32>
    %cst_29 = arith.constant dense<0.000000e+00> : vector<128x32xf32>
    %51 = tpu.matmul %50, %39, %cst_29 {dimension_numbers = #tpu.dot_dimension_numbers<[1], [0], [0], [1], [0, 0, 1, 1], [], []>} : vector<128x32xf32>, vector<32x32xf32>, vector<128x32xf32> -> vector<128x32xf32>
    %c0_30 = arith.constant 0 : index
    %c32 = arith.constant 32 : index
    %52 = vector.load %arg13[%c0_30, %c32] : memref<128x128xf32, #tpu.memory_space<vmem>>, vector<128x32xf32>
    tpu.vector_store %arg13[%c0_30, %c32], %51 {strides = array<i32>} : memref<128x128xf32, #tpu.memory_space<vmem>>, vector<128x32xf32>,
    %53 = vector.extract_strided_slice %20 {offsets = [0, 64], sizes = [128, 32], strides = [1, 1]} : vector<128x128xf32> to vector<128x32xf32>
    %54 = vector.extract_strided_slice %13 {offsets = [0, 64], sizes = [32, 32], strides = [1, 1]} : vector<32x128xf32> to vector<32x32xf32>
    %55 = vector.extract_strided_slice %18 {offsets = [0, 64], sizes = [32, 32], strides = [1, 1]} : vector<32x128xf32> to vector<32x32xf32>
    %cst_31 = arith.constant dense<0.000000e+00> : vector<128x32xf32>
    %56 = tpu.matmul %53, %54, %cst_31 {dimension_numbers = #tpu.dot_dimension_numbers<[1], [1], [0], [0], [0, 0, 1, 0], [], []>} : vector<128x32xf32>, vector<32x32xf32>, vector<128x32xf32> -> vector<128x32xf32>
    %cst_32 = arith.constant dense<0xFF800000> : vector<128xf32>
    %57 = vector.multi_reduction <maximumf>, %56, %cst_32 [1] : vector<128x32xf32> to vector<128xf32>
    %58 = vector.shape_cast %57 : vector<128xf32> to vector<128x1xf32>
    %59 = vector.broadcast %58 : vector<128x1xf32> to vector<128x32xf32>
    %60 = arith.subf %56, %59 : vector<128x32xf32>
    %61 = math.exp %60 : vector<128x32xf32>
    %cst_33 = arith.constant dense<0.000000e+00> : vector<128xf32>
    %62 = vector.multi_reduction <add>, %61, %cst_33 [1] : vector<128x32xf32> to vector<128xf32>
    %63 = vector.shape_cast %62 : vector<128xf32> to vector<128x1xf32>
    %64 = tpu.reciprocal %63 {approx = true} : vector<128x1xf32> -> vector<128x1xf32>
    %65 = vector.broadcast %64 : vector<128x1xf32> to vector<128x32xf32>
    %66 = arith.mulf %61, %65 : vector<128x32xf32>
    %cst_34 = arith.constant dense<0.000000e+00> : vector<128x32xf32>
    %67 = tpu.matmul %66, %55, %cst_34 {dimension_numbers = #tpu.dot_dimension_numbers<[1], [0], [0], [1], [0, 0, 1, 1], [], []>} : vector<128x32xf32>, vector<32x32xf32>, vector<128x32xf32> -> vector<128x32xf32>
    %c0_35 = arith.constant 0 : index
    %c64 = arith.constant 64 : index
    %68 = vector.load %arg13[%c0_35, %c64] : memref<128x128xf32, #tpu.memory_space<vmem>>, vector<128x32xf32>
    tpu.vector_store %arg13[%c0_35, %c64], %67 {strides = array<i32>} : memref<128x128xf32, #tpu.memory_space<vmem>>, vector<128x32xf32>,
    %69 = vector.extract_strided_slice %20 {offsets = [0, 96], sizes = [128, 32], strides = [1, 1]} : vector<128x128xf32> to vector<128x32xf32>
    %70 = vector.extract_strided_slice %13 {offsets = [0, 96], sizes = [32, 32], strides = [1, 1]} : vector<32x128xf32> to vector<32x32xf32>
    %71 = vector.extract_strided_slice %18 {offsets = [0, 96], sizes = [32, 32], strides = [1, 1]} : vector<32x128xf32> to vector<32x32xf32>
    %cst_36 = arith.constant dense<0.000000e+00> : vector<128x32xf32>
    %72 = tpu.matmul %69, %70, %cst_36 {dimension_numbers = #tpu.dot_dimension_numbers<[1], [1], [0], [0], [0, 0, 1, 0], [], []>} : vector<128x32xf32>, vector<32x32xf32>, vector<128x32xf32> -> vector<128x32xf32>
    %cst_37 = arith.constant dense<0xFF800000> : vector<128xf32>
    %73 = vector.multi_reduction <maximumf>, %72, %cst_37 [1] : vector<128x32xf32> to vector<128xf32>
    %74 = vector.shape_cast %73 : vector<128xf32> to vector<128x1xf32>
    %75 = vector.broadcast %74 : vector<128x1xf32> to vector<128x32xf32>
    %76 = arith.subf %72, %75 : vector<128x32xf32>
    %77 = math.exp %76 : vector<128x32xf32>
    %cst_38 = arith.constant dense<0.000000e+00> : vector<128xf32>
    %78 = vector.multi_reduction <add>, %77, %cst_38 [1] : vector<128x32xf32> to vector<128xf32>
    %79 = vector.shape_cast %78 : vector<128xf32> to vector<128x1xf32>
    %80 = tpu.reciprocal %79 {approx = true} : vector<128x1xf32> -> vector<128x1xf32>
    %81 = vector.broadcast %80 : vector<128x1xf32> to vector<128x32xf32>
    %82 = arith.mulf %77, %81 : vector<128x32xf32>
    %cst_39 = arith.constant dense<0.000000e+00> : vector<128x32xf32>
    %83 = tpu.matmul %82, %71, %cst_39 {dimension_numbers = #tpu.dot_dimension_numbers<[1], [0], [0], [1], [0, 0, 1, 1], [], []>} : vector<128x32xf32>, vector<32x32xf32>, vector<128x32xf32> -> vector<128x32xf32>
    %c0_40 = arith.constant 0 : index
    %c96 = arith.constant 96 : index
    %84 = vector.load %arg13[%c0_40, %c96] : memref<128x128xf32, #tpu.memory_space<vmem>>, vector<128x32xf32>
    tpu.vector_store %arg13[%c0_40, %c96], %83 {strides = array<i32>} : memref<128x128xf32, #tpu.memory_space<vmem>>, vector<128x32xf32>,
    %c0_41 = arith.constant 0 : index
    %c0_42 = arith.constant 0 : index
    %85 = vector.load %arg13[%c0_41, %c0_42] : memref<128x128xf32, #tpu.memory_space<vmem>>, vector<128x128xf32>
    %c0_43 = arith.constant 0 : index
    %c0_44 = arith.constant 0 : index
    %86 = vector.load %arg10[%c0_43, %c0_44] : memref<128x128xf32, #tpu.memory_space<vmem>>, vector<128x128xf32>
    %cst_45 = arith.constant dense<0.000000e+00> : vector<128x128xf32>
    %87 = tpu.matmul %85, %86, %cst_45 {dimension_numbers = #tpu.dot_dimension_numbers<[1], [0], [0], [1], [0, 0, 1, 1], [], []>} : vector<128x128xf32>, vector<128x128xf32>, vector<128x128xf32> -> vector<128x128xf32>
    %c0_46 = arith.constant 0 : index
    %c0_47 = arith.constant 0 : index
    %88 = vector.load %arg11[%c0_46, %c0_47] : memref<1x128xf32, #tpu.memory_space<vmem>>, vector<1x128xf32>
    %89 = vector.broadcast %88 : vector<1x128xf32> to vector<128x128xf32>
    %90 = arith.addf %87, %89 : vector<128x128xf32>
    %c0_48 = arith.constant 0 : index
    %c0_49 = arith.constant 0 : index
    %c0_50 = arith.constant 0 : index
    %91 = vector.load %arg12[%c0_48, %c0_49, %c0_50] : memref<1x128x128xf32, #tpu.memory_space<vmem>>, vector<1x128x128xf32>
    %92 = vector.shape_cast %91 : vector<1x128x128xf32> to vector<128x128xf32>
    %93 = vector.shape_cast %90 : vector<128x128xf32> to vector<1x128x128xf32>
    tpu.vector_store %arg12[%c0_48, %c0_49, %c0_50], %93 {strides = array<i32>} : memref<1x128x128xf32, #tpu.memory_space<vmem>>, vector<1x128x128xf32>,
    return
  }
  func.func @transform_0(%arg0: i32, %arg1: i32) -> (i32, i32, i32) {
    %c0_i32 = arith.constant 0 : i32
    %c0_i32_0 = arith.constant 0 : i32
    return %arg0, %arg1, %c0_i32 : i32, i32, i32
  }
  func.func @transform_1(%arg0: i32, %arg1: i32) -> (i32, i32, i32) {
    %c0_i32 = arith.constant 0 : i32
    %c0_i32_0 = arith.constant 0 : i32
    %c0_i32_1 = arith.constant 0 : i32
    return %arg0, %c0_i32, %c0_i32_0 : i32, i32, i32
  }
  func.func @transform_2(%arg0: i32, %arg1: i32) -> (i32, i32) {
    %c0_i32 = arith.constant 0 : i32
    %c0_i32_0 = arith.constant 0 : i32
    %c0_i32_1 = arith.constant 0 : i32
    return %c0_i32, %c0_i32_0 : i32, i32
  }
  func.func @transform_3(%arg0: i32, %arg1: i32) -> (i32, i32) {
    %c0_i32 = arith.constant 0 : i32
    %c0_i32_0 = arith.constant 0 : i32
    %c0_i32_1 = arith.constant 0 : i32
    return %c0_i32, %c0_i32_0 : i32, i32
  }
  func.func @transform_4(%arg0: i32, %arg1: i32) -> (i32, i32) {
    %c0_i32 = arith.constant 0 : i32
    %c0_i32_0 = arith.constant 0 : i32
    %c0_i32_1 = arith.constant 0 : i32
    return %c0_i32, %c0_i32_0 : i32, i32
  }
  func.func @transform_5(%arg0: i32, %arg1: i32) -> (i32, i32) {
    %c0_i32 = arith.constant 0 : i32
    %c0_i32_0 = arith.constant 0 : i32
    %c0_i32_1 = arith.constant 0 : i32
    return %c0_i32, %c0_i32_0 : i32, i32
  }
  func.func @transform_6(%arg0: i32, %arg1: i32) -> (i32, i32) {
    %c0_i32 = arith.constant 0 : i32
    %c0_i32_0 = arith.constant 0 : i32
    %c0_i32_1 = arith.constant 0 : i32
    return %c0_i32, %c0_i32_0 : i32, i32
  }
  func.func @transform_7(%arg0: i32, %arg1: i32) -> (i32, i32) {
    %c0_i32 = arith.constant 0 : i32
    %c0_i32_0 = arith.constant 0 : i32
    %c0_i32_1 = arith.constant 0 : i32
    return %c0_i32, %c0_i32_0 : i32, i32
  }
  func.func @transform_8(%arg0: i32, %arg1: i32) -> (i32, i32) {
    %c0_i32 = arith.constant 0 : i32
    %c0_i32_0 = arith.constant 0 : i32
    %c0_i32_1 = arith.constant 0 : i32
    return %c0_i32, %c0_i32_0 : i32, i32
  }
  func.func @transform_9(%arg0: i32, %arg1: i32) -> (i32, i32) {
    %c0_i32 = arith.constant 0 : i32
    %c0_i32_0 = arith.constant 0 : i32
    %c0_i32_1 = arith.constant 0 : i32
    return %c0_i32, %c0_i32_0 : i32, i32
  }
  func.func @transform_10(%arg0: i32, %arg1: i32) -> (i32, i32, i32) {
    %c0_i32 = arith.constant 0 : i32
    %c0_i32_0 = arith.constant 0 : i32
    return %arg0, %arg1, %c0_i32 : i32, i32, i32
  }
}

</mosaic_0001>

<bundles_post_ra>
// kernel: tpu_custom_call.1
= control target key start
LH: loop header
LB: loop body
LE: loop exit
PB: predicated region body
PF: predicated region fallthrough
CT: control target
= control target key end

     0   :  { %s7765_s0 = inlined_call_operand.hbm [shape: f32[2,256,128], index: 0, kind: input, shape index: {}]   ;;  %s7766_s1 = inlined_call_operand.hbm [shape: f32[2,32,64], index: 1, kind: input, shape index: {}]   ;;  %s7767_s2 = inlined_call_operand.hbm [shape: f32[128,128], index: 2, kind: input, shape index: {}]   ;;  %s7768_s3 = inlined_call_operand.hbm [shape: f32[1,128], index: 3, kind: input, shape index: {}]   ;;  %s7769_s4 = inlined_call_operand.hbm [shape: f32[64,128], index: 4, kind: input, shape index: {}]   ;;  %s7770_s5 = inlined_call_operand.hbm [shape: f32[1,128], index: 5, kind: input, shape index: {}]   ;;  %s7771_s6 = inlined_call_operand.hbm [shape: f32[64,128], index: 6, kind: input, shape index: {}]   ;;  %s7772_s7 = inlined_call_operand.hbm [shape: f32[1,128], index: 7, kind: input, shape index: {}]   ;;  %s7773_s8 = inlined_call_operand.hbm [shape: f32[128,128], index: 8, kind: input, shape index: {}]   ;;  %s7774_s9 = inlined_call_operand.hbm [shape: f32[1,128], index: 9, kind: input, shape index: {}]   ;;  %s7775_s10 = inlined_call_operand.hbm [shape: f32[2,256,128], index: 10, kind: output, shape index: {}]  }
   0x1   :  { %7814 = sst [smem:[#allocation55_spill]] %s7765_s0 }
   0x2   :  { %7815 = sst [smem:[#allocation56_spill]] %s7766_s1 }
   0x3   :  { %7816 = sst [smem:[#allocation57_spill]] %s7767_s2 }
   0x4   :  { %7817 = sst [smem:[#allocation58_spill]] %s7768_s3 }
   0x5   :  { %7818 = sst [smem:[#allocation59_spill]] %s7769_s4 }
   0x6   :  { %7819 = sst [smem:[#allocation60_spill]] %s7770_s5 }
   0x7   :  { %7820 = sst [smem:[#allocation61_spill]] %s7771_s6 }
   0x8   :  { %7821 = sst [smem:[#allocation62_spill]] %s7772_s7 }
   0x9   :  { %7822 = sst [smem:[#allocation63_spill]] %s7773_s8 }
   0xa   :  { %7823 = sst [smem:[#allocation64_spill]] %s7774_s9 }
   0xb   :  { %7824 = sst [smem:[#allocation65_spill]] %s7775_s10 }
   0xc   :  { %15 = vsyncpa [#allocation4], 0 }
   0xd   :  { %17 = vsyncpa [#allocation4 + $0x1], 0 }
   0xe   :  { %18 = vsyncpa [#allocation7], 0 }
   0xf   :  { %20 = vsyncpa [#allocation7 + $0x1], 0 }
  0x10   :  { %21 = vsyncpa [#allocation10], 0 }
  0x11   :  { %22 = vsyncpa [#allocation13], 0 }
  0x12   :  { %23 = vsyncpa [#allocation16], 0 }
  0x13   :  { %24 = vsyncpa [#allocation19], 0 }
  0x14   :  { %25 = vsyncpa [#allocation5], 0 }
  0x15   :  { %27 = vsyncpa [#allocation5 + $0x1], 0  ;;  %s6070_s13 = smov 0   ;;  %s6072_s14 = smov 0  }
  0x16   :  { %s6074_s15 = smov 0   ;;  %s6076_s16 = smov 0  }
  0x17   :  { %s6078_s17 = smov 0   ;;  %s6080_s18 = smov 0  }
  0x18   :  { %s6082_s19 = smov 0   ;;  %s6084_s20 = smov 0  }
  0x19   :  { %s6086_s21 = smov 0   ;;  %s6088_s22 = smov 0  }
  0x1a   :  { %s6090_s23 = smov 0  }
  0x1b LB: > { %7825 = sst [smem:[#allocation29_spill]] %s5955_s13  ;;  %s6126_s24 = sadd.s32 4294967295, %s5995_s23   ;;  %s5995_s23 = sphi %s6090_s23, %s33_s23   ;;  %s5991_s22 = sphi %s6088_s22, %s7935_s22   ;;  %s5987_s21 = sphi %s6086_s21, %s7934_s21   ;;  %s5983_s20 = sphi %s6084_s20, %s7933_s20   ;;  %s5979_s19 = sphi %s6082_s19, %s7932_s19   ;;  %s5975_s18 = sphi %s6080_s18, %s7931_s18   ;;  %s5971_s17 = sphi %s6078_s17, %s7930_s17   ;;  %s5967_s16 = sphi %s6076_s16, %s7929_s16   ;;  %s5963_s15 = sphi %s6074_s15, %s7928_s15   ;;  %s5959_s14 = sphi %s6072_s14, %s7927_s14   ;;  %s5955_s13 = sphi %s6070_s13, %s7924_s13  }
  0x1c   : > { %7826 = sst [smem:[#allocation30_spill]] %s5959_s14  ;;  %p4026_p0 = scmp.ge.s32.totalorder %s5995_s23, 1 }
  0x1d   : > { %7827 = sst [smem:[#allocation31_spill]] %s5963_s15  ;;  %p7782_p1 = scmp.eq.s32.totalorder %s6126_s24, 0 }
  0x1e   : > { %7828 = sst [smem:[#allocation32_spill]] %s5979_s19  ;;  %p300_p2 = scmp.lt.s32.totalorder %s5995_s23, 5 }
  0x1f   : > { %7829 = sst [smem:[#allocation33_spill]] %s5983_s20  ;;  %s5997_s26 = smov [#allocation8]  }
  0x20   : > { %p6131_p3 = pnand %p4026_p0, %p300_p2  ;;  %s312_s27 = sshll.u32 %s5997_s26, 4  ;;  %s6135_s27 = int_to_ptr.vmem [resolvable:$true] %s312_s27 }
  0x21   : > { %s5998_s29 = smov [#allocation9]   ;;  %s5999_s11 = smov [#allocation12]  }
  0x22   : > { %s7830_s25 = scalar_select %p6131_p3, 1, 0 }
  0x23   : > { %p5092_p4 = pneg %p6131_p3  ;;  %s326_s30 = sshll.u32 %s5998_s29, 4  ;;  %s6145_s30 = int_to_ptr.vmem [resolvable:$true] %s326_s30 }
  0x24   : > { %7831 = sst [smem:[#allocation34_spill]] %s7830_s25  ;;  %s6147_s12 = sshll.u32 %s5999_s11, 4  ;;  %s351_s12 = int_to_ptr.vmem [resolvable:$true] %s6147_s12 }
  0x25   : > { %p6141_p5 = pnand %p5092_p4, %p7782_p1  ;;  %s7833_s2 = sld [smem:[#allocation57_spill]] }
  0x27   : > { %p6157_p7 = pneg %p6141_p5 }
  0x2b   : > { %s5565_s26 = scalar_lea.hbm %s7833_s2, 2048 }
  0x2c   : > { %p5566_p6 = scmp.ne.s32.totalorder %s7833_s2, %s5565_s26  ;;  %p5572_p10 = scmp.lt.u32.totalorder %s5565_s26, %s7833_s2 }
  0x2e   : > { %p5568_p8 = pnand %p6157_p7, %p5566_p6 }
  0x30   : > { %p5569_p9 = pneg %p5568_p8 }
  0x32   : > { %p5574_p11 = pnand %p5572_p10, %p5569_p9 }
  0x34   : > { %5577 = shalt.err (!%p5574_p11)
}
  0x35   : > { %s5578_s10 = scalar_lea.vmem %s6135_s27, 2048  ;;  %p5586_p2 = scmp.lt.s32.totalorder %s6135_s27, %s6135_s27 }
  0x36   : > { %p5579_p12 = scmp.ne.s32.totalorder %s6135_s27, %s5578_s10  ;;  %p5587_p4 = scmp.lt.s32.totalorder %s5578_s10, %s5578_s10 }
  0x38   : > { %p5581_p13 = pnand %p5579_p12, %p6157_p7  ;;  %p5588_p6 = por %p5587_p4, %p5586_p2 }
  0x3a   : > { %p5582_p0 = pneg %p5581_p13 }
  0x3c   : > { %p5589_p8 = pnand %p5588_p6, %p5582_p0 }
  0x3e   : > { %5592 = shalt.err (!%p5589_p8)
}
  0x3f   : > { %s7784_s19 = smov 128   ;;  %s7786_s20 = smov 8  }
  0x40   : > { %5095 = dma.hbm_to_vmem [thread:$0]  (!%p6141_p5), %s7833_s2, 2048, %s6135_s27, [#allocation7], %s7784_s19, %s7784_s19, %s7786_s20  }
  0x41   : > { %s7835_s3 = sld [smem:[#allocation58_spill]] }
  0x47   : > { %s5593_s10 = scalar_lea.hbm %s7835_s3, 16 }
  0x48   : > { %p5594_p9 = scmp.ne.s32.totalorder %s7835_s3, %s5593_s10  ;;  %p5600_p12 = scmp.lt.u32.totalorder %s5593_s10, %s7835_s3 }
  0x4a   : > { %p5596_p10 = pnand %p5594_p9, %p6157_p7 }
  0x4c   : > { %p5597_p11 = pneg %p5596_p10 }
  0x4e   : > { %p5602_p13 = pnand %p5600_p12, %p5597_p11 }
  0x50   : > { %5605 = shalt.err (!%p5602_p13)
}
  0x51   : > { %s5606_s27 = scalar_lea.vmem %s6145_s30, 16  ;;  %s5613_s13 = scalar_lea.vmem %s6145_s30, 32 }
  0x52   : > { %p5607_p0 = scmp.ne.s32.totalorder %s6145_s30, %s5606_s27  ;;  %p5614_p6 = scmp.lt.s32.totalorder %s6145_s30, %s6145_s30 }
  0x53   : > { %p5615_p8 = scmp.lt.s32.totalorder %s5613_s13, %s5606_s27 }
  0x54   : > { %p5609_p2 = pnand %p5607_p0, %p6157_p7 }
  0x55   : > { %p5616_p9 = por %p5615_p8, %p5614_p6 }
  0x56   : > { %p5610_p4 = pneg %p5609_p2 }
  0x58   : > { %p5617_p10 = pnand %p5616_p9, %p5610_p4 }
  0x5a   : > { %5620 = shalt.err (!%p5617_p10)
}
  0x5b   : > { %5098 = dma.hbm_to_vmem [thread:$0]  (!%p6141_p5), %s7835_s3, 16, %s6145_s30, [#allocation10]  }
  0x5c   : > { %s7836_s5 = sld [smem:[#allocation60_spill]] }
  0x62   : > { %s5621_s26 = scalar_lea.hbm %s7836_s5, 16 }
  0x63   : > { %p5622_p11 = scmp.ne.s32.totalorder %s7836_s5, %s5621_s26  ;;  %p5628_p0 = scmp.lt.u32.totalorder %s5621_s26, %s7836_s5 }
  0x65   : > { %p5624_p12 = pnand %p5622_p11, %p6157_p7 }
  0x67   : > { %p5625_p13 = pneg %p5624_p12 }
  0x69   : > { %p5630_p2 = pnand %p5628_p0, %p5625_p13 }
  0x6b   : > { %5633 = shalt.err (!%p5630_p2)
}
  0x6c   : > { %s5634_s13 = scalar_lea.vmem %s351_s12, 16  ;;  %s5641_s30 = scalar_lea.vmem %s351_s12, 32 }
  0x6d   : > { %p5635_p4 = scmp.ne.s32.totalorder %s351_s12, %s5634_s13  ;;  %p5642_p9 = scmp.lt.s32.totalorder %s351_s12, %s351_s12 }
  0x6e   : > { %p5643_p10 = scmp.lt.s32.totalorder %s5641_s30, %s5634_s13 }
  0x6f   : > { %p5637_p6 = pnand %p5635_p4, %p6157_p7 }
  0x70   : > { %p5644_p1 = por %p5643_p10, %p5642_p9 }
  0x71   : > { %p5638_p8 = pneg %p5637_p6 }
  0x73   : > { %p5645_p3 = pnand %p5644_p1, %p5638_p8 }
  0x75   : > { %5648 = shalt.err (!%p5645_p3)
}
  0x76   : > { %5104 = dma.hbm_to_vmem [thread:$0]  (!%p6141_p5), %s7836_s5, 16, %s351_s12, [#allocation13]  }
  0x77   : > { %s6002_s15 = smov [#allocation15]   ;;  %s6003_s26 = smov [#allocation11]  }
  0x78   : > { %s374_s25 = sshll.u32 %s6002_s15, 4  ;;  %s336_s29 = sshll.u32 %s6003_s26, 4  ;;  %s375_s25 = int_to_ptr.vmem [resolvable:$true] %s374_s25  ;;  %s337_s29 = int_to_ptr.vmem [resolvable:$true] %s336_s29 }
  0x79   : > { %s7837_s7 = sld [smem:[#allocation62_spill]] }
  0x7f   : > { %s5649_s27 = scalar_lea.hbm %s7837_s7, 16 }
  0x80   : > { %p5650_p1 = scmp.ne.s32.totalorder %s7837_s7, %s5649_s27  ;;  %p5656_p12 = scmp.lt.u32.totalorder %s5649_s27, %s7837_s7 }
  0x82   : > { %p5652_p3 = pnand %p5650_p1, %p6157_p7 }
  0x84   : > { %p5653_p11 = pneg %p5652_p3 }
  0x86   : > { %p5658_p13 = pnand %p5656_p12, %p5653_p11 }
  0x88   : > { %5661 = shalt.err (!%p5658_p13)
}
  0x89   : > { %s5662_s12 = scalar_lea.vmem %s375_s25, 16  ;;  %s5669_s14 = scalar_lea.vmem %s375_s25, 32 }
  0x8a   : > { %p5663_p0 = scmp.ne.s32.totalorder %s375_s25, %s5662_s12  ;;  %p5670_p6 = scmp.lt.s32.totalorder %s375_s25, %s375_s25 }
  0x8b   : > { %p5671_p8 = scmp.lt.s32.totalorder %s5669_s14, %s5662_s12 }
  0x8c   : > { %p5665_p2 = pnand %p5663_p0, %p6157_p7 }
  0x8d   : > { %p5672_p9 = por %p5671_p8, %p5670_p6 }
  0x8e   : > { %p5666_p4 = pneg %p5665_p2 }
  0x90   : > { %p5673_p10 = pnand %p5672_p9, %p5666_p4 }
  0x92   : > { %5676 = shalt.err (!%p5673_p10)
}
  0x93   : > { %5110 = dma.hbm_to_vmem [thread:$0]  (!%p6141_p5), %s7837_s7, 16, %s375_s25, [#allocation16]  }
  0x94   : > { %s7838_s4 = sld [smem:[#allocation59_spill]] }
  0x9a   : > { %s5677_s10 = scalar_lea.hbm %s7838_s4, 1024 }
  0x9b   : > { %p5678_p1 = scmp.ne.s32.totalorder %s7838_s4, %s5677_s10  ;;  %p5684_p12 = scmp.lt.u32.totalorder %s5677_s10, %s7838_s4 }
  0x9d   : > { %p5680_p3 = pnand %p5678_p1, %p6157_p7 }
  0x9f   : > { %p5681_p11 = pneg %p5680_p3 }
  0xa1   : > { %p5686_p13 = pnand %p5684_p12, %p5681_p11 }
  0xa3   : > { %5689 = shalt.err (!%p5686_p13)
}
  0xa4   : > { %s5690_s12 = scalar_lea.vmem %s337_s29, 1024  ;;  %p5698_p6 = scmp.lt.s32.totalorder %s337_s29, %s337_s29 }
  0xa5   : > { %p5691_p0 = scmp.ne.s32.totalorder %s337_s29, %s5690_s12  ;;  %p5699_p8 = scmp.lt.s32.totalorder %s5690_s12, %s5690_s12 }
  0xa7   : > { %p5693_p2 = pnand %p5691_p0, %p6157_p7  ;;  %p5700_p9 = por %p5699_p8, %p5698_p6 }
  0xa9   : > { %p5694_p4 = pneg %p5693_p2 }
  0xab   : > { %p5701_p10 = pnand %p5700_p9, %p5694_p4 }
  0xad   : > { %5704 = shalt.err (!%p5701_p10)
}
  0xae   : > { %s7839_s25 = smov 128   ;;  %s6004_s26 = smov [#allocation14]  }
  0xaf   : > { %5101 = dma.hbm_to_vmem [thread:$0]  (!%p6141_p5), %s7838_s4, 1024, %s337_s29, [#allocation10], %s7839_s25, %s7839_s25, %s7786_s20  }
  0xb0   : > { %s360_s19 = sshll.u32 %s6004_s26, 4  ;;  %s6005_s11 = smov [#allocation17]   ;;  %s361_s19 = int_to_ptr.vmem [resolvable:$true] %s360_s19 }
  0xb1   : > { %s384_s10 = sshll.u32 %s6005_s11, 4  ;;  %s7840_s6 = sld [smem:[#allocation61_spill]]  ;;  %s385_s10 = int_to_ptr.vmem [resolvable:$true] %s384_s10 }
  0xb7   : > { %s5705_s30 = scalar_lea.hbm %s7840_s6, 1024 }
  0xb8   : > { %p5706_p1 = scmp.ne.s32.totalorder %s7840_s6, %s5705_s30  ;;  %p5712_p12 = scmp.lt.u32.totalorder %s5705_s30, %s7840_s6 }
  0xba   : > { %p5708_p3 = pnand %p5706_p1, %p6157_p7 }
  0xbc   : > { %p5709_p11 = pneg %p5708_p3 }
  0xbe   : > { %p5714_p13 = pnand %p5712_p12, %p5709_p11 }
  0xc0   : > { %5717 = shalt.err (!%p5714_p13)
}
  0xc1   : > { %s5718_s29 = scalar_lea.vmem %s361_s19, 1024  ;;  %p5726_p6 = scmp.lt.s32.totalorder %s361_s19, %s361_s19 }
  0xc2   : > { %p5719_p0 = scmp.ne.s32.totalorder %s361_s19, %s5718_s29  ;;  %p5727_p8 = scmp.lt.s32.totalorder %s5718_s29, %s5718_s29 }
  0xc4   : > { %p5721_p2 = pnand %p5719_p0, %p6157_p7  ;;  %p5728_p9 = por %p5727_p8, %p5726_p6 }
  0xc6   : > { %p5722_p4 = pneg %p5721_p2 }
  0xc8   : > { %p5729_p10 = pnand %p5728_p9, %p5722_p4 }
  0xca   : > { %5732 = shalt.err (!%p5729_p10)
}
  0xcb   : > { %5107 = dma.hbm_to_vmem [thread:$0]  (!%p6141_p5), %s7840_s6, 1024, %s361_s19, [#allocation13], %s7839_s25, %s7839_s25, %s7786_s20  }
  0xcc   : > { %s7841_s8 = sld [smem:[#allocation63_spill]] }
  0xd2   : > { %s5733_s27 = scalar_lea.hbm %s7841_s8, 2048 }
  0xd3   : > { %p5734_p1 = scmp.ne.s32.totalorder %s7841_s8, %s5733_s27  ;;  %p5740_p12 = scmp.lt.u32.totalorder %s5733_s27, %s7841_s8 }
  0xd5   : > { %p5736_p3 = pnand %p5734_p1, %p6157_p7 }
  0xd7   : > { %p5737_p11 = pneg %p5736_p3 }
  0xd9   : > { %p5742_p13 = pnand %p5740_p12, %p5737_p11 }
  0xdb   : > { %5745 = shalt.err (!%p5742_p13)
}
  0xdc   : > { %s5746_s14 = scalar_lea.vmem %s385_s10, 2048  ;;  %p5754_p6 = scmp.lt.s32.totalorder %s385_s10, %s385_s10 }
  0xdd   : > { %p5747_p0 = scmp.ne.s32.totalorder %s385_s10, %s5746_s14  ;;  %p5755_p8 = scmp.lt.s32.totalorder %s5746_s14, %s5746_s14 }
  0xdf   : > { %p5749_p2 = pnand %p5747_p0, %p6157_p7  ;;  %p5756_p9 = por %p5755_p8, %p5754_p6 }
  0xe1   : > { %p5750_p4 = pneg %p5749_p2 }
  0xe3   : > { %p5757_p10 = pnand %p5756_p9, %p5750_p4 }
  0xe5   : > { %5760 = shalt.err (!%p5757_p10)
}
  0xe6   : > { %5113 = dma.hbm_to_vmem [thread:$0]  (!%p6141_p5), %s7841_s8, 2048, %s385_s10, [#allocation16], %s7839_s25, %s7839_s25, %s7786_s20  }
  0xe7   : > { %s6006_s2 = smov [#allocation18]   ;;  %s7842_s9 = sld [smem:[#allocation64_spill]] }
  0xe8   : > { %s398_s15 = sshll.u32 %s6006_s2, 4  ;;  %s399_s15 = int_to_ptr.vmem [resolvable:$true] %s398_s15 }
  0xed   : > { %s5761_s27 = scalar_lea.hbm %s7842_s9, 16 }
  0xee   : > { %p5762_p1 = scmp.ne.s32.totalorder %s7842_s9, %s5761_s27  ;;  %p5768_p12 = scmp.lt.u32.totalorder %s5761_s27, %s7842_s9 }
  0xf0   : > { %p5764_p3 = pnand %p5762_p1, %p6157_p7 }
  0xf2   : > { %p5765_p11 = pneg %p5764_p3 }
  0xf4   : > { %p5770_p13 = pnand %p5768_p12, %p5765_p11 }
  0xf6   : > { %5773 = shalt.err (!%p5770_p13)
}
  0xf7   : > { %s5774_s10 = scalar_lea.vmem %s399_s15, 16  ;;  %s5781_s14 = scalar_lea.vmem %s399_s15, 32 }
  0xf8   : > { %p5775_p0 = scmp.ne.s32.totalorder %s399_s15, %s5774_s10  ;;  %p5782_p6 = scmp.lt.s32.totalorder %s399_s15, %s399_s15 }
  0xf9   : > { %p5783_p8 = scmp.lt.s32.totalorder %s5781_s14, %s5774_s10 }
  0xfa   : > { %p5777_p2 = pnand %p5775_p0, %p6157_p7 }
  0xfb   : > { %p5784_p9 = por %p5783_p8, %p5782_p6 }
  0xfc   : > { %p5778_p4 = pneg %p5777_p2 }
  0xfe   : > { %p5785_p10 = pnand %p5784_p9, %p5778_p4 }
 0x100   : > { %5788 = shalt.err (!%p5785_p10)
}
 0x101   : > { %5116 = dma.hbm_to_vmem [thread:$0]  (!%p6141_p5), %s7842_s9, 16, %s399_s15, [#allocation19]  }
 0x102   : > { %s4025_s1 = sadd.s32 4294967294, %s5995_s23   ;;  %s42_s28 = sadd.s32 1, %s5987_s21 }
 0x103   : > { %p43_p7 = scmp.ge.s32.totalorder %s42_s28, 2  ;;  %s45_s2 = sadd.s32 1, %s5991_s22 }
 0x104   : > { %s54_s26 = sadd.s32 1, %s5975_s18  ;;  %p61_p1 = scmp.ne.s32.totalorder %s5975_s18, %s5971_s17 }
 0x105   : > { %s7937_s28 = smov (%p43_p7, %s42_s28), 0  ;;  %s7939_s2 = smov (!%p43_p7, %s45_s2), %s5991_s22 }
 0x106   : > { %s50_s11 = ssub.s32 %s5987_s21, %s7937_s28  ;;  %p7789_p3 = scmp.eq.s32.totalorder %s5995_s23, 0 }
 0x107   : > { %p47_p11 = scmp.ge.s32.totalorder %s7939_s2, 2  ;;  %p67_p12 = scmp.ne.s32.totalorder %s5971_s17, %s5967_s16 }
 0x108   : > { %p6339_p5 = por %p7789_p3, %p61_p1  ;;  %p287_p13 = scmp.eq.s32.totalorder %s6126_s24, 3 }
 0x109   : > { %s7941_s2 = smov (%p47_p11, %s7939_s2), 0  ;;  %p7844_p0 = scmp.eq.s32.totalorder %s6126_s24, 0 }
 0x10a   : > { %p6352_p4 = por %p287_p13, %p61_p1  ;;  %s6358_s30 = ssub.s32 %s5991_s22, %s7941_s2 }
 0x10b   : > { %p6348_p2 = por %p7844_p0, %p67_p12  ;;  %p293_p6 = scmp.eq.s32.totalorder %s4025_s1, 3 }
 0x10c   : > { %s7846_s13 = scalar_select %p6352_p4, 1, 0 }
 0x10d   : > { %s51_s0 = sor.u32 %s50_s11, %s6358_s30  ;;  %p6362_p10 = por %p293_p6, %p67_p12 }
 0x10e   : > { %p52_p9 = scmp.eq.s32.totalorder %s51_s0, 0  ;;  %p7788_p7 = scmp.lt.s32.totalorder %s5995_s23, 4 }
 0x10f   : > { %s7847_s12 = scalar_select %p6362_p10, 1, 0 }
 0x110   : > { %s409_s10 = sand.u32 1, %s5975_s18   ;;  %s4037_s29 = sshll.u32 %s5987_s21, 4 }
 0x111   : > { %s6369_s14 = scalar_select %p52_p9, %s5975_s18, %s54_s26  }
 0x112   : > { %s4036_s19 = sshll.u32 %s409_s10, 7  ;;  %s4038_s20 = sshll.u32 %s5991_s22, 5 }
 0x113   : > { %s413_s3 = scalar_lea.vmem [#allocation3], %s4036_s19  ;;  %s419_s5 = sadd.s32 %s4038_s20, %s4037_s29 }
 0x114   : > { %s422_s4 = sshll.u32 %s413_s3, 4  ;;  %s4039_s1 = sshll.u32 %s419_s5, 7  ;;  %s6373_s4 = int_to_ptr.vmem [resolvable:$true] %s422_s4 }
 0x115   : > { %p6379_p1 = pnand %p7788_p7, %p6339_p5  ;;  %s7849_s7 = sld [smem:[#allocation55_spill]] }
 0x116   : > { %s6388_s3 = scalar_lea.sflag [#allocation4], %s409_s10 }
 0x117   : > { %p5791_p12 = pneg %p6379_p1 }
 0x11b   : > { %s6386_s26 = scalar_lea.hbm %s7849_s7, %s4039_s1  ;;  %s5794_s15 = scalar_lea.hbm %s7849_s7, 8192 }
 0x11c   : > { %s5789_s5 = scalar_lea.hbm %s6386_s26, 2048  ;;  %p5795_p0 = scmp.lt.u32.totalorder %s6386_s26, %s7849_s7 }
 0x11d   : > { %p5790_p11 = scmp.ne.s32.totalorder %s6386_s26, %s5789_s5  ;;  %p5796_p6 = scmp.lt.u32.totalorder %s5794_s15, %s5789_s5 }
 0x11e   : > { %p5798_p7 = scmp.lt.u32.totalorder %s5789_s5, %s6386_s26 }
 0x11f   : > { %p5792_p5 = pnand %p5791_p12, %p5790_p11  ;;  %p5797_p9 = por %p5796_p6, %p5795_p0 }
 0x121   : > { %p5793_p13 = pneg %p5792_p5  ;;  %p5799_p3 = por %p5798_p7, %p5797_p9 }
 0x123   : > { %p5800_p8 = pnand %p5799_p3, %p5793_p13 }
 0x125   : > { %5803 = shalt.err (!%p5800_p8)
}
 0x126   : > { %s5804_s10 = scalar_lea.vmem %s6373_s4, 2048  ;;  %s6007_s1 = smov [#allocation3]  }
 0x127   : > { %p5805_p11 = scmp.ne.s32.totalorder %s6373_s4, %s5804_s10  ;;  %s5809_s0 = sshll.u32 %s6007_s1, 4  ;;  %s5810_s0 = int_to_ptr.vmem [resolvable:$false] %s5809_s0 }
 0x128   : > { %s5811_s20 = scalar_lea.vmem %s5810_s0, 4096  ;;  %p5812_p4 = scmp.lt.s32.totalorder %s6373_s4, %s5810_s0 }
 0x129   : > { %p5807_p5 = pnand %p5805_p11, %p5791_p12  ;;  %p5813_p0 = scmp.lt.s32.totalorder %s5811_s20, %s5804_s10 }
 0x12b   : > { %p5808_p10 = pneg %p5807_p5  ;;  %p5814_p6 = por %p5813_p0, %p5812_p4 }
 0x12d   : > { %p5815_p7 = pnand %p5814_p6, %p5808_p10 }
 0x12f   : > { %5818 = shalt.err (!%p5815_p7)
}
 0x130   : > { %s7850_s5 = smov 8   ;;  %s7851_s6 = sld [smem:[#allocation31_spill]] }
 0x131   : > { %s7852_s15 = sld [smem:[#allocation30_spill]]  ;;  %s7853_s19 = sld [smem:[#allocation29_spill]] }
 0x132   : > { %5120 = dma.hbm_to_vmem [thread:$0]  (!%p6379_p1), %s6386_s26, 2048, %s6373_s4, %s6388_s3, %s7839_s25, %s7839_s25, %s7850_s5  }
 0x133   : > { %p7854_p4 = scmp.eq.s32.totalorder %s6358_s30, 0  ;;  %p7855_p8 = scmp.eq.s32.totalorder %s5995_s23, 0 }
 0x134   : > { %s432_s10 = sand.u32 1, %s5995_s23   ;;  %p7856_p13 = scmp.eq.s32.totalorder %s6126_s24, 0 }
 0x135   : > { %s4217_s7 = sshll.u32 %s5991_s22, 9  ;;  %s7858_s4 = sld [smem:[#allocation56_spill]] }
 0x136   : > { %s80_s11 = sadd.s32 1, %s7851_s6  ;;  %s434_s1 = sand.u32 1, %s7851_s6  }
 0x137   : > { %p87_p3 = scmp.ne.s32.totalorder %s7851_s6, %s7852_s15  ;;  %p93_p12 = scmp.ne.s32.totalorder %s7852_s15, %s7853_s19 }
 0x138   : > { %s6425_s29 = scalar_select %p7854_p4, %s7851_s6, %s80_s11  }
 0x139   : > { %p89_p10 = por %p87_p3, %p7855_p8  ;;  %p6435_p9 = por %p93_p12, %p7856_p13 }
 0x13a   : > { %s4040_s20 = sshll.u32 %s434_s1, 5  ;;  %p7859_p1 = scmp.lt.s32.totalorder %s5995_s23, 4 }
 0x13b   : > { %s7857_s0 = scalar_select %p6435_p9, 1, 0 }
 0x13c   : > { %s6443_s26 = scalar_lea.hbm %s7858_s4, %s4217_s7  ;;  %s436_s30 = scalar_lea.vmem [#allocation6], %s4040_s20 }
 0x13d   : > { %s443_s3 = sshll.u32 %s436_s30, 4  ;;  %p6447_p11 = pnand %p7859_p1, %p89_p10  ;;  %s6451_s3 = int_to_ptr.vmem [resolvable:$true] %s443_s3 }
 0x13e   : > { %s6453_s15 = scalar_lea.sflag [#allocation7], %s432_s10  ;;  %s5819_s8 = scalar_lea.hbm %s6443_s26, 512 }
 0x13f   : > { %p5820_p5 = scmp.ne.s32.totalorder %s6443_s26, %s5819_s8  ;;  %p5821_p0 = pneg %p6447_p11 }
 0x140   : > { %s5824_s19 = scalar_lea.hbm %s7858_s4, 1024  ;;  %p5825_p3 = scmp.lt.u32.totalorder %s6443_s26, %s7858_s4 }
 0x141   : > { %p5822_p6 = pnand %p5821_p0, %p5820_p5  ;;  %p5826_p4 = scmp.lt.u32.totalorder %s5824_s19, %s5819_s8 }
 0x142   : > { %p5828_p10 = scmp.lt.u32.totalorder %s5819_s8, %s6443_s26 }
 0x143   : > { %p5823_p7 = pneg %p5822_p6  ;;  %p5827_p8 = por %p5826_p4, %p5825_p3 }
 0x145   : > { %p5829_p12 = por %p5828_p10, %p5827_p8 }
 0x147   : > { %p5830_p13 = pnand %p5829_p12, %p5823_p7 }
 0x149   : > { %5833 = shalt.err (!%p5830_p13)
}
 0x14a   : > { %s5834_s10 = scalar_lea.vmem %s6451_s3, 512  ;;  %s6008_s20 = smov [#allocation6]  }
 0x14b   : > { %p5835_p1 = scmp.ne.s32.totalorder %s6451_s3, %s5834_s10  ;;  %s5839_s30 = sshll.u32 %s6008_s20, 4  ;;  %s5840_s30 = int_to_ptr.vmem [resolvable:$false] %s5839_s30 }
 0x14c   : > { %s5841_s7 = scalar_lea.vmem %s5840_s30, 1024  ;;  %p5842_p9 = scmp.lt.s32.totalorder %s6451_s3, %s5840_s30 }
 0x14d   : > { %p5837_p5 = pnand %p5835_p1, %p5821_p0  ;;  %p5843_p3 = scmp.lt.s32.totalorder %s5841_s7, %s5834_s10 }
 0x14f   : > { %p5838_p6 = pneg %p5837_p5  ;;  %p5844_p4 = por %p5843_p3, %p5842_p9 }
 0x151   : > { %p5845_p8 = pnand %p5844_p4, %p5838_p6 }
 0x153   : > { %5848 = shalt.err (!%p5845_p8)
}
 0x154   : > { %5123 = dma.hbm_to_vmem [thread:$0]  (!%p6447_p11), %s6443_s26, 512, %s6451_s3, %s6453_s15, %s7839_s25, %s7839_s25, %s7850_s5  }
 0x155   : > { %s7861_s8 = sld [smem:[#allocation34_spill]] }
 0x15b   : > { %p7862_p0 = scmp.ne.s32.totalorder %s7861_s8, 0 }
 0x15d   : > { %455 = sbr.rel (%p7862_p0) target bundleno = 2072 (0x818), region = 60 }
 0x164   : > { %s6487_s9 = sand.u32 1, %s5971_s17  }
 0x165   : > { %s4044_s19 = sshll.u32 %s6487_s9, 7  ;;  %s458_s11 = scalar_lea.sflag [#allocation4], %s6487_s9 }
 0x166   : > { %s6493_s6 = scalar_lea.vmem [#allocation3], %s4044_s19 }
 0x167   : > { %5922 = dma.done.wait (%p6348_p2), %s458_s11, 2048  }
 0x168   : > { %5924 = vsyncadd (%p6348_p2), %s458_s11, 4294965248  ;;  %s7863_s25 = sld [smem:[#allocation30_spill]]  ;;  %s466_s5 = sand.u32 1, %s6126_s24  }
 0x169   : > { %s467_s15 = scalar_lea.sflag [#allocation7], %s466_s5  ;;  %p7864_p9 = scmp.ne.s32.totalorder %s7857_s0, 0 }
 0x16e   : > { %s468_s26 = sand.u32 1, %s7863_s25  }
 0x16f   : > { %s4045_s3 = sshll.u32 %s468_s26, 5 }
 0x170   : > { %s6501_s1 = scalar_lea.vmem [#allocation6], %s4045_s3 }
 0x171   : > { %5926 = dma.done.wait (%p7864_p9), %s467_s15, 512  }
 0x172   : > { %5928 = vsyncadd (%p7864_p9), %s467_s15, 4294966784  ;;  %p7865_p11 = scmp.eq.s32.totalorder %s6126_s24, 0 }
 0x174   : > { %5930 = dma.done.wait (%p7865_p11), [#allocation7], 2048   ;;  %p7866_p7 = pmov %p7865_p11 }
 0x176   : > { %5932 = vsyncadd (%p7866_p7), [#allocation7], 4294965248  ;;  %p7867_p2 = pmov %p7866_p7 }
 0x178   : > { %5934 = dma.done.wait (%p7867_p2), [#allocation10], 1040   ;;  %p7868_p10 = pmov %p7867_p2 }
 0x179   : > { %p7869_p12 = pmov %p7867_p2 }
 0x17a   : > { %5936 = vsyncadd (%p7868_p10), [#allocation10], 4294966256 }
 0x17b   : > { %5938 = dma.done.wait (%p7869_p12), [#allocation13], 1040   ;;  %p7870_p13 = pmov %p7867_p2 }
 0x17c   : > { %p7871_p1 = pmov %p7867_p2 }
 0x17d   : > { %5940 = vsyncadd (%p7870_p13), [#allocation13], 4294966256 }
 0x17e   : > { %5942 = dma.done.wait (%p7871_p1), [#allocation16], 2064   ;;  %p7872_p5 = pmov %p7871_p1 }
 0x17f   : > { %p7873_p6 = pmov %p7871_p1 }
 0x180   : > { %5944 = vsyncadd (%p7872_p5), [#allocation16], 4294965232 }
 0x181   : > { %5946 = dma.done.wait (%p7873_p6), [#allocation19], 16   ;;  %p7874_p3 = pmov %p7871_p1 }
 0x182   : > { %v566_v0 = vld [vmem:[#allocation8] sm:$0xff]  ;;  %v567_v1 = vld [vmem:[#allocation8 + $0x8] sm:$0xff]  ;;  %v568_v2 = vld [vmem:[#allocation8 + $0x10] sm:$0xff]  ;;  %vm749_vm0 = vcmask 523264   ;;  %vm963_vm1 = vcmask 261120   ;;  %s6009_s24 = smov 96  }
 0x183   : > { %5948 = vsyncadd (%p7874_p3), [#allocation19], 4294967280  ;;  %v4878_v3 = vpack.c.bf16 %v567_v1, %v566_v0  ;;  %v569_v4 = vld [vmem:[#allocation8 + $0x18] sm:$0xff]  ;;  %v570_v6 = vld [vmem:[#allocation8 + $0x20] sm:$0xff]  ;;  %s6010_s27 = smov 64   ;;  %s6011_s0 = smov 32  }
 0x184   : > { %v4882_v5 = vpack.c.bf16 %v569_v4, %v568_v2  ;;  %v571_v7 = vld [vmem:[#allocation8 + $0x28] sm:$0xff]  ;;  %v546_v9 = vld [vmem:[%s6493_s6] sm:$0xff]  ;;  %v572_v10 = vld [vmem:[#allocation8 + $0x30] sm:$0xff]  ;;  %vm2228_vm3 = vcmask 523520   ;;  %vm2915_vm4 = vcmask 785920   ;;  %vm3602_vm5 = vcmask 1048320  }
 0x185   : > { %4879 = vmatprep.subr.bf16.mxu0 %v4878_v3  ;;  %v4886_v8 = vpack.c.bf16 %v571_v7, %v570_v6  ;;  %v573_v11 = vld [vmem:[#allocation8 + $0x38] sm:$0xff]  ;;  %4498 = vmatprep.mubr.f32.mxu0 %v546_v9  ;;  %v574_v13 = vld [vmem:[#allocation8 + $0x40] sm:$0xff]  ;;  %v575_v14 = vld [vmem:[#allocation8 + $0x48] sm:$0xff]  ;;  %s7676_s10 = scalar_lea.vmem [#allocation20], %s4044_s19  ;;  %s7919_s20 = sld [smem:[#allocation32_spill]] }
 0x186   : > { %4881 = vmatpush3.bf16.msra.mxu0 %v4878_v3  ;;  %v4890_v12 = vpack.c.bf16 %v573_v11, %v572_v10  ;;  %v4894_v15 = vpack.c.bf16 %v575_v14, %v574_v13  ;;  %v6529_v16 = vld [vmem:[%s6501_s1] sm:$0xff]  ;;  %v576_v17 = vld [vmem:[#allocation8 + $0x50] sm:$0xff]  ;;  %v577_v18 = vld [vmem:[#allocation8 + $0x58] sm:$0xff]  ;;  %s7920_s30 = sld [smem:[#allocation33_spill]]  ;;  %s7921_s26 = sld [smem:[#allocation65_spill]] }
 0x187   : > { %4883 = vmatprep.subr.bf16.mxu0 %v4882_v5  ;;  %v847_v19 = vld [vmem:[#allocation14] sm:$0xff]  ;;  %4560 = vmatprep.mubr.msk.f32.mxu1 %vm749_vm0, %v6529_v16  ;;  %v848_v20 = vld [vmem:[#allocation14 + $0x8] sm:$0xff]  ;;  %v849_v21 = vld [vmem:[#allocation14 + $0x10] sm:$0xff]  ;;  %v4898_v25 = vpack.c.bf16 %v577_v18, %v576_v17  ;;  %s3820_s15 = scalar_lea.sflag [#allocation5], %s6487_s9  ;;  %p7922_p8 = scmp.ne.s32.totalorder %s7846_s13, 0 }
 0x188   : > { %v850_v22 = vld [vmem:[#allocation14 + $0x18] sm:$0xff]  ;;  %v4926_v23 = vpack.c.bf16 %v848_v20, %v847_v19  ;;  %v851_v26 = vld [vmem:[#allocation14 + $0x20] sm:$0xff]  ;;  %v852_v27 = vld [vmem:[#allocation14 + $0x28] sm:$0xff] }
 0x189   : > { %v4930_v24 = vpack.c.bf16 %v850_v22, %v849_v21  ;;  %v578_v28 = vld [vmem:[#allocation8 + $0x60] sm:$0xff]  ;;  %v579_v29 = vld [vmem:[#allocation8 + $0x68] sm:$0xff]  ;;  %v4934_v30 = vpack.c.bf16 %v852_v27, %v851_v26  ;;  %v853_v32 = vld [vmem:[#allocation14 + $0x30] sm:$0xff] }
 0x18a   : > { %4885 = vmatpush3.bf16.msra.mxu0 %v4882_v5  ;;  %4927 = vmatprep.subr.bf16.mxu1 %v4926_v23  ;;  %v4902_v31 = vpack.c.bf16 %v579_v29, %v578_v28  ;;  %v854_v33 = vld [vmem:[#allocation14 + $0x38] sm:$0xff]  ;;  %v580_v34 = vld [vmem:[#allocation8 + $0x70] sm:$0xff]  ;;  %v547_v43 = vld [vmem:[%s6493_s6 + $0x8] sm:$0xff] }
 0x18b   : > { %4887 = vmatprep.subr.bf16.mxu0 %v4886_v8  ;;  %4929 = vmatpush3.bf16.msra.mxu1 %v4926_v23  ;;  %v581_v35 = vld [vmem:[#allocation8 + $0x78] sm:$0xff]  ;;  %v4938_v36 = vpack.c.bf16 %v854_v33, %v853_v32  ;;  %v734_v38 = vld [vmem:[#allocation11] sm:$0xff]  ;;  %v735_v39 = vld [vmem:[#allocation11 + $0x8] sm:$0xff]  ;;  %s4212_s7 = sshll.u32 %s7919_s20, 4 }
 0x18c   : > { %4931 = vmatprep.subr.bf16.mxu1 %v4930_v24  ;;  %v4906_v37 = vpack.c.bf16 %v581_v35, %v580_v34  ;;  %v4910_v40 = vpack.c.bf16 %v735_v39, %v734_v38  ;;  %v736_v41 = vld [vmem:[#allocation11 + $0x10] sm:$0xff]  ;;  %v737_v42 = vld [vmem:[#allocation11 + $0x18] sm:$0xff]  ;;  %v563_v46 = vld [vmem:[%s6501_s1 + $0x8] sm:$0xff]  ;;  %s4213_s8 = sshll.u32 %s7920_s30, 5 }
 0x18d   : > { %v548_v44 = vld [vmem:[%s6493_s6 + $0x10] sm:$0xff]  ;;  %v4914_v45 = vpack.c.bf16 %v737_v42, %v736_v41  ;;  %v738_v47 = vld [vmem:[#allocation11 + $0x20] sm:$0xff]  ;;  %v549_v50 = vld [vmem:[%s6493_s6 + $0x18] sm:$0xff]  ;;  %s3832_s19 = sadd.s32 %s4213_s8, %s4212_s7 }
 0x18e   : > { %4889 = vmatpush3.bf16.msra.mxu0 %v4886_v8  ;;  %v739_v48 = vld [vmem:[#allocation11 + $0x28] sm:$0xff]  ;;  %v550_v51 = vld [vmem:[%s6493_s6 + $0x20] sm:$0xff]  ;;  %v565_v53 = vld [vmem:[%s6501_s1 + $0x18] sm:$0xff]  ;;  %s4214_s11 = sshll.u32 %s3832_s19, 7 }
 0x18f   : > { %4891 = vmatprep.subr.bf16.mxu0 %v4890_v12  ;;  %4933 = vmatpush3.bf16.msra.mxu1 %v4930_v24  ;;  %v564_v49 = vld [vmem:[%s6501_s1 + $0x10] sm:$0xff]  ;;  %v4918_v52 = vpack.c.bf16 %v739_v48, %v738_v47  ;;  %v741_v55 = vld [vmem:[#allocation11 + $0x38] sm:$0xff]  ;;  %v551_v56 = vld [vmem:[%s6493_s6 + $0x28] sm:$0xff]  ;;  %s7698_s3 = scalar_lea.hbm %s7921_s26, %s4214_s11 }
 0x190   : > { %4935 = vmatprep.subr.bf16.mxu1 %v4934_v30  ;;  %v740_v54 = vld [vmem:[#allocation11 + $0x30] sm:$0xff]  ;;  %v554_v60 = vld [vmem:[%s6493_s6 + $0x40] sm:$0xff]  ;;  %v555_v61 = vld [vmem:[%s6493_s6 + $0x48] sm:$0xff] }
 0x191   : > { %v552_v57 = vld [vmem:[%s6493_s6 + $0x30] sm:$0xff]  ;;  %v4922_v58 = vpack.c.bf16 %v741_v55, %v740_v54  ;;  %v553_v59 = vld [vmem:[%s6493_s6 + $0x38] sm:$0xff]  ;;  %v558_v0 = vld [vmem:[%s6493_s6 + $0x60] sm:$0xff] }
 0x192   : > { %4893 = vmatpush3.bf16.msra.mxu0 %v4890_v12  ;;  %v556_v62 = vld [vmem:[%s6493_s6 + $0x50] sm:$0xff]  ;;  %v557_v63 = vld [vmem:[%s6493_s6 + $0x58] sm:$0xff]  ;;  %v559_v1 = vld [vmem:[%s6493_s6 + $0x68] sm:$0xff] }
 0x193   : > { %4895 = vmatprep.subr.bf16.mxu0 %v4894_v15  ;;  %4937 = vmatpush3.bf16.msra.mxu1 %v4934_v30  ;;  %v560_v2 = vld [vmem:[%s6493_s6 + $0x70] sm:$0xff]  ;;  %v561_v3 = vld [vmem:[%s6493_s6 + $0x78] sm:$0xff]  ;;  %v6559_v4 = vld [vmem:[#allocation9] ss:$0 sm:$0xff]  ;;  %s3835_s6 = sshll.u32 %s7676_s10, 4  ;;  %s7700_s6 = int_to_ptr.vmem [resolvable:$true] %s3835_s6 }
 0x194   : > { %4939 = vmatprep.subr.bf16.mxu1 %v4938_v36  ;;  %v4056_v38 = vld [vmem:[#allocation12] ss:$0 sm:$0xff]  ;;  %vm6609_vm2 = vmpackc.low %vm963_vm1, %vm963_vm1  ;;  %s5849_s1 = scalar_lea.vmem %s7700_s6, 2048 }
 0x195   : > { %p5850_p4 = scmp.ne.s32.totalorder %s7700_s6, %s5849_s1 }
 0x196   : > { %4897 = vmatpush3.bf16.msra.mxu0 %v4894_v15 }
 0x197   : > { %4899 = vmatprep.subr.bf16.mxu0 %v4898_v25  ;;  %4941 = vmatpush3.bf16.msra.mxu1 %v4938_v36  ;;  %p5851_p0 = pnand %p5850_p4, %p7922_p8 }
 0x199   : > { %p5852_p9 = pneg %p5851_p0 }
 0x19a   : > { %4901 = vmatpush3.bf16.msra.mxu0 %v4898_v25  ;;  %4561 = vmatmul.mubr.msk.f32.vlgmr.msra.gmra.mrb[0].mxu1 %vm749_vm0, %v563_v46 }
 0x19b   : > { %4903 = vmatprep.subr.bf16.mxu0 %v4902_v31  ;;  %4563 = vmatprep.mubr.msk.f32.mxu1 %vm749_vm0, %v564_v49 }
 0x19e   : > { %4905 = vmatpush3.bf16.msra.mxu0 %v4902_v31  ;;  %4564 = vmatmul.mubr.msk.f32.gmra.mrb[2].mxu1 %vm749_vm0, %v565_v53 }
 0x19f   : > { %4907 = vmatprep.subr.bf16.mxu0 %v4906_v37 }
 0x1a2   : > { %4909 = vmatpush3.bf16.msra.mxu0 %v4906_v37 }
 0x1a3   : > { %4911 = vmatprep.subr.bf16.mxu0 %v4910_v40 }
 0x1a5   : > { %4499 = vmatmul.mubr.f32.vlgmr.msra.gmra.mrb[0].mxu0 %v547_v43 }
 0x1a6   : > { %4501 = vmatprep.mubr.f32.mxu0 %v548_v44  ;;  %4913 = vmatpush3.bf16.msra.mxu0 %v4910_v40 }
 0x1a7   : > { %4915 = vmatprep.subr.bf16.mxu0 %v4914_v45 }
 0x1a9   : > { %4502 = vmatmul.mubr.f32.gmra.mrb[2].mxu0 %v549_v50 }
 0x1aa   : > { %4504 = vmatprep.mubr.f32.mxu0 %v550_v51  ;;  %4917 = vmatpush3.bf16.msra.mxu0 %v4914_v45 }
 0x1ab   : > { %4919 = vmatprep.subr.bf16.mxu0 %v4918_v52 }
 0x1ad   : > { %4505 = vmatmul.mubr.f32.gmra.mrb[4].mxu0 %v551_v56 }
 0x1ae   : > { %4507 = vmatprep.mubr.f32.mxu0 %v552_v57  ;;  %4921 = vmatpush3.bf16.msra.mxu0 %v4918_v52 }
 0x1af   : > { %4923 = vmatprep.subr.bf16.mxu0 %v4922_v58 }
 0x1b1   : > { %4508 = vmatmul.mubr.f32.gmra.mrb[6].mxu0 %v553_v59 }
 0x1b2   : > { %4510 = vmatprep.mubr.f32.mxu0 %v554_v60  ;;  %4925 = vmatpush3.bf16.msra.mxu0 %v4922_v58 }
 0x1b5   : > { %4511 = vmatmul.mubr.f32.gmra.mrb[8].mxu0 %v555_v61 }
 0x1b6   : > { %4513 = vmatprep.mubr.f32.mxu0 %v556_v62 }
 0x1b9   : > { %4514 = vmatmul.mubr.f32.gmra.mrb[10].mxu0 %v557_v63 }
 0x1ba   : > { %4516 = vmatprep.mubr.f32.mxu0 %v558_v0 }
 0x1bd   : > { %4517 = vmatmul.mubr.f32.gmra.mrb[12].mxu0 %v559_v1 }
 0x1be   : > { %4519 = vmatprep.mubr.f32.mxu0 %v560_v2 }
 0x1c1   : > { %4520 = vmatmul.mubr.f32.gmra.mrb[14].mxu0 %v561_v3 }
 0x1c2   : > { %4538 = vmatprep.mubr.msk.f32.mxu0 %vm749_vm0, %v6529_v16 }
 0x1c5   : > { %4539 = vmatmul.mubr.msk.f32.vlgmr.msra.gmra.mrb[16].mxu0 %vm749_vm0, %v563_v46 }
 0x1c6   : > { %4541 = vmatprep.mubr.msk.f32.mxu0 %vm749_vm0, %v564_v49 }
 0x1c9   : > { %4542 = vmatmul.mubr.msk.f32.gmra.mrb[18].mxu0 %vm749_vm0, %v565_v53 }
 0x26d   : > { %v4562_v3 = vpop.f32.mrb[0].mxu1 }
 0x278   : > { %v4500_v5 = vpop.f32.mrb[0].mxu0 }
 0x279   : > { %v655_v6 = vpop.f32.mrb[1].mxu0  ;;  %v661_v8 = vadd.f32 %v4500_v5, %v6559_v4  ;;  %v928_v5 = vpop.f32.mrb[1].mxu1 }
 0x27a   : > { %v656_v7 = vadd.f32 %v6559_v4, %v655_v6 }
 0x27b   : > { %v6569_v12 = vmul.f32 0.17677669, %v661_v8  ;;  %v4565_v8 = vpop.f32.mrb[2].mxu1 }
 0x27c   : > { %v6563_v9 = vmul.f32 0.17677669, %v656_v7  ;;  %v4503_v10 = vpop.f32.mrb[2].mxu0 }
 0x27d   : > { %v665_v11 = vpop.f32.mrb[3].mxu0  ;;  %v671_v13 = vadd.f32 %v4503_v10, %v6559_v4 }
 0x27e   : > { %1554 = vrot.lane.b32.xlu1 %v6563_v9, %s6009_s24  ;;  %4574 = vmatprep.mubr.msk.f32.mxu1 %vm963_vm1, %v6563_v9  ;;  %v666_v51 = vadd.f32 %v6559_v4, %v665_v11  ;;  %v938_v11 = vpop.f32.mrb[3].mxu1 }
 0x27f   : > { %v6574_v16 = vmul.f32 0.17677669, %v671_v13 }
 0x280   : > { %v4506_v14 = vpop.f32.mrb[4].mxu0  ;;  %v6627_v55 = vmul.f32 0.17677669, %v666_v51 }
 0x281   : > { %v675_v15 = vpop.f32.mrb[5].mxu0  ;;  %v681_v17 = vadd.f32 %v4506_v14, %v6559_v4 }
 0x282   : > { %1556 = vrot.lane.b32.xlu1 %v6569_v12, %s6009_s24  ;;  %v676_v56 = vadd.f32 %v6559_v4, %v675_v15 }
 0x283   : > { %v6579_v20 = vmul.f32 0.17677669, %v681_v17 }
 0x284   : > { %v4509_v18 = vpop.f32.mrb[6].mxu0  ;;  %v6638_v58 = vmul.f32 0.17677669, %v676_v56 }
 0x285   : > { %v685_v19 = vpop.f32.mrb[7].mxu0  ;;  %v691_v21 = vadd.f32 %v4509_v18, %v6559_v4 }
 0x286   : > { %1560 = vrot.lane.b32.xlu1 %v6574_v16, %s6009_s24  ;;  %v686_v59 = vadd.f32 %v6559_v4, %v685_v19 }
 0x287   : > { %v6584_v24 = vmul.f32 0.17677669, %v691_v21 }
 0x288   : > { %v4512_v22 = vpop.f32.mrb[8].mxu0  ;;  %v6645_v60 = vmul.f32 0.17677669, %v686_v59 }
 0x289   : > { %v695_v23 = vpop.f32.mrb[9].mxu0  ;;  %v701_v61 = vadd.f32 %v4512_v22, %v6559_v4 }
 0x28a   : > { %1564 = vrot.lane.b32.xlu1 %v6579_v20, %s6009_s24  ;;  %v696_v25 = vadd.f32 %v6559_v4, %v695_v23 }
 0x28b   : > { %v956_v62 = vmul.f32 0.17677669, %v701_v61 }
 0x28c   : > { %v4515_v26 = vpop.f32.mrb[10].mxu0  ;;  %v6589_v28 = vmul.f32 0.17677669, %v696_v25 }
 0x28d   : > { %v705_v27 = vpop.f32.mrb[11].mxu0  ;;  %v711_v63 = vadd.f32 %v4515_v26, %v6559_v4 }
 0x28e   : > { %1568 = vrot.lane.b32.xlu1 %v6584_v24, %s6009_s24  ;;  %v706_v29 = vadd.f32 %v6559_v4, %v705_v27 }
 0x28f   : > { %v958_v0 = vmul.f32 0.17677669, %v711_v63 }
 0x290   : > { %v4518_v30 = vpop.f32.mrb[12].mxu0  ;;  %v6597_v33 = vmul.f32 0.17677669, %v706_v29 }
 0x291   : > { %v715_v31 = vpop.f32.mrb[13].mxu0  ;;  %v721_v34 = vadd.f32 %v4518_v30, %v6559_v4 }
 0x292   : > { %v6593_v32 = vadd.f32 %v6559_v4, %v715_v31  ;;  %1570 = vrot.lane.b32.xlu1 %v6589_v28, %s6009_s24 }
 0x293   : > { %v6603_v39 = vmul.f32 0.17677669, %v721_v34 }
 0x294   : > { %v4521_v35 = vpop.f32.mrb[14].mxu0  ;;  %v6678_v1 = vmul.f32 0.17677669, %v6593_v32 }
 0x295   : > { %v725_v36 = vpop.f32.mrb[15].mxu0  ;;  %v731_v52 = vadd.f32 %v4521_v35, %v6559_v4 }
 0x296   : > { %v726_v37 = vadd.f32 %v6559_v4, %v725_v36  ;;  %1574 = vrot.lane.b32.xlu1 %v6597_v33, %s6009_s24  ;;  %v4061_v4 = vld [vmem:[#allocation15] ss:$0 sm:$0xff] }
 0x297   : > { %v6630_v57 = vmul.f32 0.17677669, %v731_v52  ;;  %v934_v6 = vadd.f32 %v4562_v3, %v4061_v4  ;;  %v929_v7 = vadd.f32 %v4061_v4, %v928_v5  ;;  %v939_v13 = vadd.f32 %v4061_v4, %v938_v11 }
 0x298   : > { %v4540_v40 = vpop.f32.mrb[16].mxu0  ;;  %v961_v2 = vmul.f32 0.17677669, %v726_v37 }
 0x299   : > { %v834_v41 = vadd.f32 %v4540_v40, %v4056_v38  ;;  %v828_v42 = vpop.f32.mrb[17].mxu0  ;;  %v6722_v10 = vpack.i.bf16 %v934_v6, %v929_v7  ;;  %v4954_v15 = vpack.c.bf16 %v934_v6, %v929_v7 }
 0x29a   : > { %v829_v43 = vadd.f32 %v4056_v38, %v828_v42  ;;  %1580 = vrot.lane.b32.xlu1 %v6603_v39, %s6009_s24 }
 0x29b   : > { %7877 = vst [vmem:[#allocation35_spill] sm:$0xff] %v6722_v10  ;;  %4955 = vmatprep.subr.bf16.mxu0 %v4954_v15 }
 0x29c   : > { %v4543_v45 = vpop.f32.mrb[18].mxu0  ;;  %v6613_v46 = vpack.i.bf16 %v834_v41, %v829_v43  ;;  %v4942_v47 = vpack.c.bf16 %v834_v41, %v829_v43  ;;  %4957 = vmatpush3.bf16.msra.mxu0 %v4954_v15 }
 0x29d   : > { %v844_v48 = vadd.f32 %v4543_v45, %v4056_v38  ;;  %v838_v49 = vpop.f32.mrb[19].mxu0 }
 0x29e   : > { %v839_v50 = vadd.f32 %v4056_v38, %v838_v49  ;;  %5250 = vrot.lane.b32.xlu0 %v6613_v46, %s6009_s24  ;;  %4944 = vmatprep.subr.msk.bf16.mxu1 %vm6609_vm2, %v4942_v47 }
 0x29f   : > { %4947 = vmatpush3.bf16.xpose.msk.msra.mxu1 %vm6609_vm2, %v4942_v47 }
 0x2a0   : > { %v5254_v53 = vpack.i.bf16 %v844_v48, %v839_v50  ;;  %v4948_v54 = vpack.c.bf16 %v844_v48, %v839_v50 }
 0x2a2   : > { %5255 = vrot.lane.b32.xlu0 %v5254_v53, %s6009_s24  ;;  %5265 = vrot.lane.b32.xlu1 %v5254_v53, %s6010_s27 }
 0x2a3   : > { %4950 = vmatprep.subr.msk.bf16.mxu1 %vm6609_vm2, %v4948_v54 }
 0x2a6   : > { %1558 = vrot.lane.b32.xlu0 %v6627_v55, %s6009_s24  ;;  %1584 = vrot.lane.b32.xlu1 %v6630_v57, %s6009_s24 }
 0x2a7   : > { %4953 = vmatpush3.bf16.xpose.msk.msra.mxu1 %vm6609_vm2, %v4948_v54 }
 0x2aa   : > { %1562 = vrot.lane.b32.xlu0 %v6638_v58, %s6009_s24  ;;  %2247 = vrot.lane.b32.xlu1 %v6569_v12, %s6010_s27 }
 0x2ae   : > { %1566 = vrot.lane.b32.xlu0 %v6645_v60, %s6009_s24  ;;  %2251 = vrot.lane.b32.xlu1 %v6574_v16, %s6010_s27 }
 0x2af   : > { %4575 = vmatmul.mubr.msk.f32.vlgmr.msra.gmra.mrb[4].mxu1 %vm963_vm1, %v6569_v12 }
 0x2b0   : > { %4577 = vmatprep.mubr.msk.f32.mxu1 %vm963_vm1, %v6627_v55 }
 0x2b2   : > { %5260 = vrot.lane.b32.xlu0 %v6613_v46, %s6010_s27  ;;  %2255 = vrot.lane.b32.xlu1 %v6579_v20, %s6010_s27 }
 0x2b3   : > { %4578 = vmatmul.mubr.msk.f32.gmra.mrb[6].mxu1 %vm963_vm1, %v6574_v16 }
 0x2b4   : > { %4580 = vmatprep.mubr.msk.f32.mxu1 %vm963_vm1, %v6638_v58 }
 0x2b6   : > { %1572 = vrot.lane.b32.xlu0 %v956_v62, %s6009_s24  ;;  %2259 = vrot.lane.b32.xlu1 %v6584_v24, %s6010_s27 }
 0x2b7   : > { %4581 = vmatmul.mubr.msk.f32.gmra.mrb[8].mxu1 %vm963_vm1, %v6579_v20 }
 0x2b8   : > { %4583 = vmatprep.mubr.msk.f32.mxu1 %vm963_vm1, %v6645_v60 }
 0x2ba   : > { %1576 = vrot.lane.b32.xlu0 %v958_v0, %s6009_s24  ;;  %2261 = vrot.lane.b32.xlu1 %v6589_v28, %s6010_s27 }
 0x2bb   : > { %4584 = vmatmul.mubr.msk.f32.gmra.mrb[10].mxu1 %vm963_vm1, %v6584_v24 }
 0x2bc   : > { %4586 = vmatprep.mubr.msk.f32.mxu1 %vm963_vm1, %v6589_v28 }
 0x2be   : > { %1578 = vrot.lane.b32.xlu0 %v6678_v1, %s6009_s24  ;;  %2265 = vrot.lane.b32.xlu1 %v6597_v33, %s6010_s27 }
 0x2bf   : > { %4587 = vmatmul.mubr.msk.f32.gmra.mrb[12].mxu1 %vm963_vm1, %v956_v62 }
 0x2c0   : > { %4589 = vmatprep.mubr.msk.f32.mxu1 %vm963_vm1, %v6597_v33 }
 0x2c2   : > { %1582 = vrot.lane.b32.xlu0 %v961_v2, %s6009_s24  ;;  %5275 = vrot.lane.b32.xlu1 %v5254_v53, %s6011_s0 }
 0x2c3   : > { %4590 = vmatmul.mubr.msk.f32.gmra.mrb[14].mxu1 %vm963_vm1, %v958_v0 }
 0x2c4   : > { %4592 = vmatprep.mubr.msk.f32.mxu1 %vm963_vm1, %v6678_v1 }
 0x2c6   : > { %2245 = vrot.lane.b32.xlu0 %v6563_v9, %s6010_s27  ;;  %2271 = vrot.lane.b32.xlu1 %v6603_v39, %s6010_s27 }
 0x2c7   : > { %4593 = vmatmul.mubr.msk.f32.gmra.mrb[16].mxu1 %vm963_vm1, %v6603_v39 }
 0x2c8   : > { %4595 = vmatprep.mubr.msk.f32.mxu1 %vm963_vm1, %v961_v2 }
 0x2ca   : > { %2249 = vrot.lane.b32.xlu0 %v6627_v55, %s6010_s27  ;;  %2275 = vrot.lane.b32.xlu1 %v6630_v57, %s6010_s27 }
 0x2cb   : > { %4596 = vmatmul.mubr.msk.f32.gmra.mrb[18].mxu1 %vm963_vm1, %v6630_v57 }
 0x2ce   : > { %2253 = vrot.lane.b32.xlu0 %v6638_v58, %s6010_s27  ;;  %2934 = vrot.lane.b32.xlu1 %v6569_v12, %s6011_s0  ;;  %v944_v12 = vadd.f32 %v4565_v8, %v4061_v4 }
 0x2d0   : > { %v6726_v14 = vpack.i.bf16 %v944_v12, %v939_v13 }
 0x2d2   : > { %2257 = vrot.lane.b32.xlu0 %v6645_v60, %s6010_s27  ;;  %2938 = vrot.lane.b32.xlu1 %v6574_v16, %s6011_s0  ;;  %7878 = vst [vmem:[#allocation36_spill] sm:$0xff] %v6726_v14  ;;  %v4958_v16 = vpack.c.bf16 %v944_v12, %v939_v13 }
 0x2d4   : > { %4959 = vmatprep.subr.bf16.mxu0 %v4958_v16 }
 0x2d5   : > { %4961 = vmatpush3.bf16.msra.mxu0 %v4958_v16 }
 0x2d6   : > { %5270 = vrot.lane.b32.xlu0 %v6613_v46, %s6011_s0  ;;  %2942 = vrot.lane.b32.xlu1 %v6579_v20, %s6011_s0 }
 0x2da   : > { %2263 = vrot.lane.b32.xlu0 %v956_v62, %s6010_s27  ;;  %2946 = vrot.lane.b32.xlu1 %v6584_v24, %s6011_s0 }
 0x2de   : > { %2267 = vrot.lane.b32.xlu0 %v958_v0, %s6010_s27  ;;  %2950 = vrot.lane.b32.xlu1 %v956_v62, %s6011_s0 }
 0x2e2   : > { %2269 = vrot.lane.b32.xlu0 %v6678_v1, %s6010_s27  ;;  %2954 = vrot.lane.b32.xlu1 %v958_v0, %s6011_s0 }
 0x2e6   : > { %2273 = vrot.lane.b32.xlu0 %v961_v2, %s6010_s27  ;;  %2958 = vrot.lane.b32.xlu1 %v6603_v39, %s6011_s0 }
 0x2ea   : > { %2932 = vrot.lane.b32.xlu0 %v6563_v9, %s6011_s0  ;;  %2962 = vrot.lane.b32.xlu1 %v6630_v57, %s6011_s0 }
 0x2ee   : > { %2936 = vrot.lane.b32.xlu0 %v6627_v55, %s6011_s0  ;;  %5280 = vrot.lane.b32.xlu1 %v6722_v10, %s6009_s24 }
 0x2f0   : > { %v1555_v17 = vpop.permute.xlu1 %1554 }
 0x2f1   : > { %4638 = vmatprep.mubr.msk.f32.mxu1 %vm963_vm1, %v1555_v17 }
 0x2f2   : > { %2940 = vrot.lane.b32.xlu0 %v6638_v58, %s6011_s0  ;;  %5290 = vrot.lane.b32.xlu1 %v6722_v10, %s6010_s27 }
 0x2f4   : > { %v1557_v9 = vpop.permute.xlu1 %1556 }
 0x2f6   : > { %2944 = vrot.lane.b32.xlu0 %v6645_v60, %s6011_s0 }
 0x2f8   : > { %v1561_v18 = vpop.permute.xlu1 %1560 }
 0x2fa   : > { %2948 = vrot.lane.b32.xlu0 %v6589_v28, %s6011_s0 }
 0x2fc   : > { %v1565_v19 = vpop.permute.xlu1 %1564 }
 0x2fe   : > { %2952 = vrot.lane.b32.xlu0 %v6597_v33, %s6011_s0 }
 0x300   : > { %v1569_v20 = vpop.permute.xlu1 %1568 }
 0x302   : > { %2956 = vrot.lane.b32.xlu0 %v6678_v1, %s6011_s0 }
 0x304   : > { %v1571_v21 = vpop.permute.xlu1 %1570 }
 0x306   : > { %2960 = vrot.lane.b32.xlu0 %v961_v2, %s6011_s0 }
 0x308   : > { %v1575_v22 = vpop.permute.xlu1 %1574 }
 0x30a   : > { %5285 = vrot.lane.b32.xlu0 %v6726_v14, %s6009_s24 }
 0x30c   : > { %v1581_v23 = vpop.permute.xlu1 %1580 }
 0x30e   : > { %5295 = vrot.lane.b32.xlu0 %v6726_v14, %s6010_s27 }
 0x310   : > { %v5251_v24 = vpop.permute.xlu0 %5250 }
 0x311   : > { %v5253_v25 = vunpack.i.h.bf16 %v5251_v24  ;;  %v5252_v26 = vunpack.i.l.bf16 %v5251_v24 }
 0x313   : > { %v4962_v27 = vpack.c.bf16 %v5253_v25, %v5252_v26 }
 0x314   : > { %v5256_v28 = vpop.permute.xlu0 %5255  ;;  %v5266_v29 = vpop.permute.xlu1 %5265 }
 0x315   : > { %v5258_v30 = vunpack.i.h.bf16 %v5256_v28  ;;  %v5257_v31 = vunpack.i.l.bf16 %v5256_v28  ;;  %4964 = vmatprep.subr.msk.bf16.mxu1 %vm6609_vm2, %v4962_v27  ;;  %v5268_v41 = vunpack.i.h.bf16 %v5266_v29  ;;  %v5267_v42 = vunpack.i.l.bf16 %v5266_v29 }
 0x316   : > { %4967 = vmatpush3.bf16.xpose.msk.msra.mxu1 %vm6609_vm2, %v4962_v27 }
 0x317   : > { %v4968_v32 = vpack.c.bf16 %v5258_v30, %v5257_v31  ;;  %v4988_v49 = vpack.c.bf16 %v5268_v41, %v5267_v42 }
 0x318   : > { %v1559_v33 = vpop.permute.xlu0 %1558  ;;  %v1585_v34 = vpop.permute.xlu1 %1584 }
 0x319   : > { %4970 = vmatprep.subr.msk.bf16.mxu1 %vm6609_vm2, %v4968_v32 }
 0x31c   : > { %v1563_v35 = vpop.permute.xlu0 %1562  ;;  %v2248_v36 = vpop.permute.xlu1 %2247 }
 0x31e   : > { %4973 = vmatpush3.bf16.xpose.msk.msra.mxu1 %vm6609_vm2, %v4968_v32 }
 0x320   : > { %v1567_v37 = vpop.permute.xlu0 %1566  ;;  %v2252_v38 = vpop.permute.xlu1 %2251 }
 0x324   : > { %v5261_v39 = vpop.permute.xlu0 %5260  ;;  %v2256_v40 = vpop.permute.xlu1 %2255 }
 0x325   : > { %v5263_v43 = vunpack.i.h.bf16 %v5261_v39  ;;  %v5262_v45 = vunpack.i.l.bf16 %v5261_v39  ;;  %4639 = vmatmul.mubr.msk.f32.vlgmr.msra.gmra.mrb[20].mxu1 %vm963_vm1, %v1557_v9 }
 0x326   : > { %4641 = vmatprep.mubr.msk.f32.mxu1 %vm963_vm1, %v1559_v33 }
 0x327   : > { %v4982_v46 = vpack.c.bf16 %v5263_v43, %v5262_v45 }
 0x328   : > { %v1573_v47 = vpop.permute.xlu0 %1572  ;;  %v2260_v48 = vpop.permute.xlu1 %2259 }
 0x329   : > { %4642 = vmatmul.mubr.msk.f32.gmra.mrb[22].mxu1 %vm963_vm1, %v1561_v18  ;;  %4984 = vmatprep.subr.msk.bf16.mxu1 %vm6609_vm2, %v4982_v46 }
 0x32a   : > { %4644 = vmatprep.mubr.msk.f32.mxu1 %vm963_vm1, %v1563_v35  ;;  %4987 = vmatpush3.bf16.xpose.msk.msra.mxu1 %vm6609_vm2, %v4982_v46 }
 0x32b   : > { %4990 = vmatprep.subr.msk.bf16.mxu1 %vm6609_vm2, %v4988_v49 }
 0x32c   : > { %v1577_v50 = vpop.permute.xlu0 %1576  ;;  %v2262_v51 = vpop.permute.xlu1 %2261 }
 0x32d   : > { %4645 = vmatmul.mubr.msk.f32.gmra.mrb[24].mxu1 %vm963_vm1, %v1565_v19 }
 0x32e   : > { %4647 = vmatprep.mubr.msk.f32.mxu1 %vm963_vm1, %v1567_v37 }
 0x330   : > { %v1579_v52 = vpop.permute.xlu0 %1578  ;;  %v2266_v53 = vpop.permute.xlu1 %2265 }
 0x331   : > { %4648 = vmatmul.mubr.msk.f32.gmra.mrb[26].mxu1 %vm963_vm1, %v1569_v20 }
 0x332   : > { %4650 = vmatprep.mubr.msk.f32.mxu1 %vm963_vm1, %v1571_v21  ;;  %4993 = vmatpush3.bf16.xpose.msk.msra.mxu1 %vm6609_vm2, %v4988_v49 }
 0x334   : > { %v1583_v54 = vpop.permute.xlu0 %1582  ;;  %v5276_v55 = vpop.permute.xlu1 %5275 }
 0x335   : > { %4651 = vmatmul.mubr.msk.f32.gmra.mrb[28].mxu1 %vm963_vm1, %v1573_v47  ;;  %v5278_v2 = vunpack.i.h.bf16 %v5276_v55  ;;  %v5277_v3 = vunpack.i.l.bf16 %v5276_v55 }
 0x336   : > { %4653 = vmatprep.mubr.msk.f32.mxu1 %vm963_vm1, %v1575_v22 }
 0x337   : > { %v5008_v11 = vpack.c.bf16 %v5278_v2, %v5277_v3 }
 0x338   : > { %v2246_v56 = vpop.permute.xlu0 %2245  ;;  %v2272_v57 = vpop.permute.xlu1 %2271 }
 0x339   : > { %4654 = vmatmul.mubr.msk.f32.gmra.mrb[30].mxu1 %vm963_vm1, %v1577_v50 }
 0x33a   : > { %4656 = vmatprep.mubr.msk.f32.mxu1 %vm963_vm1, %v1579_v52 }
 0x33c   : > { %v2250_v58 = vpop.permute.xlu0 %2249  ;;  %v2276_v59 = vpop.permute.xlu1 %2275 }
 0x33d   : > { %4657 = vmatmul.mubr.msk.f32.gmra.mrb[32].mxu1 %vm963_vm1, %v1581_v23 }
 0x33e   : > { %4659 = vmatprep.mubr.msk.f32.mxu1 %vm963_vm1, %v1583_v54 }
 0x340   : > { %v2254_v60 = vpop.permute.xlu0 %2253  ;;  %v2935_v61 = vpop.permute.xlu1 %2934 }
 0x341   : > { %4660 = vmatmul.mubr.msk.f32.gmra.mrb[34].mxu1 %vm963_vm1, %v1585_v34 }
 0x342   : > { %4702 = vmatprep.mubr.msk.f32.mxu1 %vm963_vm1, %v2246_v56 }
 0x344   : > { %v2258_v62 = vpop.permute.xlu0 %2257  ;;  %v2939_v63 = vpop.permute.xlu1 %2938 }
 0x345   : > { %4703 = vmatmul.mubr.msk.f32.vlgmr.msra.gmra.mrb[36].mxu1 %vm963_vm1, %v2248_v36 }
 0x346   : > { %4705 = vmatprep.mubr.msk.f32.mxu1 %vm963_vm1, %v2250_v58 }
 0x348   : > { %v5271_v0 = vpop.permute.xlu0 %5270  ;;  %v2943_v1 = vpop.permute.xlu1 %2942 }
 0x349   : > { %v5273_v4 = vunpack.i.h.bf16 %v5271_v0  ;;  %v5272_v5 = vunpack.i.l.bf16 %v5271_v0  ;;  %4706 = vmatmul.mubr.msk.f32.gmra.mrb[38].mxu1 %vm963_vm1, %v2252_v38 }
 0x34a   : > { %4708 = vmatprep.mubr.msk.f32.mxu1 %vm963_vm1, %v2254_v60 }
 0x34b   : > { %v5002_v6 = vpack.c.bf16 %v5273_v4, %v5272_v5 }
 0x34c   : > { %v2264_v7 = vpop.permute.xlu0 %2263  ;;  %v2947_v8 = vpop.permute.xlu1 %2946 }
 0x34d   : > { %4709 = vmatmul.mubr.msk.f32.gmra.mrb[40].mxu1 %vm963_vm1, %v2256_v40  ;;  %5004 = vmatprep.subr.msk.bf16.mxu1 %vm6609_vm2, %v5002_v6 }
 0x34e   : > { %4711 = vmatprep.mubr.msk.f32.mxu1 %vm963_vm1, %v2258_v62  ;;  %5007 = vmatpush3.bf16.xpose.msk.msra.mxu1 %vm6609_vm2, %v5002_v6 }
 0x34f   : > { %5010 = vmatprep.subr.msk.bf16.mxu1 %vm6609_vm2, %v5008_v11 }
 0x350   : > { %v2268_v12 = vpop.permute.xlu0 %2267  ;;  %v2951_v13 = vpop.permute.xlu1 %2950 }
 0x351   : > { %4712 = vmatmul.mubr.msk.f32.gmra.mrb[42].mxu1 %vm963_vm1, %v2260_v48 }
 0x352   : > { %4714 = vmatprep.mubr.msk.f32.mxu1 %vm963_vm1, %v2262_v51 }
 0x354   : > { %v2270_v15 = vpop.permute.xlu0 %2269  ;;  %v2955_v16 = vpop.permute.xlu1 %2954 }
 0x355   : > { %4715 = vmatmul.mubr.msk.f32.gmra.mrb[44].mxu1 %vm963_vm1, %v2264_v7 }
 0x356   : > { %4717 = vmatprep.mubr.msk.f32.mxu1 %vm963_vm1, %v2266_v53  ;;  %5013 = vmatpush3.bf16.xpose.msk.msra.mxu1 %vm6609_vm2, %v5008_v11 }
 0x358   : > { %v2274_v17 = vpop.permute.xlu0 %2273  ;;  %v2959_v9 = vpop.permute.xlu1 %2958 }
 0x359   : > { %4718 = vmatmul.mubr.msk.f32.gmra.mrb[46].mxu1 %vm963_vm1, %v2268_v12 }
 0x35a   : > { %4720 = vmatprep.mubr.msk.f32.mxu1 %vm963_vm1, %v2270_v15 }
 0x35c   : > { %v2933_v18 = vpop.permute.xlu0 %2932  ;;  %v2963_v19 = vpop.permute.xlu1 %2962 }
 0x35d   : > { %4721 = vmatmul.mubr.msk.f32.gmra.mrb[48].mxu1 %vm963_vm1, %v2272_v57 }
 0x35e   : > { %4723 = vmatprep.mubr.msk.f32.mxu1 %vm963_vm1, %v2274_v17 }
 0x360   : > { %v2937_v20 = vpop.permute.xlu0 %2936  ;;  %v5281_v21 = vpop.permute.xlu1 %5280 }
 0x361   : > { %4724 = vmatmul.mubr.msk.f32.gmra.mrb[50].mxu1 %vm963_vm1, %v2276_v59  ;;  %v5283_v22 = vunpack.i.h.bf16 %v5281_v21  ;;  %v5282_v23 = vunpack.i.l.bf16 %v5281_v21 }
 0x362   : > { %4766 = vmatprep.mubr.msk.f32.mxu1 %vm963_vm1, %v2933_v18 }
 0x363   : > { %v6816_v44 = vpack.c.bf16 %v5283_v22, %v5282_v23 }
 0x364   : > { %v2941_v24 = vpop.permute.xlu0 %2940  ;;  %v6942_v23 = vpop.permute.xlu1 %5290 }
 0x365   : > { %4767 = vmatmul.mubr.msk.f32.vlgmr.msra.gmra.mrb[52].mxu1 %vm963_vm1, %v2935_v61  ;;  %4975 = vmatprep.subr.bf16.mxu0 %v6816_v44 }
 0x366   : > { %4769 = vmatprep.mubr.msk.f32.mxu1 %vm963_vm1, %v2937_v20 }
 0x368   : > { %v2945_v25 = vpop.permute.xlu0 %2944 }
 0x369   : > { %4770 = vmatmul.mubr.msk.f32.gmra.mrb[54].mxu1 %vm963_vm1, %v2939_v63 }
 0x36a   : > { %4772 = vmatprep.mubr.msk.f32.mxu1 %vm963_vm1, %v2941_v24 }
 0x36c   : > { %v2949_v26 = vpop.permute.xlu0 %2948 }
 0x36d   : > { %4773 = vmatmul.mubr.msk.f32.gmra.mrb[56].mxu1 %vm963_vm1, %v2943_v1 }
 0x36e   : > { %4775 = vmatprep.mubr.msk.f32.mxu1 %vm963_vm1, %v2945_v25 }
 0x370   : > { %v2953_v27 = vpop.permute.xlu0 %2952 }
 0x371   : > { %4776 = vmatmul.mubr.msk.f32.gmra.mrb[58].mxu1 %vm963_vm1, %v2947_v8 }
 0x372   : > { %4778 = vmatprep.mubr.msk.f32.mxu1 %vm963_vm1, %v2949_v26 }
 0x374   : > { %v2957_v28 = vpop.permute.xlu0 %2956 }
 0x375   : > { %4779 = vmatmul.mubr.msk.f32.gmra.mrb[60].mxu1 %vm963_vm1, %v2951_v13 }
 0x376   : > { %4781 = vmatprep.mubr.msk.f32.mxu1 %vm963_vm1, %v2953_v27 }
 0x378   : > { %v2961_v29 = vpop.permute.xlu0 %2960 }
 0x379   : > { %4782 = vmatmul.mubr.msk.f32.gmra.mrb[62].mxu1 %vm963_vm1, %v2955_v16 }
 0x37a   : > { %4784 = vmatprep.mubr.msk.f32.mxu1 %vm963_vm1, %v2957_v28 }
 0x37d   : > { %4785 = vmatmul.mubr.msk.f32.gmra.mrb[64].mxu1 %vm963_vm1, %v2959_v9  ;;  %v6930_v9 = vpop.permute.xlu0 %5285 }
 0x37e   : > { %4787 = vmatprep.mubr.msk.f32.mxu1 %vm963_vm1, %v2961_v29 }
 0x381   : > { %4788 = vmatmul.mubr.msk.f32.gmra.mrb[66].mxu1 %vm963_vm1, %v2963_v19  ;;  %v6948_v26 = vpop.permute.xlu0 %5295 }
 0x382   : > { %v6834_v30 = vpop.f32.mrb[4].mxu1  ;;  %7879 = vst [vmem:[#allocation37_spill] sm:$0xff] %v6948_v26 }
 0x383   : > { %v6836_v31 = vpop.f32.mrb[5].mxu1  ;;  %v1172_v32 = vsel %vm963_vm1, %v6834_v30, -inf }
 0x384   : > { %1173 = vmax.xlane.f32.xlu1 %v1172_v32  ;;  %v1169_v33 = vsel %vm963_vm1, %v6836_v31, -inf }
 0x385   : > { %1170 = vmax.xlane.f32.xlu0 %v1169_v33 }
 0x386   : > { %v6842_v34 = vpop.f32.mrb[6].mxu1 }
 0x387   : > { %v6844_v35 = vpop.f32.mrb[7].mxu1  ;;  %v1178_v36 = vsel %vm963_vm1, %v6842_v34, -inf }
 0x388   : > { %v1175_v39 = vsel %vm963_vm1, %v6844_v35, -inf }
 0x389   : > { %1179 = vmax.xlane.f32.xlu0 %v1178_v36 }
 0x38a   : > { %v6848_v37 = vpop.f32.mrb[8].mxu1 }
 0x38b   : > { %v6850_v38 = vpop.f32.mrb[9].mxu1  ;;  %v1184_v43 = vsel %vm963_vm1, %v6848_v37, -inf }
 0x38c   : > { %v1181_v40 = vsel %vm963_vm1, %v6850_v38, -inf }
 0x38d   : > { %1176 = vmax.xlane.f32.xlu0 %v1175_v39  ;;  %1182 = vmax.xlane.f32.xlu1 %v1181_v40 }
 0x38e   : > { %v6856_v41 = vpop.f32.mrb[10].mxu1 }
 0x38f   : > { %v6858_v42 = vpop.f32.mrb[11].mxu1  ;;  %v1190_v48 = vsel %vm963_vm1, %v6856_v41, -inf }
 0x390   : > { %v1187_v45 = vsel %vm963_vm1, %v6858_v42, -inf }
 0x391   : > { %1185 = vmax.xlane.f32.xlu0 %v1184_v43  ;;  %1188 = vmax.xlane.f32.xlu1 %v1187_v45 }
 0x392   : > { %v6864_v46 = vpop.f32.mrb[12].mxu1 }
 0x393   : > { %v6866_v47 = vpop.f32.mrb[13].mxu1  ;;  %v1196_v52 = vsel %vm963_vm1, %v6864_v46, -inf }
 0x394   : > { %v1193_v49 = vsel %vm963_vm1, %v6866_v47, -inf }
 0x395   : > { %1191 = vmax.xlane.f32.xlu0 %v1190_v48  ;;  %1194 = vmax.xlane.f32.xlu1 %v1193_v49 }
 0x396   : > { %v6872_v50 = vpop.f32.mrb[14].mxu1 }
 0x397   : > { %v6874_v51 = vpop.f32.mrb[15].mxu1  ;;  %v1202_v56 = vsel %vm963_vm1, %v6872_v50, -inf }
 0x398   : > { %v1199_v53 = vsel %vm963_vm1, %v6874_v51, -inf }
 0x399   : > { %1197 = vmax.xlane.f32.xlu0 %v1196_v52  ;;  %1200 = vmax.xlane.f32.xlu1 %v1199_v53 }
 0x39a   : > { %v6880_v54 = vpop.f32.mrb[16].mxu1 }
 0x39b   : > { %v6882_v55 = vpop.f32.mrb[17].mxu1  ;;  %v1208_v60 = vsel %vm963_vm1, %v6880_v54, -inf }
 0x39c   : > { %v1205_v57 = vsel %vm963_vm1, %v6882_v55, -inf }
 0x39d   : > { %1203 = vmax.xlane.f32.xlu0 %v1202_v56  ;;  %1206 = vmax.xlane.f32.xlu1 %v1205_v57 }
 0x39e   : > { %v6888_v58 = vpop.f32.mrb[18].mxu1 }
 0x39f   : > { %v6890_v59 = vpop.f32.mrb[19].mxu1  ;;  %v1214_v62 = vsel %vm963_vm1, %v6888_v58, -inf }
 0x3a0   : > { %v1211_v61 = vsel %vm963_vm1, %v6890_v59, -inf }
 0x3a1   : > { %1209 = vmax.xlane.f32.xlu0 %v1208_v60  ;;  %1212 = vmax.xlane.f32.xlu1 %v1211_v61 }
 0x3a5   : > { %1215 = vmax.xlane.f32.xlu0 %v1214_v62 }
 0x3f8   : > { %v6898_v63 = vpop.f32.mrb[20].mxu1 }
 0x3f9   : > { %v6900_v0 = vpop.f32.mrb[21].mxu1  ;;  %v1782_v1 = vsel %vm963_vm1, %v6898_v63, -inf }
 0x3fa   : > { %1783 = vmax.xlane.f32.xlu0 %v1782_v1  ;;  %v1779_v2 = vsel %vm963_vm1, %v6900_v0, -inf }
 0x3fb   : > { %1780 = vmax.xlane.f32.xlu1 %v1779_v2 }
 0x3fc   : > { %v6906_v3 = vpop.f32.mrb[22].mxu1 }
 0x3fd   : > { %v6908_v4 = vpop.f32.mrb[23].mxu1  ;;  %v1788_v5 = vsel %vm963_vm1, %v6906_v3, -inf }
 0x3fe   : > { %1789 = vmax.xlane.f32.xlu0 %v1788_v5  ;;  %v1785_v6 = vsel %vm963_vm1, %v6908_v4, -inf }
 0x3ff   : > { %1786 = vmax.xlane.f32.xlu1 %v1785_v6 }
 0x400   : > { %v6914_v7 = vpop.f32.mrb[24].mxu1 }
 0x401   : > { %v6916_v8 = vpop.f32.mrb[25].mxu1  ;;  %v1794_v11 = vsel %vm963_vm1, %v6914_v7, -inf }
 0x402   : > { %1795 = vmax.xlane.f32.xlu0 %v1794_v11  ;;  %v1791_v12 = vsel %vm963_vm1, %v6916_v8, -inf }
 0x403   : > { %1792 = vmax.xlane.f32.xlu1 %v1791_v12 }
 0x404   : > { %v6922_v13 = vpop.f32.mrb[26].mxu1 }
 0x405   : > { %v6924_v15 = vpop.f32.mrb[27].mxu1  ;;  %v1800_v16 = vsel %vm963_vm1, %v6922_v13, -inf }
 0x406   : > { %1801 = vmax.xlane.f32.xlu0 %v1800_v16  ;;  %v1797_v17 = vsel %vm963_vm1, %v6924_v15, -inf }
 0x407   : > { %1798 = vmax.xlane.f32.xlu1 %v1797_v17 }
 0x408   : > { %v6932_v18 = vpop.f32.mrb[28].mxu1 }
 0x409   : > { %v6934_v19 = vpop.f32.mrb[29].mxu1  ;;  %v1806_v20 = vsel %vm963_vm1, %v6932_v18, -inf }
 0x40a   : > { %1807 = vmax.xlane.f32.xlu0 %v1806_v20  ;;  %v1803_v21 = vsel %vm963_vm1, %v6934_v19, -inf }
 0x40b   : > { %1804 = vmax.xlane.f32.xlu1 %v1803_v21 }
 0x40c   : > { %v6940_v22 = vpop.f32.mrb[30].mxu1 }
 0x40d   : > { %v6944_v24 = vpop.f32.mrb[31].mxu1  ;;  %v1812_v25 = vsel %vm963_vm1, %v6940_v22, -inf }
 0x40e   : > { %1813 = vmax.xlane.f32.xlu0 %v1812_v25  ;;  %v1809_v27 = vsel %vm963_vm1, %v6944_v24, -inf }
 0x40f   : > { %1810 = vmax.xlane.f32.xlu1 %v1809_v27 }
 0x410   : > { %v6952_v28 = vpop.f32.mrb[32].mxu1 }
 0x411   : > { %v1174_v29 = vpop.xlane.xlu1 %1173  ;;  %v6954_v32 = vpop.f32.mrb[33].mxu1  ;;  %v1818_v33 = vsel %vm963_vm1, %v6952_v28, -inf }
 0x412   : > { %v1218_v36 = vsub.f32 %v6834_v30, %v1174_v29  ;;  %v1171_v39 = vpop.xlane.xlu0 %1170  ;;  %1819 = vmax.xlane.f32.xlu0 %v1818_v33  ;;  %v1815_v40 = vsel %vm963_vm1, %v6954_v32, -inf }
 0x413   : > { %1816 = vmax.xlane.f32.xlu1 %v1815_v40  ;;  %v1217_v48 = vsub.f32 %v6836_v31, %v1171_v39 }
 0x414   : > { %v6961_v43 = vpop.f32.mrb[34].mxu1  ;;  %v1235_v45 = vmul.f32 1.442695, %v1218_v36 }
 0x415   : > { %v6964_v49 = vpop.f32.mrb[35].mxu1  ;;  %v1824_v52 = vsel %vm963_vm1, %v6961_v43, -inf  ;;  %v1233_v57 = vmul.f32 1.442695, %v1217_v48 }
 0x416   : > { %1825 = vmax.xlane.f32.xlu0 %v1824_v52  ;;  %v1821_v30 = vsel %vm963_vm1, %v6964_v49, -inf  ;;  %v1180_v53 = vpop.xlane.xlu0 %1179  ;;  %5309 = vpow2.f32 %v1235_v45 }
 0x417   : > { %1822 = vmax.xlane.f32.xlu1 %v1821_v30  ;;  %5311 = vpow2.f32 %v1233_v57  ;;  %v1220_v1 = vsub.f32 %v6842_v34, %v1180_v53 }
 0x418   : > { %v6970_v56 = vpop.f32.mrb[36].mxu1 }
 0x419   : > { %v6972_v60 = vpop.f32.mrb[37].mxu1  ;;  %v2473_v31 = vsel %vm963_vm1, %v6970_v56, -inf  ;;  %v1239_v16 = vmul.f32 1.442695, %v1220_v1 }
 0x41a   : > { %2474 = vmax.xlane.f32.xlu0 %v2473_v31  ;;  %v2470_v61 = vsel %vm963_vm1, %v6972_v60, -inf  ;;  %v1177_v6 = vpop.xlane.xlu0 %1176  ;;  %v1183_v53 = vpop.xlane.xlu1 %1182 }
 0x41b   : > { %2471 = vmax.xlane.f32.xlu1 %v2470_v61  ;;  %v1219_v17 = vsub.f32 %v6844_v35, %v1177_v6  ;;  %5313 = vpow2.f32 %v1239_v16  ;;  %v1221_v61 = vsub.f32 %v6850_v38, %v1183_v53 }
 0x41c   : > { %v6978_v62 = vpop.f32.mrb[38].mxu1 }
 0x41d   : > { %v6981_v2 = vpop.f32.mrb[39].mxu1  ;;  %v2479_v5 = vsel %vm963_vm1, %v6978_v62, -inf  ;;  %v1237_v29 = vmul.f32 1.442695, %v1219_v17  ;;  %v1241_v17 = vmul.f32 1.442695, %v1221_v61 }
 0x41e   : > { %2480 = vmax.xlane.f32.xlu0 %v2479_v5  ;;  %v2476_v11 = vsel %vm963_vm1, %v6981_v2, -inf  ;;  %v1186_v36 = vpop.xlane.xlu0 %1185  ;;  %v1189_v53 = vpop.xlane.xlu1 %1188 }
 0x41f   : > { %2477 = vmax.xlane.f32.xlu1 %v2476_v11  ;;  %5315 = vpow2.f32 %v1237_v29  ;;  %v1222_v48 = vsub.f32 %v6848_v37, %v1186_v36 }
 0x420   : > { %v6987_v12 = vpop.f32.mrb[40].mxu1  ;;  %v6996_v25 = vpop.eup %5309 }
 0x421   : > { %v6990_v20 = vpop.f32.mrb[41].mxu1  ;;  %v2485_v34 = vsel %vm963_vm1, %v6987_v12, -inf  ;;  %v1268_v39 = vsel %vm963_vm1, %v6996_v25, 0.0  ;;  %v7006_v40 = vpop.eup %5311  ;;  %v1243_v1 = vmul.f32 1.442695, %v1222_v48 }
 0x422   : > { %2486 = vmax.xlane.f32.xlu0 %v2485_v34  ;;  %v2482_v21 = vsel %vm963_vm1, %v6990_v20, -inf  ;;  %v1265_v57 = vsel %vm963_vm1, %v7006_v40, 0.0 }
 0x423   : > { %2483 = vmax.xlane.f32.xlu1 %v2482_v21  ;;  %5317 = vpow2.f32 %v1243_v1  ;;  %v1192_v21 = vpop.xlane.xlu0 %1191  ;;  %v1223_v1 = vsub.f32 %v6858_v42, %v1189_v53 }
 0x424   : > { %v6998_v27 = vpop.f32.mrb[42].mxu1  ;;  %5319 = vpow2.f32 %v1241_v17 }
 0x425   : > { %v7000_v33 = vpop.f32.mrb[43].mxu1  ;;  %v2491_v35 = vsel %vm963_vm1, %v6998_v27, -inf  ;;  %v7026_v11 = vpop.eup %5313 }
 0x426   : > { %2492 = vmax.xlane.f32.xlu0 %v2491_v35  ;;  %v2488_v6 = vsel %vm963_vm1, %v7000_v33, -inf  ;;  %v1274_v29 = vsel %vm963_vm1, %v7026_v11, 0.0 }
 0x427   : > { %1269 = vadd.xlane.f32.xlu1 %v1268_v39  ;;  %v1224_v39 = vsub.f32 %v6856_v41, %v1192_v21  ;;  %v1198_v17 = vpop.xlane.xlu0 %1197 }
 0x428   : > { %v7008_v45 = vpop.f32.mrb[44].mxu1  ;;  %v1226_v42 = vsub.f32 %v6864_v46, %v1198_v17 }
 0x429   : > { %v7011_v52 = vpop.f32.mrb[45].mxu1  ;;  %v2497_v30 = vsel %vm963_vm1, %v7008_v45, -inf  ;;  %v7036_v35 = vpop.eup %5315 }
 0x42a   : > { %2498 = vmax.xlane.f32.xlu0 %v2497_v30 }
 0x42b   : > { %1266 = vadd.xlane.f32.xlu1 %v1265_v57  ;;  %v1271_v57 = vsel %vm963_vm1, %v7036_v35, 0.0  ;;  %v1204_v14 = vpop.xlane.xlu0 %1203 }
 0x42c   : > { %v7017_v31 = vpop.f32.mrb[46].mxu1 }
 0x42d   : > { %v7020_v5 = vpop.f32.mrb[47].mxu1  ;;  %v2503_v37 = vsel %vm963_vm1, %v7017_v31, -inf  ;;  %v7056_v21 = vpop.eup %5317 }
 0x42e   : > { %7880 = vst [vmem:[#allocation38_spill] sm:$0xff] %v7020_v5  ;;  %2504 = vmax.xlane.f32.xlu0 %v2503_v37  ;;  %v1247_v37 = vmul.f32 1.442695, %v1224_v39  ;;  %7882 = vst [vmem:[#allocation40_spill] sm:$0xff] %v7056_v21  ;;  %v7067_v26 = vpop.eup %5319 }
 0x42f   : > { %2489 = vmax.xlane.f32.xlu1 %v2488_v6  ;;  %7885 = vst [vmem:[#allocation43_spill] sm:$0xff] %v7067_v26 }
 0x430   : > { %v7028_v16 = vpop.f32.mrb[48].mxu1  ;;  %5321 = vpow2.f32 %v1247_v37  ;;  %v1251_v37 = vmul.f32 1.442695, %v1226_v42 }
 0x431   : > { %v7030_v34 = vpop.f32.mrb[49].mxu1  ;;  %v2509_v38 = vsel %vm963_vm1, %v7028_v16, -inf }
 0x432   : > { %2510 = vmax.xlane.f32.xlu0 %v2509_v38  ;;  %v2506_v30 = vsel %vm963_vm1, %v7030_v34, -inf  ;;  %v2494_v38 = vsel %vm963_vm1, %v7011_v52, -inf }
 0x433   : > { %1275 = vadd.xlane.f32.xlu1 %v1274_v29 }
 0x434   : > { %v7038_v36 = vpop.f32.mrb[50].mxu1 }
 0x435   : > { %v7041_v48 = vpop.f32.mrb[51].mxu1  ;;  %v2515_v41 = vsel %vm963_vm1, %v7038_v36, -inf }
 0x436   : > { %2507 = vmax.xlane.f32.xlu0 %v2506_v30  ;;  %v1245_v30 = vmul.f32 1.442695, %v1223_v1  ;;  %v2512_v53 = vsel %vm963_vm1, %v7041_v48, -inf }
 0x437   : > { %1272 = vadd.xlane.f32.xlu1 %v1271_v57  ;;  %v1195_v57 = vpop.xlane.xlu1 %1194 }
 0x438   : > { %v7047_v61 = vpop.f32.mrb[52].mxu1  ;;  %5323 = vpow2.f32 %v1245_v30  ;;  %v1225_v1 = vsub.f32 %v6866_v47, %v1195_v57  ;;  %v1228_v30 = vsub.f32 %v6872_v50, %v1204_v14  ;;  %v2500_v57 = vsel %vm963_vm1, %v7020_v5, -inf }
 0x439   : > { %7881 = vst [vmem:[#allocation39_spill] sm:$0xff] %v7047_v61  ;;  %v7050_v6 = vpop.f32.mrb[53].mxu1  ;;  %v3160_v17 = vsel %vm963_vm1, %v7047_v61, -inf  ;;  %5325 = vpow2.f32 %v1251_v37 }
 0x43a   : > { %2516 = vmax.xlane.f32.xlu0 %v2515_v41  ;;  %v1280_v41 = vsel %vm963_vm1, %v7056_v21, 0.0  ;;  %v3157_v47 = vsel %vm963_vm1, %v7050_v6, -inf  ;;  %v1255_v37 = vmul.f32 1.442695, %v1228_v30 }
 0x43b   : > { %2495 = vmax.xlane.f32.xlu1 %v2494_v38  ;;  %v1201_v42 = vpop.xlane.xlu1 %1200 }
 0x43c   : > { %v7058_v29 = vpop.f32.mrb[54].mxu1 }
 0x43d   : > { %7883 = vst [vmem:[#allocation41_spill] sm:$0xff] %v7058_v29  ;;  %v7061_v39 = vpop.f32.mrb[55].mxu1  ;;  %v3166_v50 = vsel %vm963_vm1, %v7058_v29, -inf }
 0x43e   : > { %7884 = vst [vmem:[#allocation42_spill] sm:$0xff] %v7061_v39  ;;  %2513 = vmax.xlane.f32.xlu0 %v2512_v53  ;;  %v1277_v53 = vsel %vm963_vm1, %v7067_v26, 0.0  ;;  %v1210_v26 = vpop.xlane.xlu0 %1209  ;;  %v3163_v30 = vsel %vm963_vm1, %v7061_v39, -inf }
 0x43f   : > { %1281 = vadd.xlane.f32.xlu1 %v1280_v41  ;;  %v1249_v41 = vmul.f32 1.442695, %v1225_v1  ;;  %v1227_v1 = vsub.f32 %v6874_v51, %v1201_v42  ;;  %v1230_v51 = vsub.f32 %v6880_v54, %v1210_v26  ;;  %v1207_v42 = vpop.xlane.xlu1 %1206 }
 0x440   : > { %v7069_v38 = vpop.f32.mrb[56].mxu1 }
 0x441   : > { %v7072_v46 = vpop.f32.mrb[57].mxu1  ;;  %5327 = vpow2.f32 %v1249_v41  ;;  %v1253_v5 = vmul.f32 1.442695, %v1227_v1  ;;  %v1229_v1 = vsub.f32 %v6882_v55, %v1207_v42  ;;  %v3172_v26 = vsel %vm963_vm1, %v7069_v38, -inf }
 0x442   : > { %3161 = vmax.xlane.f32.xlu0 %v3160_v17  ;;  %v7087_v17 = vpop.eup %5321  ;;  %5329 = vpow2.f32 %v1255_v37  ;;  %v1259_v37 = vmul.f32 1.442695, %v1230_v51  ;;  %v1216_v39 = vpop.xlane.xlu0 %1215  ;;  %v3169_v51 = vsel %vm963_vm1, %v7072_v46, -inf }
 0x443   : > { %1278 = vadd.xlane.f32.xlu1 %v1277_v53  ;;  %7886 = vst [vmem:[#allocation44_spill] sm:$0xff] %v7087_v17  ;;  %v7098_v61 = vpop.eup %5323  ;;  %5331 = vpow2.f32 %v1253_v5  ;;  %v1257_v29 = vmul.f32 1.442695, %v1229_v1  ;;  %v1232_v55 = vsub.f32 %v6888_v58, %v1216_v39  ;;  %v1213_v42 = vpop.xlane.xlu1 %1212 }
 0x444   : > { %v7078_v10 = vpop.f32.mrb[58].mxu1  ;;  %7887 = vst [vmem:[#allocation45_spill] sm:$0xff] %v7098_v61  ;;  %5333 = vpow2.f32 %v1259_v37 }
 0x445   : > { %v7081_v21 = vpop.f32.mrb[59].mxu1  ;;  %5335 = vpow2.f32 %v1257_v29  ;;  %v1263_v1 = vmul.f32 1.442695, %v1232_v55  ;;  %v3178_v58 = vsel %vm963_vm1, %v7078_v10, -inf }
 0x446   : > { %3158 = vmax.xlane.f32.xlu0 %v3157_v47  ;;  %v1286_v47 = vsel %vm963_vm1, %v7087_v17, 0.0  ;;  %v7109_v17 = vpop.eup %5325 }
 0x447   : > { %2501 = vmax.xlane.f32.xlu1 %v2500_v57  ;;  %7888 = vst [vmem:[#allocation46_spill] sm:$0xff] %v7109_v17  ;;  %5337 = vpow2.f32 %v1263_v1 }
 0x448   : > { %v7089_v53 = vpop.f32.mrb[60].mxu1 }
 0x449   : > { %v7092_v14 = vpop.f32.mrb[61].mxu1  ;;  %v3184_v55 = vsel %vm963_vm1, %v7089_v53, -inf }
 0x44a   : > { %3167 = vmax.xlane.f32.xlu0 %v3166_v50  ;;  %v1283_v50 = vsel %vm963_vm1, %v7098_v61, 0.0 }
 0x44b   : > { %1287 = vadd.xlane.f32.xlu1 %v1286_v47  ;;  %v7120_v61 = vpop.eup %5327 }
 0x44c   : > { %v7100_v57 = vpop.f32.mrb[62].mxu1  ;;  %7891 = vst [vmem:[#allocation49_spill] sm:$0xff] %v7120_v61 }
 0x44d   : > { %v7103_v41 = vpop.f32.mrb[63].mxu1 }
 0x44e   : > { %3164 = vmax.xlane.f32.xlu0 %v3163_v30  ;;  %v1292_v30 = vsel %vm963_vm1, %v7109_v17, 0.0  ;;  %v7131_v17 = vpop.eup %5329 }
 0x44f   : > { %1284 = vadd.xlane.f32.xlu1 %v1283_v50  ;;  %v1298_v39 = vsel %vm963_vm1, %v7131_v17, 0.0  ;;  %v7138_v37 = vpop.eup %5331 }
 0x450   : > { %v7111_v47 = vpop.f32.mrb[64].mxu1  ;;  %v7144_v29 = vpop.eup %5333 }
 0x451   : > { %7889 = vst [vmem:[#allocation47_spill] sm:$0xff] %v7111_v47  ;;  %v7114_v54 = vpop.f32.mrb[65].mxu1  ;;  %7894 = vst [vmem:[#allocation52_spill] sm:$0xff] %v7144_v29 }
 0x452   : > { %7890 = vst [vmem:[#allocation48_spill] sm:$0xff] %v7114_v54  ;;  %3173 = vmax.xlane.f32.xlu0 %v3172_v26  ;;  %v1289_v26 = vsel %vm963_vm1, %v7120_v61, 0.0  ;;  %v3175_v61 = vsel %vm963_vm1, %v7081_v21, -inf }
 0x453   : > { %1293 = vadd.xlane.f32.xlu1 %v1292_v30  ;;  %v1231_v30 = vsub.f32 %v6890_v59, %v1213_v42  ;;  %v1295_v59 = vsel %vm963_vm1, %v7138_v37, 0.0  ;;  %v1304_v42 = vsel %vm963_vm1, %v7144_v29, 0.0 }
 0x454   : > { %v7122_v50 = vpop.f32.mrb[66].mxu1 }
 0x455   : > { %7892 = vst [vmem:[#allocation50_spill] sm:$0xff] %v7122_v50  ;;  %v7125_v5 = vpop.f32.mrb[67].mxu1 }
 0x456   : > { %7893 = vst [vmem:[#allocation51_spill] sm:$0xff] %v7125_v5  ;;  %3170 = vmax.xlane.f32.xlu0 %v3169_v51  ;;  %v1261_v51 = vmul.f32 1.442695, %v1231_v30 }
 0x457   : > { %1290 = vadd.xlane.f32.xlu1 %v1289_v26  ;;  %v7150_v26 = vpop.eup %5335 }
 0x458   : > { %5339 = vpow2.f32 %v1261_v51  ;;  %v1301_v30 = vsel %vm963_vm1, %v7150_v26, 0.0  ;;  %v7156_v1 = vpop.eup %5337 }
 0x459   : > { %7895 = vst [vmem:[#allocation53_spill] sm:$0xff] %v7156_v1 }
 0x45a   : > { %3179 = vmax.xlane.f32.xlu0 %v3178_v58  ;;  %v3190_v58 = vsel %vm963_vm1, %v7100_v57, -inf }
 0x45b   : > { %1299 = vadd.xlane.f32.xlu1 %v1298_v39  ;;  %v1310_v39 = vsel %vm963_vm1, %v7156_v1, 0.0 }
 0x45e   : > { %3176 = vmax.xlane.f32.xlu0 %v3175_v61  ;;  %v3181_v61 = vsel %vm963_vm1, %v7092_v14, -inf }
 0x45f   : > { %1296 = vadd.xlane.f32.xlu1 %v1295_v59  ;;  %v3187_v59 = vsel %vm963_vm1, %v7103_v41, -inf }
 0x462   : > { %3185 = vmax.xlane.f32.xlu0 %v3184_v55  ;;  %v7162_v51 = vpop.eup %5339 }
 0x463   : > { %1305 = vadd.xlane.f32.xlu1 %v1304_v42  ;;  %7896 = vst [vmem:[#allocation54_spill] sm:$0xff] %v7162_v51  ;;  %v1307_v55 = vsel %vm963_vm1, %v7162_v51, 0.0  ;;  %v3196_v42 = vsel %vm963_vm1, %v7111_v47, -inf }
 0x466   : > { %3182 = vmax.xlane.f32.xlu0 %v3181_v61  ;;  %v3193_v61 = vsel %vm963_vm1, %v7114_v54, -inf }
 0x467   : > { %1302 = vadd.xlane.f32.xlu1 %v1301_v30  ;;  %v3202_v30 = vsel %vm963_vm1, %v7122_v50, -inf }
 0x46a   : > { %3191 = vmax.xlane.f32.xlu0 %v3190_v58  ;;  %v3199_v58 = vsel %vm963_vm1, %v7125_v5, -inf }
 0x46b   : > { %1311 = vadd.xlane.f32.xlu1 %v1310_v39 }
 0x46e   : > { %3188 = vmax.xlane.f32.xlu0 %v3187_v59 }
 0x46f   : > { %1308 = vadd.xlane.f32.xlu1 %v1307_v55 }
 0x472   : > { %3197 = vmax.xlane.f32.xlu0 %v3196_v42 }
 0x476   : > { %3194 = vmax.xlane.f32.xlu0 %v3193_v61 }
 0x47a   : > { %3203 = vmax.xlane.f32.xlu0 %v3202_v30 }
 0x47e   : > { %3200 = vmax.xlane.f32.xlu0 %v3199_v58 }
 0x487   : > { %v1784_v39 = vpop.xlane.xlu0 %1783 }
 0x488   : > { %v1828_v59 = vsub.f32 %v6898_v63, %v1784_v39  ;;  %v1781_v55 = vpop.xlane.xlu1 %1780 }
 0x489   : > { %v1827_v1 = vsub.f32 %v6900_v0, %v1781_v55 }
 0x48a   : > { %v1845_v47 = vmul.f32 1.442695, %v1828_v59 }
 0x48b   : > { %v1843_v42 = vmul.f32 1.442695, %v1827_v1  ;;  %v1790_v51 = vpop.xlane.xlu0 %1789 }
 0x48c   : > { %5341 = vpow2.f32 %v1845_v47  ;;  %v1830_v61 = vsub.f32 %v6906_v3, %v1790_v51  ;;  %v1787_v54 = vpop.xlane.xlu1 %1786 }
 0x48d   : > { %5343 = vpow2.f32 %v1843_v42  ;;  %v1829_v30 = vsub.f32 %v6908_v4, %v1787_v54 }
 0x48e   : > { %v1849_v50 = vmul.f32 1.442695, %v1830_v61 }
 0x48f   : > { %v1796_v29 = vpop.xlane.xlu0 %1795  ;;  %v1847_v63 = vmul.f32 1.442695, %v1829_v30 }
 0x490   : > { %v1832_v58 = vsub.f32 %v6914_v7, %v1796_v29  ;;  %v1793_v5 = vpop.xlane.xlu1 %1792  ;;  %5345 = vpow2.f32 %v1849_v50 }
 0x491   : > { %v1831_v0 = vsub.f32 %v6916_v8, %v1793_v5 }
 0x492   : > { %v1853_v39 = vmul.f32 1.442695, %v1832_v58 }
 0x493   : > { %v1802_v59 = vpop.xlane.xlu0 %1801  ;;  %v1851_v51 = vmul.f32 1.442695, %v1831_v0 }
 0x494   : > { %5347 = vpow2.f32 %v1853_v39  ;;  %v1834_v47 = vsub.f32 %v6922_v13, %v1802_v59  ;;  %v1799_v1 = vpop.xlane.xlu1 %1798 }
 0x495   : > { %5349 = vpow2.f32 %v1847_v63  ;;  %v1833_v4 = vsub.f32 %v6924_v15, %v1799_v1 }
 0x496   : > { %v7183_v3 = vpop.eup %5341  ;;  %v1857_v55 = vmul.f32 1.442695, %v1834_v47 }
 0x497   : > { %v1808_v54 = vpop.xlane.xlu0 %1807  ;;  %v1878_v7 = vsel %vm963_vm1, %v7183_v3, 0.0  ;;  %v7188_v50 = vpop.eup %5343  ;;  %v1855_v29 = vmul.f32 1.442695, %v1833_v4 }
 0x498   : > { %5351 = vpow2.f32 %v1857_v55  ;;  %v1836_v8 = vsub.f32 %v6932_v18, %v1808_v54  ;;  %1879 = vadd.xlane.f32.xlu1 %v1878_v7  ;;  %v1805_v5 = vpop.xlane.xlu1 %1804  ;;  %v1875_v15 = vsel %vm963_vm1, %v7188_v50, 0.0 }
 0x499   : > { %v1835_v13 = vsub.f32 %v6934_v19, %v1805_v5  ;;  %5353 = vpow2.f32 %v1851_v51 }
 0x49a   : > { %v1861_v42 = vmul.f32 1.442695, %v1836_v8  ;;  %v7194_v30 = vpop.eup %5345 }
 0x49b   : > { %v1814_v61 = vpop.xlane.xlu0 %1813  ;;  %v1859_v39 = vmul.f32 1.442695, %v1835_v13  ;;  %v1884_v51 = vsel %vm963_vm1, %v7194_v30, 0.0 }
 0x49c   : > { %5355 = vpow2.f32 %v1861_v42  ;;  %v1838_v58 = vsub.f32 %v6940_v22, %v1814_v61  ;;  %1876 = vadd.xlane.f32.xlu1 %v1875_v15  ;;  %v1811_v63 = vpop.xlane.xlu1 %1810 }
 0x49d   : > { %v1837_v18 = vsub.f32 %v6944_v24, %v1811_v63  ;;  %5357 = vpow2.f32 %v1855_v29 }
 0x49e   : > { %v7198_v0 = vpop.eup %5347  ;;  %v1865_v19 = vmul.f32 1.442695, %v1838_v58 }
 0x49f   : > { %v1863_v59 = vmul.f32 1.442695, %v1837_v18  ;;  %v1820_v47 = vpop.xlane.xlu0 %1819  ;;  %v1890_v1 = vsel %vm963_vm1, %v7198_v0, 0.0  ;;  %v7204_v55 = vpop.eup %5349 }
 0x4a0   : > { %5359 = vpow2.f32 %v1865_v19  ;;  %v1840_v22 = vsub.f32 %v6952_v28, %v1820_v47  ;;  %1891 = vadd.xlane.f32.xlu0 %v1890_v1  ;;  %1885 = vadd.xlane.f32.xlu1 %v1884_v51  ;;  %v1817_v24 = vpop.xlane.xlu1 %1816  ;;  %v1881_v29 = vsel %vm963_vm1, %v7204_v55, 0.0 }
 0x4a1   : > { %5361 = vpow2.f32 %v1859_v39  ;;  %v1839_v4 = vsub.f32 %v6954_v32, %v1817_v24 }
 0x4a2   : > { %v7208_v54 = vpop.eup %5351  ;;  %5363 = vpow2.f32 %v1863_v59  ;;  %v1869_v7 = vmul.f32 1.442695, %v1840_v22 }
 0x4a3   : > { %v1867_v8 = vmul.f32 1.442695, %v1839_v4  ;;  %v1826_v5 = vpop.xlane.xlu0 %1825  ;;  %v1896_v13 = vsel %vm963_vm1, %v7208_v54, 0.0  ;;  %v7214_v42 = vpop.eup %5353 }
 0x4a4   : > { %v1842_v28 = vsub.f32 %v6961_v43, %v1826_v5  ;;  %1897 = vadd.xlane.f32.xlu0 %v1896_v13  ;;  %1882 = vadd.xlane.f32.xlu1 %v1881_v29  ;;  %v1823_v61 = vpop.xlane.xlu1 %1822  ;;  %5365 = vpow2.f32 %v1869_v7  ;;  %v1887_v18 = vsel %vm963_vm1, %v7214_v42, 0.0 }
 0x4a5   : > { %5367 = vpow2.f32 %v1867_v8  ;;  %v1841_v58 = vsub.f32 %v6964_v49, %v1823_v61 }
 0x4a6   : > { %v7217_v32 = vpop.eup %5355  ;;  %v1873_v15 = vmul.f32 1.442695, %v1842_v28 }
 0x4a7   : > { %v2475_v63 = vpop.xlane.xlu0 %2474  ;;  %v1902_v39 = vsel %vm963_vm1, %v7217_v32, 0.0  ;;  %v7224_v19 = vpop.eup %5357  ;;  %v1871_v1 = vmul.f32 1.442695, %v1841_v58 }
 0x4a8   : > { %v2519_v43 = vsub.f32 %v6970_v56, %v2475_v63  ;;  %1903 = vadd.xlane.f32.xlu0 %v1902_v39  ;;  %1888 = vadd.xlane.f32.xlu1 %v1887_v18  ;;  %v2472_v59 = vpop.xlane.xlu1 %2471  ;;  %5369 = vpow2.f32 %v1873_v15  ;;  %v1893_v7 = vsel %vm963_vm1, %v7224_v19, 0.0 }
 0x4a9   : > { %v2518_v49 = vsub.f32 %v6972_v60, %v2472_v59 }
 0x4aa   : > { %v7227_v47 = vpop.eup %5359  ;;  %v2536_v51 = vmul.f32 1.442695, %v2519_v43 }
 0x4ab   : > { %v7230_v22 = vpop.eup %5361  ;;  %v2481_v24 = vpop.xlane.xlu0 %2480  ;;  %v1908_v4 = vsel %vm963_vm1, %v7227_v47, 0.0  ;;  %v2534_v13 = vmul.f32 1.442695, %v2518_v49 }
 0x4ac   : > { %v7236_v56 = vpop.eup %5363  ;;  %5371 = vpow2.f32 %v2536_v51  ;;  %v2521_v8 = vsub.f32 %v6978_v62, %v2481_v24  ;;  %1909 = vadd.xlane.f32.xlu0 %v1908_v4  ;;  %1894 = vadd.xlane.f32.xlu1 %v1893_v7  ;;  %v2478_v5 = vpop.xlane.xlu1 %2477  ;;  %v1899_v15 = vsel %vm963_vm1, %v7230_v22, 0.0 }
 0x4ad   : > { %5373 = vpow2.f32 %v1871_v1  ;;  %v2520_v29 = vsub.f32 %v6981_v2, %v2478_v5  ;;  %v1905_v58 = vsel %vm963_vm1, %v7236_v56, 0.0 }
 0x4ae   : > { %v2540_v60 = vmul.f32 1.442695, %v2521_v8  ;;  %v7240_v28 = vpop.eup %5365 }
 0x4af   : > { %v2487_v61 = vpop.xlane.xlu0 %2486  ;;  %v7246_v63 = vpop.eup %5367  ;;  %v2538_v18 = vmul.f32 1.442695, %v2520_v29  ;;  %v1914_v1 = vsel %vm963_vm1, %v7240_v28, 0.0 }
 0x4b0   : > { %5375 = vpow2.f32 %v2540_v60  ;;  %v2523_v62 = vsub.f32 %v6987_v12, %v2487_v61  ;;  %1900 = vadd.xlane.f32.xlu1 %v1899_v15  ;;  %1906 = vadd.xlane.f32.xlu0 %v1905_v58  ;;  %v2484_v39 = vpop.xlane.xlu1 %2483  ;;  %v1911_v51 = vsel %vm963_vm1, %v7246_v63, 0.0 }
 0x4b1   : > { %5377 = vpow2.f32 %v2534_v13  ;;  %v2522_v43 = vsub.f32 %v6990_v20, %v2484_v39 }
 0x4b2   : > { %v2544_v2 = vmul.f32 1.442695, %v2523_v62  ;;  %v7254_v49 = vpop.eup %5369 }
 0x4b3   : > { %v2493_v59 = vpop.xlane.xlu0 %2492  ;;  %v2542_v20 = vmul.f32 1.442695, %v2522_v43  ;;  %v1920_v13 = vsel %vm963_vm1, %v7254_v49, 0.0 }
 0x4b4   : > { %5379 = vpow2.f32 %v2544_v2  ;;  %v2525_v12 = vsub.f32 %v6998_v27, %v2493_v59  ;;  %1915 = vadd.xlane.f32.xlu0 %v1914_v1  ;;  %1912 = vadd.xlane.f32.xlu1 %v1911_v51  ;;  %v1270_v24 = vpop.xlane.xlu1 %1269 }
 0x4b5   : > { %5381 = vpow2.f32 %v2538_v18 }
 0x4b6   : > { %v7257_v4 = vpop.eup %5371  ;;  %v2548_v7 = vmul.f32 1.442695, %v2525_v12  ;;  %5383 = vrcp.f32 %v1270_v24 }
 0x4b7   : > { %v2499_v8 = vpop.xlane.xlu0 %2498  ;;  %v2569_v5 = vsel %vm963_vm1, %v7257_v4, 0.0  ;;  %v7263_v60 = vpop.eup %5373 }
 0x4b8   : > { %5385 = vpow2.f32 %v2548_v7  ;;  %v2527_v27 = vsub.f32 %v7008_v45, %v2499_v8  ;;  %2570 = vadd.xlane.f32.xlu0 %v2569_v5  ;;  %1921 = vadd.xlane.f32.xlu1 %v1920_v13  ;;  %v1267_v29 = vpop.xlane.xlu1 %1266  ;;  %v1917_v39 = vsel %vm963_vm1, %v7263_v60, 0.0  ;;  %v5288_v13 = vunpack.i.h.bf16 %v6930_v9 }
 0x4b9   : > { %5387 = vrcp.f32 %v1267_v29 }
 0x4ba   : > { %v7266_v61 = vpop.eup %5375  ;;  %v2552_v15 = vmul.f32 1.442695, %v2527_v27  ;;  %5389 = vpow2.f32 %v2542_v20  ;;  %v5287_v27 = vunpack.i.l.bf16 %v6930_v9  ;;  %v5293_v9 = vunpack.i.h.bf16 %v6942_v23 }
 0x4bb   : > { %v2505_v58 = vpop.xlane.xlu0 %2504  ;;  %v2575_v62 = vsel %vm963_vm1, %v7266_v61, 0.0  ;;  %v7272_v18 = vpop.eup %5377 }
 0x4bc   : > { %5391 = vpow2.f32 %v2552_v15  ;;  %v2529_v45 = vsub.f32 %v7017_v31, %v2505_v58  ;;  %2576 = vadd.xlane.f32.xlu0 %v2575_v62  ;;  %1918 = vadd.xlane.f32.xlu1 %v1917_v39  ;;  %v2490_v2 = vpop.xlane.xlu1 %2489  ;;  %v2566_v7 = vsel %vm963_vm1, %v7272_v18, 0.0 }
 0x4bd   : > { %v2524_v43 = vsub.f32 %v7000_v33, %v2490_v2 }
 0x4be   : > { %v7276_v59 = vpop.eup %5379  ;;  %v2556_v1 = vmul.f32 1.442695, %v2529_v45 }
 0x4bf   : > { %v2546_v51 = vmul.f32 1.442695, %v2524_v43  ;;  %v7278_v12 = vpop.xlane.xlu0 %2510  ;;  %v2581_v24 = vsel %vm963_vm1, %v7276_v59, 0.0  ;;  %v7284_v20 = vpop.eup %5381 }
 0x4c0   : > { %5393 = vpow2.f32 %v2556_v1  ;;  %2582 = vadd.xlane.f32.xlu0 %v2581_v24  ;;  %2567 = vadd.xlane.f32.xlu1 %v2566_v7  ;;  %v1276_v31 = vpop.xlane.xlu1 %1275  ;;  %v5384_v8 = vpop.eup %5383  ;;  %v2572_v58 = vsel %vm963_vm1, %v7284_v20, 0.0  ;;  %v5292_v1 = vunpack.i.l.bf16 %v6942_v23  ;;  %v4978_v7 = vpack.c.bf16 %v5288_v13, %v5287_v27 }
 0x4c1   : > { %5395 = vpow2.f32 %v2546_v51  ;;  %v1330_v2 = vmul.f32 %v5384_v8, %v6996_v25 }
 0x4c2   : > { %v7286_v33 = vpop.eup %5385  ;;  %5397 = vrcp.f32 %v1276_v31 }
 0x4c3   : > { %v5388_v5 = vpop.eup %5387  ;;  %v2508_v29 = vpop.xlane.xlu0 %2507  ;;  %v2587_v15 = vsel %vm963_vm1, %v7286_v33, 0.0 }
 0x4c4   : > { %2588 = vadd.xlane.f32.xlu0 %v2587_v15  ;;  %2573 = vadd.xlane.f32.xlu1 %v2572_v58  ;;  %v1273_v62 = vpop.xlane.xlu1 %1272  ;;  %v1329_v39 = vmul.f32 %v5388_v5, %v7006_v40  ;;  %v7295_v45 = vpop.eup %5389  ;;  %v2530_v51 = vsub.f32 %v7030_v34, %v2508_v29  ;;  %v7313_v34 = vpack.c.bf16 %v5293_v9, %v5292_v1 }
 0x4c5   : > { %5399 = vrcp.f32 %v1273_v62  ;;  %v2578_v25 = vsel %vm963_vm1, %v7295_v45, 0.0 }
 0x4c6   : > { %v7298_v43 = vpop.eup %5391  ;;  %4606 = vmatprep.mubr.msk.f32.mxu0 %vm963_vm1, %v1329_v39  ;;  %v2558_v29 = vmul.f32 1.442695, %v2530_v51 }
 0x4c7   : > { %v2517_v24 = vpop.xlane.xlu0 %2516  ;;  %4607 = vmatmul.mubr.msk.f32.vlgmr.msra.gmra.mrb[20].mxu0 %vm963_vm1, %v1330_v2  ;;  %v2593_v40 = vsel %vm963_vm1, %v7298_v43, 0.0 }
 0x4c8   : > { %4977 = vmatpush3.bf16.msra.mxu0 %v6816_v44  ;;  %2594 = vadd.xlane.f32.xlu0 %v2593_v40  ;;  %v2496_v31 = vpop.xlane.xlu1 %2495  ;;  %v2533_v13 = vsub.f32 %v7038_v36, %v2517_v24  ;;  %v2531_v40 = vsub.f32 %v7028_v16, %v7278_v12 }
 0x4c9   : > { %2579 = vadd.xlane.f32.xlu1 %v2578_v25  ;;  %4979 = vmatprep.subr.bf16.mxu0 %v4978_v7  ;;  %v2526_v23 = vsub.f32 %v7011_v52, %v2496_v31 }
 0x4ca   : > { %v7311_v8 = vpop.eup %5393  ;;  %v2564_v2 = vmul.f32 1.442695, %v2533_v13  ;;  %v2560_v13 = vmul.f32 1.442695, %v2531_v40 }
 0x4cb   : > { %v7315_v5 = vpop.eup %5395  ;;  %v2550_v27 = vmul.f32 1.442695, %v2526_v23  ;;  %v2514_v44 = vpop.xlane.xlu0 %2513  ;;  %v2599_v15 = vsel %vm963_vm1, %v7311_v8, 0.0  ;;  %v7897_v23 = vld [vmem:[#allocation38_spill] sm:$0xff] }
 0x4cc   : > { %4981 = vmatpush3.bf16.msra.mxu0 %v4978_v7  ;;  %2600 = vadd.xlane.f32.xlu0 %v2599_v15  ;;  %v1282_v58 = vpop.xlane.xlu1 %1281  ;;  %v2584_v52 = vsel %vm963_vm1, %v7315_v5, 0.0  ;;  %v5398_v62 = vpop.eup %5397  ;;  %v2532_v36 = vsub.f32 %v7041_v48, %v2514_v44 }
 0x4cd   : > { %5401 = vpow2.f32 %v2550_v27  ;;  %4995 = vmatprep.subr.bf16.mxu0 %v7313_v34  ;;  %2585 = vadd.xlane.f32.xlu1 %v2584_v52  ;;  %v1332_v24 = vmul.f32 %v5398_v62, %v7026_v11  ;;  %v7898_v11 = vld [vmem:[#allocation39_spill] sm:$0xff] }
 0x4ce   : > { %5403 = vpow2.f32 %v2558_v29  ;;  %v2562_v7 = vmul.f32 1.442695, %v2532_v36 }
 0x4cf   : > { %v5400_v39 = vpop.eup %5399  ;;  %v3162_v9 = vpop.xlane.xlu0 %3161  ;;  %5405 = vrcp.f32 %v1282_v58 }
 0x4d0   : > { %v1279_v1 = vpop.xlane.xlu1 %1278  ;;  %v1331_v51 = vmul.f32 %v5400_v39, %v7036_v35  ;;  %v3206_v27 = vsub.f32 %v7898_v11, %v3162_v9  ;;  %v7900_v9 = vld [vmem:[#allocation42_spill] sm:$0xff] }
 0x4d1   : > { %5407 = vrcp.f32 %v1279_v1 }
 0x4d2   : > { %4609 = vmatprep.mubr.msk.f32.mxu0 %vm963_vm1, %v1331_v51  ;;  %5409 = vpow2.f32 %v2564_v2  ;;  %v3223_v39 = vmul.f32 1.442695, %v3206_v27  ;;  %v7899_v2 = vld [vmem:[#allocation41_spill] sm:$0xff] }
 0x4d3   : > { %v3159_v25 = vpop.xlane.xlu0 %3158  ;;  %4610 = vmatmul.mubr.msk.f32.gmra.mrb[22].mxu0 %vm963_vm1, %v1332_v24  ;;  %5411 = vpow2.f32 %v2562_v7  ;;  %v7901_v7 = vld [vmem:[#allocation43_spill] sm:$0xff] }
 0x4d4   : > { %v3205_v48 = vsub.f32 %v7050_v6, %v3159_v25  ;;  %v2502_v31 = vpop.xlane.xlu1 %2501 }
 0x4d5   : > { %v2528_v29 = vsub.f32 %v7897_v23, %v2502_v31  ;;  %v7902_v31 = vld [vmem:[#allocation40_spill] sm:$0xff] }
 0x4d6   : > { %v3221_v44 = vmul.f32 1.442695, %v3205_v48 }
 0x4d7   : > { %v7332_v35 = vpop.eup %5401  ;;  %v2554_v16 = vmul.f32 1.442695, %v2528_v29  ;;  %v3168_v12 = vpop.xlane.xlu0 %3167 }
 0x4d8   : > { %v1288_v15 = vpop.xlane.xlu1 %1287  ;;  %v2590_v58 = vsel %vm963_vm1, %v7332_v35, 0.0  ;;  %v7337_v52 = vpop.eup %5403  ;;  %v3208_v36 = vsub.f32 %v7899_v2, %v3168_v12 }
 0x4d9   : > { %5413 = vpow2.f32 %v2554_v16  ;;  %2591 = vadd.xlane.f32.xlu1 %v2590_v58  ;;  %v5406_v6 = vpop.eup %5405  ;;  %v2602_v40 = vsel %vm963_vm1, %v7337_v52, 0.0 }
 0x4da   : > { %5415 = vpow2.f32 %v2560_v13  ;;  %v1334_v23 = vmul.f32 %v5406_v6, %v7902_v31  ;;  %v3227_v13 = vmul.f32 1.442695, %v3208_v36 }
 0x4db   : > { %v5408_v62 = vpop.eup %5407  ;;  %5417 = vpow2.f32 %v3221_v44  ;;  %v3165_v1 = vpop.xlane.xlu0 %3164 }
 0x4dc   : > { %5419 = vrcp.f32 %v1288_v15  ;;  %v3207_v51 = vsub.f32 %v7900_v9, %v3165_v1  ;;  %v1285_v24 = vpop.xlane.xlu1 %1284  ;;  %v1333_v25 = vmul.f32 %v5408_v62, %v7901_v7  ;;  %v7344_v48 = vpop.eup %5409 }
 0x4dd   : > { %5421 = vrcp.f32 %v1285_v24  ;;  %2603 = vadd.xlane.f32.xlu1 %v2602_v40  ;;  %v2611_v16 = vsel %vm963_vm1, %v7344_v48, 0.0  ;;  %v7352_v12 = vpop.eup %5411 }
 0x4de   : > { %v3225_v29 = vmul.f32 1.442695, %v3207_v51  ;;  %4612 = vmatprep.mubr.msk.f32.mxu0 %vm963_vm1, %v1333_v25  ;;  %5423 = vpow2.f32 %v3223_v39 }
 0x4df   : > { %v3174_v11 = vpop.xlane.xlu0 %3173  ;;  %4613 = vmatmul.mubr.msk.f32.gmra.mrb[24].mxu0 %vm963_vm1, %v1334_v23  ;;  %v7903_v23 = vld [vmem:[#allocation45_spill] sm:$0xff] }
 0x4e0   : > { %5425 = vpow2.f32 %v3225_v29  ;;  %v3210_v27 = vsub.f32 %v7069_v38, %v3174_v11  ;;  %v1294_v44 = vpop.xlane.xlu1 %1293  ;;  %v2608_v38 = vsel %vm963_vm1, %v7352_v12, 0.0  ;;  %v7904_v11 = vld [vmem:[#allocation44_spill] sm:$0xff] }
 0x4e1   : > { %2612 = vadd.xlane.f32.xlu1 %v2611_v16  ;;  %5427 = vpow2.f32 %v3227_v13 }
 0x4e2   : > { %v3231_v58 = vmul.f32 1.442695, %v3210_v27  ;;  %5429 = vrcp.f32 %v1294_v44 }
 0x4e3   : > { %v7354_v15 = vpop.eup %5413  ;;  %v3171_v6 = vpop.xlane.xlu0 %3170 }
 0x4e4   : > { %v7356_v62 = vpop.eup %5415  ;;  %v3209_v39 = vsub.f32 %v7072_v46, %v3171_v6  ;;  %v1291_v2 = vpop.xlane.xlu1 %1290  ;;  %v2596_v36 = vsel %vm963_vm1, %v7354_v15, 0.0 }
 0x4e5   : > { %v7363_v1 = vpop.eup %5417  ;;  %5431 = vrcp.f32 %v1291_v2  ;;  %2609 = vadd.xlane.f32.xlu1 %v2608_v38  ;;  %2597 = vadd.xlane.f32.xlu0 %v2596_v36  ;;  %v2605_v46 = vsel %vm963_vm1, %v7356_v62, 0.0 }
 0x4e6   : > { %v5420_v9 = vpop.eup %5419  ;;  %v3229_v51 = vmul.f32 1.442695, %v3209_v39  ;;  %5433 = vpow2.f32 %v3231_v58  ;;  %v3253_v31 = vsel %vm963_vm1, %v7363_v1, 0.0 }
 0x4e7   : > { %v5422_v24 = vpop.eup %5421  ;;  %v3180_v40 = vpop.xlane.xlu0 %3179  ;;  %v1336_v27 = vmul.f32 %v5420_v9, %v7904_v11 }
 0x4e8   : > { %5435 = vpow2.f32 %v3229_v51  ;;  %v3212_v7 = vsub.f32 %v7078_v10, %v3180_v40  ;;  %v1300_v25 = vpop.xlane.xlu1 %1299  ;;  %v1335_v29 = vmul.f32 %v5422_v24, %v7903_v23  ;;  %v7371_v13 = vpop.eup %5423  ;;  %v7906_v23 = vld [vmem:[#allocation46_spill] sm:$0xff] }
 0x4e9   : > { %3254 = vadd.xlane.f32.xlu1 %v3253_v31  ;;  %2606 = vadd.xlane.f32.xlu0 %v2605_v46  ;;  %5437 = vrcp.f32 %v1300_v25  ;;  %v3256_v2 = vsel %vm963_vm1, %v7371_v13, 0.0 }
 0x4ea   : > { %v7374_v44 = vpop.eup %5425  ;;  %v3235_v16 = vmul.f32 1.442695, %v3212_v7  ;;  %4615 = vmatprep.mubr.msk.f32.mxu0 %vm963_vm1, %v1335_v29  ;;  %v7905_v7 = vld [vmem:[#allocation49_spill] sm:$0xff] }
 0x4eb   : > { %v3177_v58 = vpop.xlane.xlu0 %3176  ;;  %4616 = vmatmul.mubr.msk.f32.gmra.mrb[26].mxu0 %vm963_vm1, %v1336_v27  ;;  %v3259_v10 = vsel %vm963_vm1, %v7374_v44, 0.0  ;;  %v7383_v38 = vpop.eup %5427 }
 0x4ec   : > { %5439 = vpow2.f32 %v3235_v16  ;;  %v3211_v6 = vsub.f32 %v7081_v21, %v3177_v58  ;;  %v1297_v39 = vpop.xlane.xlu1 %1296  ;;  %v5430_v36 = vpop.eup %5429  ;;  %v3262_v21 = vsel %vm963_vm1, %v7383_v38, 0.0 }
 0x4ed   : > { %5441 = vrcp.f32 %v1297_v39  ;;  %3260 = vadd.xlane.f32.xlu1 %v3259_v10  ;;  %3257 = vadd.xlane.f32.xlu0 %v3256_v2  ;;  %v1338_v29 = vmul.f32 %v5430_v36, %v7906_v23 }
 0x4ee   : > { %v3233_v9 = vmul.f32 1.442695, %v3211_v6 }
 0x4ef   : > { %v5432_v51 = vpop.eup %5431  ;;  %v3186_v24 = vpop.xlane.xlu0 %3185 }
 0x4f0   : > { %5443 = vpow2.f32 %v3233_v9  ;;  %v3214_v40 = vsub.f32 %v7089_v53, %v3186_v24  ;;  %v1306_v46 = vpop.xlane.xlu1 %1305  ;;  %v1337_v25 = vmul.f32 %v5432_v51, %v7905_v7  ;;  %v7389_v31 = vpop.eup %5433 }
 0x4f1   : > { %3263 = vadd.xlane.f32.xlu0 %v3262_v21  ;;  %5445 = vrcp.f32 %v1306_v46  ;;  %v3268_v6 = vsel %vm963_vm1, %v7389_v31, 0.0 }
 0x4f2   : > { %v7392_v11 = vpop.eup %5435  ;;  %v3239_v27 = vmul.f32 1.442695, %v3214_v40  ;;  %4618 = vmatprep.mubr.msk.f32.mxu0 %vm963_vm1, %v1337_v25 }
 0x4f3   : > { %v3183_v16 = vpop.xlane.xlu0 %3182  ;;  %4619 = vmatmul.mubr.msk.f32.gmra.mrb[28].mxu0 %vm963_vm1, %v1338_v29  ;;  %v3265_v53 = vsel %vm963_vm1, %v7392_v11, 0.0  ;;  %v5438_v39 = vpop.eup %5437 }
 0x4f4   : > { %5447 = vpow2.f32 %v3239_v27  ;;  %v3213_v58 = vsub.f32 %v7092_v14, %v3183_v16  ;;  %3266 = vadd.xlane.f32.xlu1 %v3265_v53  ;;  %v1303_v10 = vpop.xlane.xlu1 %1302  ;;  %v1340_v21 = vmul.f32 %v5438_v39, %v7131_v17 }
 0x4f5   : > { %5449 = vrcp.f32 %v1303_v10  ;;  %3269 = vadd.xlane.f32.xlu0 %v3268_v6  ;;  %v7907_v6 = vld [vmem:[#allocation52_spill] sm:$0xff] }
 0x4f6   : > { %v7401_v2 = vpop.eup %5439  ;;  %v3237_v36 = vmul.f32 1.442695, %v3213_v58 }
 0x4f7   : > { %v5442_v9 = vpop.eup %5441  ;;  %v3192_v51 = vpop.xlane.xlu0 %3191  ;;  %v3274_v24 = vsel %vm963_vm1, %v7401_v2, 0.0 }
 0x4f8   : > { %5451 = vpow2.f32 %v3237_v36  ;;  %v3216_v40 = vsub.f32 %v7100_v57, %v3192_v51  ;;  %v1312_v14 = vpop.xlane.xlu1 %1311  ;;  %v1339_v46 = vmul.f32 %v5442_v9, %v7138_v37 }
 0x4f9   : > { %3275 = vadd.xlane.f32.xlu0 %v3274_v24  ;;  %5453 = vrcp.f32 %v1312_v14 }
 0x4fa   : > { %v7408_v7 = vpop.eup %5443  ;;  %v3243_v25 = vmul.f32 1.442695, %v3216_v40  ;;  %4621 = vmatprep.mubr.msk.f32.mxu0 %vm963_vm1, %v1339_v46  ;;  %v7910_v46 = vld [vmem:[#allocation53_spill] sm:$0xff] }
 0x4fb   : > { %v3189_v23 = vpop.xlane.xlu0 %3188  ;;  %4622 = vmatmul.mubr.msk.f32.gmra.mrb[30].mxu0 %vm963_vm1, %v1340_v21  ;;  %v3271_v29 = vsel %vm963_vm1, %v7408_v7, 0.0  ;;  %v5446_v27 = vpop.eup %5445 }
 0x4fc   : > { %5455 = vpow2.f32 %v3243_v25  ;;  %v3215_v57 = vsub.f32 %v7103_v41, %v3189_v23  ;;  %3272 = vadd.xlane.f32.xlu1 %v3271_v29  ;;  %v1309_v37 = vpop.xlane.xlu1 %1308  ;;  %v1342_v39 = vmul.f32 %v5446_v27, %v7907_v6 }
 0x4fd   : > { %5457 = vrcp.f32 %v1309_v37 }
 0x4fe   : > { %v7415_v17 = vpop.eup %5447  ;;  %v3241_v16 = vmul.f32 1.442695, %v3215_v57  ;;  %v7911_v57 = vld [vmem:[#allocation35_spill] sm:$0xff] }
 0x4ff   : > { %v5450_v53 = vpop.eup %5449  ;;  %v3280_v58 = vsel %vm963_vm1, %v7415_v17, 0.0  ;;  %v3198_v29 = vpop.xlane.xlu0 %3197 }
 0x500   : > { %5459 = vpow2.f32 %v3241_v16  ;;  %3281 = vadd.xlane.f32.xlu0 %v3280_v58  ;;  %v1341_v10 = vmul.f32 %v5450_v53, %v7150_v26  ;;  %v7909_v26 = vld [vmem:[#allocation54_spill] sm:$0xff]  ;;  %v7912_v16 = vld [vmem:[#allocation36_spill] sm:$0xff] }
 0x501   : > { %v7913_v53 = vld [vmem:[#allocation48_spill] sm:$0xff] }
 0x502   : > { %v7421_v36 = vpop.eup %5451  ;;  %4624 = vmatprep.mubr.msk.f32.mxu0 %vm963_vm1, %v1341_v10 }
 0x503   : > { %4625 = vmatmul.mubr.msk.f32.gmra.mrb[32].mxu0 %vm963_vm1, %v1342_v39  ;;  %v3277_v41 = vsel %vm963_vm1, %v7421_v36, 0.0  ;;  %v5454_v9 = vpop.eup %5453  ;;  %v3195_v37 = vpop.xlane.xlu0 %3194 }
 0x504   : > { %3278 = vadd.xlane.f32.xlu1 %v3277_v41  ;;  %v1344_v21 = vmul.f32 %v5454_v9, %v7910_v46  ;;  %v3217_v58 = vsub.f32 %v7913_v53, %v3195_v37  ;;  %v7914_v41 = vld [vmem:[#allocation51_spill] sm:$0xff] }
 0x505   : > { %v7916_v46 = vld [vmem:[#allocation47_spill] sm:$0xff] }
 0x506   : > { %v7427_v51 = vpop.eup %5455  ;;  %v3245_v39 = vmul.f32 1.442695, %v3217_v58 }
 0x507   : > { %7908 = vst [vmem:[#allocation38_spill] sm:$0xff] %v7427_v51  ;;  %v5458_v24 = vpop.eup %5457  ;;  %v3286_v40 = vsel %vm963_vm1, %v7427_v51, 0.0  ;;  %v3204_v27 = vpop.xlane.xlu0 %3203 }
 0x508   : > { %3287 = vadd.xlane.f32.xlu0 %v3286_v40  ;;  %v1343_v14 = vmul.f32 %v5458_v24, %v7909_v26  ;;  %v7915_v24 = vld [vmem:[#allocation50_spill] sm:$0xff] }
 0x509   : > { %v3220_v40 = vsub.f32 %v7915_v24, %v3204_v27  ;;  %v7917_v27 = vld [vmem:[#allocation37_spill] sm:$0xff] }
 0x50a   : > { %v7433_v25 = vpop.eup %5459  ;;  %4627 = vmatprep.mubr.msk.f32.mxu0 %vm963_vm1, %v1343_v14 }
 0x50b   : > { %4628 = vmatmul.mubr.msk.f32.gmra.mrb[34].mxu0 %vm963_vm1, %v1344_v21  ;;  %v3283_v23 = vsel %vm963_vm1, %v7433_v25, 0.0  ;;  %v3201_v10 = vpop.xlane.xlu0 %3200  ;;  %v3218_v21 = vsub.f32 %v7916_v46, %v3198_v29 }
 0x50c   : > { %3284 = vadd.xlane.f32.xlu0 %v3283_v23  ;;  %v3219_v9 = vsub.f32 %v7914_v41, %v3201_v10  ;;  %v3251_v23 = vmul.f32 1.442695, %v3220_v40  ;;  %v5297_v41 = vunpack.i.l.bf16 %v7917_v27 }
 0x50e   : > { %v3249_v14 = vmul.f32 1.442695, %v3219_v9 }
 0x515   : > { %5300 = vrot.lane.b32.xlu1 %v7911_v57, %s6011_s0 }
 0x522   : > { %5305 = vrot.lane.b32.xlu0 %v7912_v16, %s6011_s0  ;;  %v3247_v16 = vmul.f32 1.442695, %v3218_v21 }
 0x525   : > { %v1880_v6 = vpop.xlane.xlu1 %1879 }
 0x526   : > { %5461 = vrcp.f32 %v1880_v6  ;;  %v5298_v6 = vunpack.i.h.bf16 %v7917_v27 }
 0x529   : > { %v1877_v26 = vpop.xlane.xlu1 %1876 }
 0x52a   : > { %5463 = vrcp.f32 %v1877_v26  ;;  %v4998_v26 = vpack.c.bf16 %v5298_v6, %v5297_v41 }
 0x52b   : > { %5465 = vpow2.f32 %v3245_v39 }
 0x52c   : > { %5467 = vpow2.f32 %v3249_v14 }
 0x52d   : > { %v1892_v57 = vpop.xlane.xlu0 %1891  ;;  %v1886_v51 = vpop.xlane.xlu1 %1885  ;;  %5469 = vpow2.f32 %v3251_v23 }
 0x52e   : > { %5471 = vrcp.f32 %v1886_v51 }
 0x530   : > { %v5462_v58 = vpop.eup %5461 }
 0x531   : > { %v1898_v37 = vpop.xlane.xlu0 %1897  ;;  %v1883_v53 = vpop.xlane.xlu1 %1882  ;;  %v1940_v40 = vmul.f32 %v5462_v58, %v7183_v3 }
 0x532   : > { %5473 = vrcp.f32 %v1883_v53 }
 0x533   : > { %5475 = vpow2.f32 %v3247_v16 }
 0x534   : > { %v5464_v10 = vpop.eup %5463  ;;  %5477 = vrcp.f32 %v1892_v57 }
 0x535   : > { %v7449_v39 = vpop.eup %5465  ;;  %v1904_v29 = vpop.xlane.xlu0 %1903  ;;  %v1939_v24 = vmul.f32 %v5464_v10, %v7188_v50 }
 0x536   : > { %v1889_v9 = vpop.xlane.xlu1 %1888  ;;  %v3289_v51 = vsel %vm963_vm1, %v7449_v39, 0.0  ;;  %v7457_v14 = vpop.eup %5467 }
 0x537   : > { %5479 = vrcp.f32 %v1889_v9  ;;  %4670 = vmatprep.mubr.msk.f32.mxu0 %vm963_vm1, %v1939_v24  ;;  %v7460_v3 = vpop.eup %5469  ;;  %v3295_v23 = vsel %vm963_vm1, %v7457_v14, 0.0 }
 0x538   : > { %4671 = vmatmul.mubr.msk.f32.vlgmr.msra.gmra.mrb[36].mxu0 %vm963_vm1, %v1940_v40  ;;  %5481 = vrcp.f32 %v1898_v37  ;;  %v5472_v50 = vpop.eup %5471  ;;  %v3298_v27 = vsel %vm963_vm1, %v7460_v3, 0.0 }
 0x539   : > { %4997 = vmatpush3.bf16.msra.mxu0 %v7313_v34  ;;  %v1910_v46 = vpop.xlane.xlu0 %1909  ;;  %3290 = vadd.xlane.f32.xlu1 %v3289_v51  ;;  %v1942_v37 = vmul.f32 %v5472_v50, %v7194_v30 }
 0x53a   : > { %v1895_v21 = vpop.xlane.xlu1 %1894  ;;  %4999 = vmatprep.subr.bf16.mxu0 %v4998_v26 }
 0x53b   : > { %5483 = vrcp.f32 %v1895_v21 }
 0x53c   : > { %v5474_v57 = vpop.eup %5473  ;;  %5485 = vrcp.f32 %v1904_v29 }
 0x53d   : > { %5001 = vmatpush3.bf16.msra.mxu0 %v4998_v26  ;;  %v1907_v16 = vpop.xlane.xlu0 %1906  ;;  %3296 = vadd.xlane.f32.xlu1 %v3295_v23  ;;  %v7464_v58 = vpop.eup %5475  ;;  %v1941_v34 = vmul.f32 %v5474_v57, %v7204_v55 }
 0x53e   : > { %v1901_v53 = vpop.xlane.xlu1 %1900  ;;  %5487 = vrcp.f32 %v1907_v16  ;;  %v5478_v10 = vpop.eup %5477  ;;  %v3292_v29 = vsel %vm963_vm1, %v7464_v58, 0.0 }
 0x53f   : > { %5489 = vrcp.f32 %v1901_v53  ;;  %4673 = vmatprep.mubr.msk.f32.mxu0 %vm963_vm1, %v1941_v34  ;;  %v1944_v30 = vmul.f32 %v5478_v10, %v7198_v0 }
 0x540   : > { %4674 = vmatmul.mubr.msk.f32.gmra.mrb[38].mxu0 %vm963_vm1, %v1942_v37  ;;  %5491 = vrcp.f32 %v1910_v46 }
 0x541   : > { %v5480_v6 = vpop.eup %5479  ;;  %v1916_v41 = vpop.xlane.xlu0 %1915  ;;  %3299 = vadd.xlane.f32.xlu1 %v3298_v27  ;;  %3293 = vadd.xlane.f32.xlu0 %v3292_v29 }
 0x542   : > { %v1913_v9 = vpop.xlane.xlu1 %1912  ;;  %v1943_v55 = vmul.f32 %v5480_v6, %v7214_v42  ;;  %v5482_v24 = vpop.eup %5481 }
 0x543   : > { %5493 = vrcp.f32 %v1913_v9  ;;  %v1946_v46 = vmul.f32 %v5482_v24, %v7208_v54 }
 0x544   : > { %4676 = vmatprep.mubr.msk.f32.mxu0 %vm963_vm1, %v1943_v55  ;;  %5495 = vrcp.f32 %v1916_v41 }
 0x545   : > { %v5484_v40 = vpop.eup %5483  ;;  %4677 = vmatmul.mubr.msk.f32.gmra.mrb[40].mxu0 %vm963_vm1, %v1944_v30  ;;  %v2571_v51 = vpop.xlane.xlu0 %2570 }
 0x546   : > { %v1922_v26 = vpop.xlane.xlu1 %1921  ;;  %v1945_v21 = vmul.f32 %v5484_v40, %v7224_v19  ;;  %v5486_v50 = vpop.eup %5485 }
 0x547   : > { %5497 = vrcp.f32 %v1922_v26  ;;  %v1948_v53 = vmul.f32 %v5486_v50, %v7217_v32 }
 0x548   : > { %v5488_v23 = vpop.eup %5487  ;;  %4679 = vmatprep.mubr.msk.f32.mxu0 %vm963_vm1, %v1945_v21 }
 0x549   : > { %v5490_v42 = vpop.eup %5489  ;;  %4680 = vmatmul.mubr.msk.f32.gmra.mrb[42].mxu0 %vm963_vm1, %v1946_v46  ;;  %v2577_v16 = vpop.xlane.xlu0 %2576  ;;  %v1949_v19 = vmul.f32 %v5488_v23, %v7236_v56 }
 0x54a   : > { %v1919_v0 = vpop.xlane.xlu1 %1918  ;;  %v1947_v57 = vmul.f32 %v5490_v42, %v7230_v22  ;;  %v5492_v34 = vpop.eup %5491 }
 0x54b   : > { %5499 = vrcp.f32 %v1919_v0  ;;  %v1950_v10 = vmul.f32 %v5492_v34, %v7227_v47 }
 0x54c   : > { %4682 = vmatprep.mubr.msk.f32.mxu0 %vm963_vm1, %v1947_v57  ;;  %5501 = vrcp.f32 %v2571_v51 }
 0x54d   : > { %v5494_v54 = vpop.eup %5493  ;;  %4683 = vmatmul.mubr.msk.f32.gmra.mrb[44].mxu0 %vm963_vm1, %v1948_v53  ;;  %v2583_v6 = vpop.xlane.xlu0 %2582 }
 0x54e   : > { %v2568_v37 = vpop.xlane.xlu1 %2567  ;;  %4685 = vmatprep.mubr.msk.f32.mxu0 %vm963_vm1, %v1949_v19  ;;  %v5496_v22 = vpop.eup %5495  ;;  %v1951_v27 = vmul.f32 %v5494_v54, %v7246_v63 }
 0x54f   : > { %5503 = vrcp.f32 %v2568_v37  ;;  %v1952_v56 = vmul.f32 %v5496_v22, %v7240_v28 }
 0x550   : > { %5505 = vrcp.f32 %v2577_v16 }
 0x551   : > { %4686 = vmatmul.mubr.msk.f32.gmra.mrb[46].mxu0 %vm963_vm1, %v1950_v10  ;;  %v5498_v41 = vpop.eup %5497  ;;  %v2589_v55 = vpop.xlane.xlu0 %2588 }
 0x552   : > { %v2574_v32 = vpop.xlane.xlu1 %2573  ;;  %4688 = vmatprep.mubr.msk.f32.mxu0 %vm963_vm1, %v1951_v27  ;;  %v1954_v63 = vmul.f32 %v5498_v41, %v7254_v49 }
 0x553   : > { %5507 = vrcp.f32 %v2574_v32 }
 0x554   : > { %5509 = vrcp.f32 %v2583_v6 }
 0x555   : > { %v5500_v29 = vpop.eup %5499  ;;  %4689 = vmatmul.mubr.msk.f32.gmra.mrb[48].mxu0 %vm963_vm1, %v1952_v56 }
 0x556   : > { %v2580_v9 = vpop.xlane.xlu1 %2579  ;;  %v1953_v47 = vmul.f32 %v5500_v29, %v7263_v60  ;;  %v5502_v30 = vpop.eup %5501 }
 0x557   : > { %5511 = vrcp.f32 %v2580_v9  ;;  %v2631_v51 = vmul.f32 %v5502_v30, %v7257_v4  ;;  %v2595_v4 = vpop.xlane.xlu0 %2594 }
 0x558   : > { %4691 = vmatprep.mubr.msk.f32.mxu0 %vm963_vm1, %v1953_v47  ;;  %5513 = vrcp.f32 %v2589_v55 }
 0x559   : > { %v5504_v24 = vpop.eup %5503  ;;  %4692 = vmatmul.mubr.msk.f32.gmra.mrb[50].mxu0 %vm963_vm1, %v1954_v63 }
 0x55a   : > { %v2586_v28 = vpop.xlane.xlu1 %2585  ;;  %v2630_v40 = vmul.f32 %v5504_v24, %v7272_v18  ;;  %v5506_v26 = vpop.eup %5505 }
 0x55b   : > { %5515 = vrcp.f32 %v2586_v28  ;;  %v2633_v21 = vmul.f32 %v5506_v26, %v7266_v61  ;;  %v2601_v16 = vpop.xlane.xlu0 %2600 }
 0x55c   : > { %4734 = vmatprep.mubr.msk.f32.mxu0 %vm963_vm1, %v2630_v40  ;;  %5517 = vrcp.f32 %v2595_v4 }
 0x55d   : > { %v5508_v60 = vpop.eup %5507  ;;  %4735 = vmatmul.mubr.msk.f32.vlgmr.msra.gmra.mrb[52].mxu0 %vm963_vm1, %v2631_v51 }
 0x55e   : > { %v2632_v49 = vmul.f32 %v5508_v60, %v7284_v20  ;;  %v5510_v50 = vpop.eup %5509 }
 0x55f   : > { %v2635_v23 = vmul.f32 %v5510_v50, %v7276_v59 }
 0x560   : > { %4737 = vmatprep.mubr.msk.f32.mxu0 %vm963_vm1, %v2632_v49 }
 0x561   : > { %v5512_v46 = vpop.eup %5511  ;;  %4738 = vmatmul.mubr.msk.f32.gmra.mrb[54].mxu0 %vm963_vm1, %v2633_v21 }
 0x562   : > { %v2634_v18 = vmul.f32 %v5512_v46, %v7295_v45  ;;  %v5514_v42 = vpop.eup %5513 }
 0x563   : > { %v2637_v57 = vmul.f32 %v5514_v42, %v7286_v33 }
 0x564   : > { %4740 = vmatprep.mubr.msk.f32.mxu0 %vm963_vm1, %v2634_v18 }
 0x565   : > { %v5516_v0 = vpop.eup %5515  ;;  %4741 = vmatmul.mubr.msk.f32.gmra.mrb[56].mxu0 %vm963_vm1, %v2635_v23 }
 0x566   : > { %v2592_v20 = vpop.xlane.xlu1 %2591  ;;  %v2636_v61 = vmul.f32 %v5516_v0, %v7315_v5  ;;  %v5518_v53 = vpop.eup %5517 }
 0x567   : > { %5519 = vrcp.f32 %v2592_v20  ;;  %v2639_v5 = vmul.f32 %v5518_v53, %v7298_v43 }
 0x568   : > { %4743 = vmatprep.mubr.msk.f32.mxu0 %vm963_vm1, %v2636_v61  ;;  %5521 = vrcp.f32 %v2601_v16 }
 0x569   : > { %4744 = vmatmul.mubr.msk.f32.gmra.mrb[58].mxu0 %vm963_vm1, %v2637_v57 }
 0x56a   : > { %v2604_v45 = vpop.xlane.xlu1 %2603 }
 0x56b   : > { %5523 = vrcp.f32 %v2604_v45 }
 0x56e   : > { %v2613_v59 = vpop.xlane.xlu1 %2612 }
 0x571   : > { %v5520_v34 = vpop.eup %5519 }
 0x572   : > { %v2598_v19 = vpop.xlane.xlu0 %2597  ;;  %v2610_v54 = vpop.xlane.xlu1 %2609  ;;  %v2638_v37 = vmul.f32 %v5520_v34, %v7332_v35 }
 0x573   : > { %5525 = vrcp.f32 %v2598_v19  ;;  %v5522_v22 = vpop.eup %5521 }
 0x574   : > { %4746 = vmatprep.mubr.msk.f32.mxu0 %vm963_vm1, %v2638_v37  ;;  %5527 = vrcp.f32 %v2610_v54  ;;  %v2641_v35 = vmul.f32 %v5522_v22, %v7311_v8 }
 0x575   : > { %4747 = vmatmul.mubr.msk.f32.gmra.mrb[60].mxu0 %vm963_vm1, %v2639_v5  ;;  %v5524_v6 = vpop.eup %5523 }
 0x576   : > { %v2607_v33 = vpop.xlane.xlu0 %2606  ;;  %v3255_v10 = vpop.xlane.xlu1 %3254  ;;  %v2642_v43 = vmul.f32 %v5524_v6, %v7337_v52 }
 0x577   : > { %5529 = vrcp.f32 %v2607_v33 }
 0x578   : > { %5531 = vrcp.f32 %v2613_v59 }
 0x579   : > { %5533 = vrcp.f32 %v3255_v10 }
 0x57a   : > { %v3258_v27 = vpop.xlane.xlu0 %3257 }
 0x57b   : > { %5535 = vrcp.f32 %v3258_v27 }
 0x57d   : > { %v5526_v32 = vpop.eup %5525 }
 0x57e   : > { %v2640_v56 = vmul.f32 %v5526_v32, %v7354_v15  ;;  %v5528_v41 = vpop.eup %5527  ;;  %v3264_v9 = vpop.xlane.xlu0 %3263 }
 0x57f   : > { %v2644_v63 = vmul.f32 %v5528_v41, %v7352_v12  ;;  %v3261_v15 = vpop.xlane.xlu1 %3260 }
 0x580   : > { %4749 = vmatprep.mubr.msk.f32.mxu0 %vm963_vm1, %v2640_v56  ;;  %5537 = vrcp.f32 %v3261_v15 }
 0x581   : > { %v5530_v29 = vpop.eup %5529  ;;  %4750 = vmatmul.mubr.msk.f32.gmra.mrb[62].mxu0 %vm963_vm1, %v2641_v35  ;;  %5539 = vrcp.f32 %v3264_v9 }
 0x582   : > { %4752 = vmatprep.mubr.msk.f32.mxu0 %vm963_vm1, %v2642_v43  ;;  %v2643_v47 = vmul.f32 %v5530_v29, %v7356_v62  ;;  %v5532_v55 = vpop.eup %5531  ;;  %v3270_v8 = vpop.xlane.xlu0 %3269 }
 0x583   : > { %v5534_v30 = vpop.eup %5533  ;;  %v2645_v52 = vmul.f32 %v5532_v55, %v7344_v48  ;;  %v3267_v28 = vpop.xlane.xlu1 %3266 }
 0x584   : > { %v3317_v24 = vmul.f32 %v5534_v30, %v7363_v1  ;;  %5541 = vrcp.f32 %v3267_v28 }
 0x585   : > { %4753 = vmatmul.mubr.msk.f32.gmra.mrb[64].mxu0 %vm963_vm1, %v2643_v47  ;;  %5543 = vrcp.f32 %v3270_v8  ;;  %v5536_v0 = vpop.eup %5535 }
 0x586   : > { %4755 = vmatprep.mubr.msk.f32.mxu0 %vm963_vm1, %v2644_v63  ;;  %v3276_v62 = vpop.xlane.xlu0 %3275  ;;  %v3318_v61 = vmul.f32 %v5536_v0, %v7371_v13 }
 0x589   : > { %4756 = vmatmul.mubr.msk.f32.gmra.mrb[66].mxu0 %vm963_vm1, %v2645_v52  ;;  %v3273_v40 = vpop.xlane.xlu1 %3272 }
 0x58a   : > { %4798 = vmatprep.mubr.msk.f32.mxu0 %vm963_vm1, %v3317_v24  ;;  %5545 = vrcp.f32 %v3273_v40  ;;  %v5538_v20 = vpop.eup %5537 }
 0x58b   : > { %5547 = vrcp.f32 %v3276_v62  ;;  %v5540_v57 = vpop.eup %5539  ;;  %v3319_v45 = vmul.f32 %v5538_v20, %v7374_v44 }
 0x58c   : > { %v3320_v34 = vmul.f32 %v5540_v57, %v7383_v38 }
 0x58d   : > { %v3282_v51 = vpop.xlane.xlu0 %3281 }
 0x58e   : > { %v5542_v16 = vpop.eup %5541 }
 0x58f   : > { %v5544_v13 = vpop.eup %5543  ;;  %v3321_v19 = vmul.f32 %v5542_v16, %v7392_v11 }
 0x590   : > { %v3322_v44 = vmul.f32 %v5544_v13, %v7389_v31 }
 0x591   : > { %v3279_v12 = vpop.xlane.xlu1 %3278 }
 0x592   : > { %5549 = vrcp.f32 %v3279_v12 }
 0x593   : > { %5551 = vrcp.f32 %v3282_v51 }
 0x594   : > { %v5546_v54 = vpop.eup %5545 }
 0x595   : > { %v3288_v26 = vpop.xlane.xlu0 %3287  ;;  %v5301_v60 = vpop.permute.xlu1 %5300  ;;  %v3323_v5 = vmul.f32 %v5546_v54, %v7408_v7  ;;  %v3635_v54 = vld [vmem:[#allocation17] sm:$0xff] }
 0x596   : > { %v5303_v49 = vunpack.i.h.bf16 %v5301_v60  ;;  %v5302_v21 = vunpack.i.l.bf16 %v5301_v60  ;;  %v5548_v37 = vpop.eup %5547 }
 0x597   : > { %v3324_v38 = vmul.f32 %v5548_v37, %v7401_v2  ;;  %v7918_v2 = vld [vmem:[#allocation38_spill] sm:$0xff]  ;;  %v3637_v37 = vld [vmem:[#allocation17 + $0x10] sm:$0xff] }
 0x598   : > { %v5014_v50 = vpack.c.bf16 %v5303_v49, %v5302_v21 }
 0x599   : > { %v3285_v46 = vpop.xlane.xlu0 %3284 }
 0x59a   : > { %v4608_v48 = vpop.f32.mrb[20].mxu0  ;;  %5015 = vmatprep.subr.bf16.mxu0 %v5014_v50  ;;  %5553 = vrcp.f32 %v3285_v46 }
 0x59b   : > { %1539 = vst.msk [vmem:[#allocation2 + $0x8] sm:$0xff] %vm963_vm1, %v4608_v48  ;;  %v1459_v1 = vpop.f32.mrb[21].mxu0  ;;  %5017 = vmatpush3.bf16.msra.mxu0 %v5014_v50  ;;  %5555 = vrcp.f32 %v3288_v26 }
 0x59c   : > { %1538 = vst.msk [vmem:[#allocation2] sm:$0xff] %vm963_vm1, %v1459_v1  ;;  %v5550_v33 = vpop.eup %5549 }
 0x59d   : > { %v5306_v18 = vpop.permute.xlu0 %5305  ;;  %v5552_v10 = vpop.eup %5551  ;;  %v3325_v11 = vmul.f32 %v5550_v33, %v7421_v36  ;;  %v3638_v33 = vld [vmem:[#allocation17 + $0x18] sm:$0xff] }
 0x59e   : > { %v5308_v4 = vunpack.i.h.bf16 %v5306_v18  ;;  %v5307_v23 = vunpack.i.l.bf16 %v5306_v18  ;;  %v3326_v7 = vmul.f32 %v5552_v10, %v7415_v17  ;;  %v3639_v10 = vld [vmem:[#allocation17 + $0x20] sm:$0xff] }
 0x5a0   : > { %v5018_v42 = vpack.c.bf16 %v5308_v4, %v5307_v23 }
 0x5a2   : > { %5019 = vmatprep.subr.bf16.mxu0 %v5018_v42 }
 0x5a3   : > { %5021 = vmatpush3.bf16.msra.mxu0 %v5018_v42 }
 0x5a4   : > { %v5554_v22 = vpop.eup %5553 }
 0x5a5   : > { %v5556_v6 = vpop.eup %5555  ;;  %v3327_v32 = vmul.f32 %v5554_v22, %v7433_v25 }
 0x5a6   : > { %v4611_v59 = vpop.f32.mrb[22].mxu0  ;;  %4799 = vmatmul.mubr.msk.f32.vlgmr.msra.gmra.mrb[68].mxu0 %vm963_vm1, %v3318_v61  ;;  %v3328_v36 = vmul.f32 %v5556_v6, %v7918_v2  ;;  %v3642_v6 = vld [vmem:[#allocation17 + $0x38] sm:$0xff] }
 0x5a7   : > { %1541 = vst.msk [vmem:[#allocation2 + $0x18] sm:$0xff] %vm963_vm1, %v4611_v59  ;;  %v1469_v53 = vpop.f32.mrb[23].mxu0  ;;  %4801 = vmatprep.mubr.msk.f32.mxu0 %vm963_vm1, %v3319_v45 }
 0x5a8   : > { %1540 = vst.msk [vmem:[#allocation2 + $0x10] sm:$0xff] %vm963_vm1, %v1469_v53 }
 0x5aa   : > { %4802 = vmatmul.mubr.msk.f32.gmra.mrb[70].mxu0 %vm963_vm1, %v3320_v34 }
 0x5ab   : > { %4804 = vmatprep.mubr.msk.f32.mxu0 %vm963_vm1, %v3321_v19 }
 0x5ae   : > { %4805 = vmatmul.mubr.msk.f32.gmra.mrb[72].mxu0 %vm963_vm1, %v3322_v44  ;;  %v3636_v44 = vld [vmem:[#allocation17 + $0x8] sm:$0xff] }
 0x5af   : > { %4807 = vmatprep.mubr.msk.f32.mxu0 %vm963_vm1, %v3323_v5  ;;  %v5022_v5 = vpack.c.bf16 %v3636_v44, %v3635_v54 }
 0x5b1   : > { %5023 = vmatprep.subr.bf16.mxu1 %v5022_v5 }
 0x5b2   : > { %v4614_v27 = vpop.f32.mrb[24].mxu0  ;;  %4808 = vmatmul.mubr.msk.f32.gmra.mrb[74].mxu0 %vm963_vm1, %v3324_v38  ;;  %v5026_v38 = vpack.c.bf16 %v3638_v33, %v3637_v37  ;;  %5025 = vmatpush3.bf16.msra.mxu1 %v5022_v5 }
 0x5b3   : > { %1543 = vst.msk [vmem:[#allocation2 + $0x28] sm:$0xff] %vm963_vm1, %v4614_v27  ;;  %v1479_v31 = vpop.f32.mrb[25].mxu0  ;;  %4810 = vmatprep.mubr.msk.f32.mxu0 %vm963_vm1, %v3325_v11  ;;  %v3640_v11 = vld [vmem:[#allocation17 + $0x28] sm:$0xff] }
 0x5b4   : > { %1542 = vst.msk [vmem:[#allocation2 + $0x20] sm:$0xff] %vm963_vm1, %v1479_v31  ;;  %5027 = vmatprep.subr.bf16.mxu1 %v5026_v38  ;;  %v5030_v31 = vpack.c.bf16 %v3640_v11, %v3639_v10 }
 0x5b6   : > { %4811 = vmatmul.mubr.msk.f32.gmra.mrb[76].mxu0 %vm963_vm1, %v3326_v7  ;;  %v3641_v7 = vld [vmem:[#allocation17 + $0x30] sm:$0xff]  ;;  %5029 = vmatpush3.bf16.msra.mxu1 %v5026_v38 }
 0x5b7   : > { %4813 = vmatprep.mubr.msk.f32.mxu0 %vm963_vm1, %v3327_v32  ;;  %5031 = vmatprep.subr.bf16.mxu1 %v5030_v31 }
 0x5ba   : > { %4814 = vmatmul.mubr.msk.f32.gmra.mrb[78].mxu0 %vm963_vm1, %v3328_v36  ;;  %v5034_v36 = vpack.c.bf16 %v3642_v6, %v3641_v7  ;;  %5033 = vmatpush3.bf16.msra.mxu1 %v5030_v31 }
 0x5bc   : > { %5035 = vmatprep.subr.bf16.mxu1 %v5034_v36 }
 0x5be   : > { %v4617_v56 = vpop.f32.mrb[26].mxu0  ;;  %5037 = vmatpush3.bf16.msra.mxu1 %v5034_v36 }
 0x5bf   : > { %1545 = vst.msk [vmem:[#allocation2 + $0x38] sm:$0xff] %vm963_vm1, %v4617_v56  ;;  %v1489_v35 = vpop.f32.mrb[27].mxu0  ;;  %v3643_v56 = vld [vmem:[#allocation17 + $0x40] sm:$0xff] }
 0x5c0   : > { %1544 = vst.msk [vmem:[#allocation2 + $0x30] sm:$0xff] %vm963_vm1, %v1489_v35  ;;  %v3644_v35 = vld [vmem:[#allocation17 + $0x48] sm:$0xff] }
 0x5c6   : > { %v4620_v41 = vpop.f32.mrb[28].mxu0  ;;  %v3291_v43 = vpop.xlane.xlu1 %3290 }
 0x5c7   : > { %1547 = vst.msk [vmem:[#allocation2 + $0x48] sm:$0xff] %vm963_vm1, %v4620_v41  ;;  %5557 = vrcp.f32 %v3291_v43  ;;  %v1499_v17 = vpop.f32.mrb[29].mxu0 }
 0x5c8   : > { %1546 = vst.msk [vmem:[#allocation2 + $0x40] sm:$0xff] %vm963_vm1, %v1499_v17  ;;  %v5038_v17 = vpack.c.bf16 %v3644_v35, %v3643_v56 }
 0x5ca   : > { %v3297_v25 = vpop.xlane.xlu1 %3296  ;;  %5039 = vmatprep.subr.bf16.mxu1 %v5038_v17 }
 0x5cb   : > { %5559 = vrcp.f32 %v3297_v25  ;;  %v3645_v25 = vld [vmem:[#allocation17 + $0x50] sm:$0xff]  ;;  %5041 = vmatpush3.bf16.msra.mxu1 %v5038_v17 }
 0x5ce   : > { %v4623_v29 = vpop.f32.mrb[30].mxu0  ;;  %v3300_v9 = vpop.xlane.xlu1 %3299 }
 0x5cf   : > { %v3294_v47 = vpop.xlane.xlu0 %3293  ;;  %1549 = vst.msk [vmem:[#allocation2 + $0x58] sm:$0xff] %vm963_vm1, %v4623_v29  ;;  %v1509_v55 = vpop.f32.mrb[31].mxu0  ;;  %v3646_v29 = vld [vmem:[#allocation17 + $0x58] sm:$0xff] }
 0x5d0   : > { %5561 = vrcp.f32 %v3294_v47  ;;  %1548 = vst.msk [vmem:[#allocation2 + $0x50] sm:$0xff] %vm963_vm1, %v1509_v55  ;;  %v3647_v47 = vld [vmem:[#allocation17 + $0x60] sm:$0xff]  ;;  %v3648_v55 = vld [vmem:[#allocation17 + $0x68] sm:$0xff] }
 0x5d1   : > { %v5558_v63 = vpop.eup %5557  ;;  %5563 = vrcp.f32 %v3300_v9  ;;  %v5042_v9 = vpack.c.bf16 %v3646_v29, %v3645_v25 }
 0x5d2   : > { %v3329_v30 = vmul.f32 %v5558_v63, %v7449_v39  ;;  %v5046_v63 = vpack.c.bf16 %v3648_v55, %v3647_v47 }
 0x5d3   : > { %5043 = vmatprep.subr.bf16.mxu1 %v5042_v9 }
 0x5d4   : > { %4816 = vmatprep.mubr.msk.f32.mxu0 %vm963_vm1, %v3329_v30  ;;  %5045 = vmatpush3.bf16.msra.mxu1 %v5042_v9  ;;  %v3649_v30 = vld [vmem:[#allocation17 + $0x70] sm:$0xff] }
 0x5d5   : > { %v5560_v52 = vpop.eup %5559  ;;  %5047 = vmatprep.subr.bf16.mxu1 %v5046_v63 }
 0x5d6   : > { %v4626_v15 = vpop.f32.mrb[32].mxu0  ;;  %v3331_v40 = vmul.f32 %v5560_v52, %v7457_v14 }
 0x5d7   : > { %1551 = vst.msk [vmem:[#allocation2 + $0x68] sm:$0xff] %vm963_vm1, %v4626_v15  ;;  %v1519_v8 = vpop.f32.mrb[33].mxu0  ;;  %v3650_v15 = vld [vmem:[#allocation17 + $0x78] sm:$0xff] }
 0x5d8   : > { %1550 = vst.msk [vmem:[#allocation2 + $0x60] sm:$0xff] %vm963_vm1, %v1519_v8  ;;  %5049 = vmatpush3.bf16.msra.mxu1 %v5046_v63  ;;  %v5050_v8 = vpack.c.bf16 %v3650_v15, %v3649_v30 }
 0x5da   : > { %v5562_v24 = vpop.eup %5561  ;;  %5051 = vmatprep.subr.bf16.mxu1 %v5050_v8 }
 0x5db   : > { %v3330_v28 = vmul.f32 %v5562_v24, %v7464_v58  ;;  %v5564_v62 = vpop.eup %5563 }
 0x5dc   : > { %v3332_v12 = vmul.f32 %v5564_v62, %v7460_v3  ;;  %5053 = vmatpush3.bf16.msra.mxu1 %v5050_v8 }
 0x5dd   : > { %4817 = vmatmul.mubr.msk.f32.gmra.mrb[80].mxu0 %vm963_vm1, %v3330_v28 }
 0x5de   : > { %4819 = vmatprep.mubr.msk.f32.mxu0 %vm963_vm1, %v3331_v40  ;;  %v4629_v39 = vpop.f32.mrb[34].mxu0 }
 0x5df   : > { %1553 = vst.msk [vmem:[#allocation2 + $0x78] sm:$0xff] %vm963_vm1, %v4629_v39  ;;  %v1529_v51 = vpop.f32.mrb[35].mxu0 }
 0x5e0   : > { %1552 = vst.msk [vmem:[#allocation2 + $0x70] sm:$0xff] %vm963_vm1, %v1529_v51 }
 0x5e1   : > { %4820 = vmatmul.mubr.msk.f32.gmra.mrb[82].mxu0 %vm963_vm1, %v3332_v12 }
 0x60b   : > { %v4672_v26 = vpop.f32.mrb[36].mxu0 }
 0x60c   : > { %2182 = vrot.lane.b32.xlu0 %v4672_v26, %s6011_s0  ;;  %v2085_v58 = vpop.f32.mrb[37].mxu0 }
 0x60d   : > { %2180 = vrot.lane.b32.xlu1 %v2085_v58, %s6011_s0 }
 0x613   : > { %v4675_v14 = vpop.f32.mrb[38].mxu0 }
 0x614   : > { %2186 = vrot.lane.b32.xlu1 %v4675_v14, %s6011_s0  ;;  %v2095_v60 = vpop.f32.mrb[39].mxu0 }
 0x615   : > { %2184 = vrot.lane.b32.xlu0 %v2095_v60, %s6011_s0 }
 0x618   : > { %v4678_v49 = vpop.f32.mrb[40].mxu0 }
 0x619   : > { %2190 = vrot.lane.b32.xlu1 %v4678_v49, %s6011_s0  ;;  %v2105_v3 = vpop.f32.mrb[41].mxu0 }
 0x61a   : > { %2188 = vrot.lane.b32.xlu0 %v2105_v3, %s6011_s0 }
 0x61c   : > { %v4681_v21 = vpop.f32.mrb[42].mxu0 }
 0x61d   : > { %2194 = vrot.lane.b32.xlu1 %v4681_v21, %s6011_s0  ;;  %v2115_v50 = vpop.f32.mrb[43].mxu0 }
 0x61e   : > { %2192 = vrot.lane.b32.xlu0 %v2115_v50, %s6011_s0 }
 0x620   : > { %v4684_v46 = vpop.f32.mrb[44].mxu0 }
 0x621   : > { %2198 = vrot.lane.b32.xlu1 %v4684_v46, %s6011_s0  ;;  %v2125_v48 = vpop.f32.mrb[45].mxu0 }
 0x622   : > { %2196 = vrot.lane.b32.xlu0 %v2125_v48, %s6011_s0 }
 0x624   : > { %v4687_v1 = vpop.f32.mrb[46].mxu0 }
 0x625   : > { %2202 = vrot.lane.b32.xlu1 %v4687_v1, %s6011_s0  ;;  %v2135_v18 = vpop.f32.mrb[47].mxu0 }
 0x626   : > { %2200 = vrot.lane.b32.xlu0 %v2135_v18, %s6011_s0 }
 0x628   : > { %v4690_v4 = vpop.f32.mrb[48].mxu0 }
 0x629   : > { %2206 = vrot.lane.b32.xlu1 %v4690_v4, %s6011_s0  ;;  %v2145_v23 = vpop.f32.mrb[49].mxu0 }
 0x62a   : > { %2204 = vrot.lane.b32.xlu0 %v2145_v23, %s6011_s0 }
 0x62c   : > { %v4693_v42 = vpop.f32.mrb[50].mxu0 }
 0x62d   : > { %2210 = vrot.lane.b32.xlu1 %v4693_v42, %s6011_s0  ;;  %v2155_v0 = vpop.f32.mrb[51].mxu0 }
 0x62e   : > { %2208 = vrot.lane.b32.xlu0 %v2155_v0, %s6011_s0 }
 0x630   : > { %v4736_v20 = vpop.f32.mrb[52].mxu0 }
 0x631   : > { %2869 = vrot.lane.b32.xlu1 %v4736_v20, %s6010_s27  ;;  %v2772_v61 = vpop.f32.mrb[53].mxu0 }
 0x634   : > { %v4739_v57 = vpop.f32.mrb[54].mxu0 }
 0x635   : > { %2867 = vrot.lane.b32.xlu1 %v2772_v61, %s6010_s27  ;;  %v2782_v45 = vpop.f32.mrb[55].mxu0 }
 0x636   : > { %2871 = vrot.lane.b32.xlu0 %v2782_v45, %s6010_s27 }
 0x638   : > { %v4742_v16 = vpop.f32.mrb[56].mxu0 }
 0x639   : > { %2873 = vrot.lane.b32.xlu1 %v4739_v57, %s6010_s27  ;;  %v2792_v59 = vpop.f32.mrb[57].mxu0 }
 0x63a   : > { %2875 = vrot.lane.b32.xlu0 %v2792_v59, %s6010_s27 }
 0x63c   : > { %v4745_v53 = vpop.f32.mrb[58].mxu0 }
 0x63d   : > { %2877 = vrot.lane.b32.xlu1 %v4742_v16, %s6010_s27  ;;  %v2802_v34 = vpop.f32.mrb[59].mxu0 }
 0x63e   : > { %2879 = vrot.lane.b32.xlu0 %v2802_v34, %s6010_s27 }
 0x641   : > { %2881 = vrot.lane.b32.xlu1 %v4745_v53, %s6010_s27 }
 0x648   : > { %v4748_v13 = vpop.f32.mrb[60].mxu0 }
 0x649   : > { %2885 = vrot.lane.b32.xlu1 %v4748_v13, %s6010_s27  ;;  %v2812_v19 = vpop.f32.mrb[61].mxu0 }
 0x64a   : > { %2883 = vrot.lane.b32.xlu0 %v2812_v19, %s6010_s27 }
 0x654   : > { %v4751_v22 = vpop.f32.mrb[62].mxu0 }
 0x655   : > { %2889 = vrot.lane.b32.xlu1 %v4751_v22, %s6010_s27  ;;  %v2822_v27 = vpop.f32.mrb[63].mxu0 }
 0x656   : > { %2887 = vrot.lane.b32.xlu0 %v2822_v27, %s6010_s27 }
 0x658   : > { %v4754_v32 = vpop.f32.mrb[64].mxu0 }
 0x659   : > { %2893 = vrot.lane.b32.xlu1 %v4754_v32, %s6010_s27  ;;  %v2832_v2 = vpop.f32.mrb[65].mxu0 }
 0x65a   : > { %2891 = vrot.lane.b32.xlu0 %v2832_v2, %s6010_s27 }
 0x65c   : > { %v4757_v41 = vpop.f32.mrb[66].mxu0 }
 0x65d   : > { %2897 = vrot.lane.b32.xlu1 %v4757_v41, %s6010_s27  ;;  %v2842_v43 = vpop.f32.mrb[67].mxu0 }
 0x65e   : > { %2895 = vrot.lane.b32.xlu0 %v2842_v43, %s6010_s27 }
 0x679   : > { %v4800_v52 = vpop.f32.mrb[68].mxu0 }
 0x67a   : > { %3556 = vrot.lane.b32.xlu1 %v4800_v52, %s6009_s24  ;;  %v3459_v24 = vpop.f32.mrb[69].mxu0 }
 0x67b   : > { %3554 = vrot.lane.b32.xlu0 %v3459_v24, %s6009_s24 }
 0x67d   : > { %v4803_v28 = vpop.f32.mrb[70].mxu0 }
 0x67e   : > { %v2183_v62 = vpop.permute.xlu0 %2182  ;;  %3560 = vrot.lane.b32.xlu1 %v4803_v28, %s6009_s24  ;;  %v3469_v40 = vpop.f32.mrb[71].mxu0 }
 0x67f   : > { %2230 = vst.msk [vmem:[#allocation2 + $0x8] sm:$0xff] %vm2228_vm3, %v2183_v62  ;;  %v2181_v39 = vpop.permute.xlu1 %2180  ;;  %3558 = vrot.lane.b32.xlu0 %v3469_v40, %s6009_s24 }
 0x680   : > { %2229 = vst.msk [vmem:[#allocation2] sm:$0xff] %vm2228_vm3, %v2181_v39 }
 0x681   : > { %v4806_v51 = vpop.f32.mrb[72].mxu0 }
 0x682   : > { %3564 = vrot.lane.b32.xlu1 %v4806_v51, %s6009_s24  ;;  %v3479_v12 = vpop.f32.mrb[73].mxu0 }
 0x683   : > { %3562 = vrot.lane.b32.xlu0 %v3479_v12, %s6009_s24 }
 0x685   : > { %v4809_v26 = vpop.f32.mrb[74].mxu0 }
 0x686   : > { %3568 = vrot.lane.b32.xlu1 %v4809_v26, %s6009_s24  ;;  %v3489_v58 = vpop.f32.mrb[75].mxu0  ;;  %v2187_v14 = vpop.permute.xlu1 %2186 }
 0x687   : > { %3566 = vrot.lane.b32.xlu0 %v3489_v58, %s6009_s24  ;;  %2232 = vst.msk [vmem:[#allocation2 + $0x18] sm:$0xff] %vm2228_vm3, %v2187_v14  ;;  %v2185_v60 = vpop.permute.xlu0 %2184 }
 0x688   : > { %2231 = vst.msk [vmem:[#allocation2 + $0x10] sm:$0xff] %vm2228_vm3, %v2185_v60 }
 0x689   : > { %v4812_v49 = vpop.f32.mrb[76].mxu0 }
 0x68a   : > { %3572 = vrot.lane.b32.xlu1 %v4812_v49, %s6009_s24  ;;  %v3499_v3 = vpop.f32.mrb[77].mxu0 }
 0x68b   : > { %v2191_v21 = vpop.permute.xlu1 %2190  ;;  %3570 = vrot.lane.b32.xlu0 %v3499_v3, %s6009_s24 }
 0x68c   : > { %2234 = vst.msk [vmem:[#allocation2 + $0x28] sm:$0xff] %vm2228_vm3, %v2191_v21  ;;  %v2189_v50 = vpop.permute.xlu0 %2188 }
 0x68d   : > { %2233 = vst.msk [vmem:[#allocation2 + $0x20] sm:$0xff] %vm2228_vm3, %v2189_v50  ;;  %v4815_v46 = vpop.f32.mrb[78].mxu0 }
 0x68e   : > { %3576 = vrot.lane.b32.xlu1 %v4815_v46, %s6009_s24  ;;  %v3509_v48 = vpop.f32.mrb[79].mxu0  ;;  %v4210_v46 = vld [vmem:[#allocation18] ss:$0 sm:$0xff] }
 0x68f   : > { %v2195_v1 = vpop.permute.xlu1 %2194  ;;  %3574 = vrot.lane.b32.xlu0 %v3509_v48, %s6009_s24 }
 0x690   : > { %2236 = vst.msk [vmem:[#allocation2 + $0x38] sm:$0xff] %vm2228_vm3, %v2195_v1  ;;  %v2193_v18 = vpop.permute.xlu0 %2192 }
 0x691   : > { %2235 = vst.msk [vmem:[#allocation2 + $0x30] sm:$0xff] %vm2228_vm3, %v2193_v18 }
 0x693   : > { %v2199_v4 = vpop.permute.xlu1 %2198 }
 0x694   : > { %2238 = vst.msk [vmem:[#allocation2 + $0x48] sm:$0xff] %vm2228_vm3, %v2199_v4  ;;  %v2197_v23 = vpop.permute.xlu0 %2196 }
 0x695   : > { %2237 = vst.msk [vmem:[#allocation2 + $0x40] sm:$0xff] %vm2228_vm3, %v2197_v23 }
 0x697   : > { %v2203_v42 = vpop.permute.xlu1 %2202 }
 0x698   : > { %2240 = vst.msk [vmem:[#allocation2 + $0x58] sm:$0xff] %vm2228_vm3, %v2203_v42  ;;  %v2201_v0 = vpop.permute.xlu0 %2200 }
 0x699   : > { %2239 = vst.msk [vmem:[#allocation2 + $0x50] sm:$0xff] %vm2228_vm3, %v2201_v0 }
 0x69b   : > { %v2207_v20 = vpop.permute.xlu1 %2206 }
 0x69c   : > { %2242 = vst.msk [vmem:[#allocation2 + $0x68] sm:$0xff] %vm2228_vm3, %v2207_v20  ;;  %v2205_v61 = vpop.permute.xlu0 %2204 }
 0x69d   : > { %2241 = vst.msk [vmem:[#allocation2 + $0x60] sm:$0xff] %vm2228_vm3, %v2205_v61 }
 0x69f   : > { %v2211_v57 = vpop.permute.xlu1 %2210 }
 0x6a0   : > { %2244 = vst.msk [vmem:[#allocation2 + $0x78] sm:$0xff] %vm2228_vm3, %v2211_v57  ;;  %v2209_v45 = vpop.permute.xlu0 %2208 }
 0x6a1   : > { %2243 = vst.msk [vmem:[#allocation2 + $0x70] sm:$0xff] %vm2228_vm3, %v2209_v45 }
 0x6a3   : > { %v2870_v16 = vpop.permute.xlu1 %2869 }
 0x6a4   : > { %2917 = vst.msk [vmem:[#allocation2 + $0x8] sm:$0xff] %vm2915_vm4, %v2870_v16 }
 0x6a7   : > { %v2868_v59 = vpop.permute.xlu1 %2867 }
 0x6a8   : > { %2916 = vst.msk [vmem:[#allocation2] sm:$0xff] %vm2915_vm4, %v2868_v59  ;;  %v2872_v53 = vpop.permute.xlu0 %2871 }
 0x6a9   : > { %2918 = vst.msk [vmem:[#allocation2 + $0x10] sm:$0xff] %vm2915_vm4, %v2872_v53 }
 0x6ab   : > { %v2874_v34 = vpop.permute.xlu1 %2873 }
 0x6ac   : > { %2919 = vst.msk [vmem:[#allocation2 + $0x18] sm:$0xff] %vm2915_vm4, %v2874_v34  ;;  %v2876_v13 = vpop.permute.xlu0 %2875 }
 0x6ad   : > { %2920 = vst.msk [vmem:[#allocation2 + $0x20] sm:$0xff] %vm2915_vm4, %v2876_v13 }
 0x6af   : > { %v2878_v19 = vpop.permute.xlu1 %2877 }
 0x6b0   : > { %2921 = vst.msk [vmem:[#allocation2 + $0x28] sm:$0xff] %vm2915_vm4, %v2878_v19  ;;  %v4818_v54 = vpop.f32.mrb[80].mxu0  ;;  %v2880_v44 = vpop.permute.xlu0 %2879 }
 0x6b1   : > { %2922 = vst.msk [vmem:[#allocation2 + $0x30] sm:$0xff] %vm2915_vm4, %v2880_v44  ;;  %3580 = vrot.lane.b32.xlu1 %v4818_v54, %s6009_s24  ;;  %v3519_v37 = vpop.f32.mrb[81].mxu0 }
 0x6b2   : > { %3578 = vrot.lane.b32.xlu0 %v3519_v37, %s6009_s24 }
 0x6b3   : > { %v2882_v5 = vpop.permute.xlu1 %2881 }
 0x6b4   : > { %2923 = vst.msk [vmem:[#allocation2 + $0x38] sm:$0xff] %vm2915_vm4, %v2882_v5  ;;  %v4821_v33 = vpop.f32.mrb[82].mxu0 }
 0x6b5   : > { %3584 = vrot.lane.b32.xlu1 %v4821_v33, %s6009_s24  ;;  %v3529_v38 = vpop.f32.mrb[83].mxu0 }
 0x6b6   : > { %3582 = vrot.lane.b32.xlu0 %v3529_v38, %s6009_s24  ;;  %s6012_s24 = smov [#allocation20]  }
 0x6b7   : > { %s5853_s27 = sshll.u32 %s6012_s24, 4  ;;  %s5854_s27 = int_to_ptr.vmem [resolvable:$false] %s5853_s27 }
 0x6b8   : > { %s5855_s0 = scalar_lea.vmem %s5854_s27, 4096  ;;  %p5856_p11 = scmp.lt.s32.totalorder %s7700_s6, %s5854_s27 }
 0x6b9   : > { %p5857_p7 = scmp.lt.s32.totalorder %s5855_s0, %s5849_s1 }
 0x6bb   : > { %v2886_v10 = vpop.permute.xlu1 %2885  ;;  %p5858_p2 = por %p5857_p7, %p5856_p11 }
 0x6bc   : > { %2925 = vst.msk [vmem:[#allocation2 + $0x48] sm:$0xff] %vm2915_vm4, %v2886_v10  ;;  %v2884_v11 = vpop.permute.xlu0 %2883 }
 0x6bd   : > { %2924 = vst.msk [vmem:[#allocation2 + $0x40] sm:$0xff] %vm2915_vm4, %v2884_v11  ;;  %p5859_p10 = pnand %p5858_p2, %p5852_p9 }
 0x6c7   : > { %v2890_v22 = vpop.permute.xlu1 %2889 }
 0x6c8   : > { %2927 = vst.msk [vmem:[#allocation2 + $0x58] sm:$0xff] %vm2915_vm4, %v2890_v22  ;;  %v2888_v27 = vpop.permute.xlu0 %2887 }
 0x6c9   : > { %2926 = vst.msk [vmem:[#allocation2 + $0x50] sm:$0xff] %vm2915_vm4, %v2888_v27 }
 0x6cb   : > { %v2894_v31 = vpop.permute.xlu1 %2893 }
 0x6cc   : > { %2929 = vst.msk [vmem:[#allocation2 + $0x68] sm:$0xff] %vm2915_vm4, %v2894_v31  ;;  %v2892_v7 = vpop.permute.xlu0 %2891 }
 0x6cd   : > { %2928 = vst.msk [vmem:[#allocation2 + $0x60] sm:$0xff] %vm2915_vm4, %v2892_v7 }
 0x6cf   : > { %v2898_v6 = vpop.permute.xlu1 %2897 }
 0x6d0   : > { %2931 = vst.msk [vmem:[#allocation2 + $0x78] sm:$0xff] %vm2915_vm4, %v2898_v6  ;;  %v2896_v32 = vpop.permute.xlu0 %2895 }
 0x6d1   : > { %2930 = vst.msk [vmem:[#allocation2 + $0x70] sm:$0xff] %vm2915_vm4, %v2896_v32 }
 0x6ec   : > { %v3557_v2 = vpop.permute.xlu1 %3556 }
 0x6ed   : > { %3604 = vst.msk [vmem:[#allocation2 + $0x8] sm:$0xff] %vm3602_vm5, %v3557_v2  ;;  %v3555_v36 = vpop.permute.xlu0 %3554 }
 0x6ee   : > { %3603 = vst.msk [vmem:[#allocation2] sm:$0xff] %vm3602_vm5, %v3555_v36 }
 0x6f0   : > { %v3561_v56 = vpop.permute.xlu1 %3560 }
 0x6f1   : > { %3606 = vst.msk [vmem:[#allocation2 + $0x18] sm:$0xff] %vm3602_vm5, %v3561_v56  ;;  %v3559_v35 = vpop.permute.xlu0 %3558 }
 0x6f2   : > { %3605 = vst.msk [vmem:[#allocation2 + $0x10] sm:$0xff] %vm3602_vm5, %v3559_v35 }
 0x6f4   : > { %v3565_v41 = vpop.permute.xlu1 %3564  ;;  %v3620_v25 = vld [vmem:[#allocation2 + $0x8] sm:$0xff] }
 0x6f5   : > { %3608 = vst.msk [vmem:[#allocation2 + $0x28] sm:$0xff] %vm3602_vm5, %v3565_v41  ;;  %v3563_v43 = vpop.permute.xlu0 %3562  ;;  %v3619_v17 = vld [vmem:[#allocation2] sm:$0xff] }
 0x6f6   : > { %3607 = vst.msk [vmem:[#allocation2 + $0x20] sm:$0xff] %vm3602_vm5, %v3563_v43  ;;  %4854 = vmatprep.mubr.f32.mxu1 %v3619_v17 }
 0x6f7   : > { %4855 = vmatmul.mubr.f32.vlgmr.msra.gmra.mrb[68].mxu1 %v3620_v25 }
 0x6f8   : > { %v3569_v29 = vpop.permute.xlu1 %3568  ;;  %v3622_v55 = vld [vmem:[#allocation2 + $0x18] sm:$0xff] }
 0x6f9   : > { %3610 = vst.msk [vmem:[#allocation2 + $0x38] sm:$0xff] %vm3602_vm5, %v3569_v29  ;;  %v3567_v9 = vpop.permute.xlu0 %3566  ;;  %v3621_v47 = vld [vmem:[#allocation2 + $0x10] sm:$0xff] }
 0x6fa   : > { %3609 = vst.msk [vmem:[#allocation2 + $0x30] sm:$0xff] %vm3602_vm5, %v3567_v9  ;;  %4857 = vmatprep.mubr.f32.mxu1 %v3621_v47 }
 0x6fb   : > { %4858 = vmatmul.mubr.f32.gmra.mrb[70].mxu1 %v3622_v55 }
 0x6fc   : > { %v3573_v63 = vpop.permute.xlu1 %3572  ;;  %v3624_v8 = vld [vmem:[#allocation2 + $0x28] sm:$0xff] }
 0x6fd   : > { %3612 = vst.msk [vmem:[#allocation2 + $0x48] sm:$0xff] %vm3602_vm5, %v3573_v63  ;;  %v3571_v30 = vpop.permute.xlu0 %3570  ;;  %v3623_v15 = vld [vmem:[#allocation2 + $0x20] sm:$0xff] }
 0x6fe   : > { %3611 = vst.msk [vmem:[#allocation2 + $0x40] sm:$0xff] %vm3602_vm5, %v3571_v30  ;;  %4860 = vmatprep.mubr.f32.mxu1 %v3623_v15 }
 0x6ff   : > { %4861 = vmatmul.mubr.f32.gmra.mrb[72].mxu1 %v3624_v8 }
 0x700   : > { %v3577_v52 = vpop.permute.xlu1 %3576  ;;  %v3626_v62 = vld [vmem:[#allocation2 + $0x38] sm:$0xff] }
 0x701   : > { %3614 = vst.msk [vmem:[#allocation2 + $0x58] sm:$0xff] %vm3602_vm5, %v3577_v52  ;;  %v3575_v24 = vpop.permute.xlu0 %3574  ;;  %v3625_v28 = vld [vmem:[#allocation2 + $0x30] sm:$0xff] }
 0x702   : > { %3613 = vst.msk [vmem:[#allocation2 + $0x50] sm:$0xff] %vm3602_vm5, %v3575_v24  ;;  %4863 = vmatprep.mubr.f32.mxu1 %v3625_v28 }
 0x703   : > { %4864 = vmatmul.mubr.f32.gmra.mrb[74].mxu1 %v3626_v62 }
 0x704   : > { %v3628_v39 = vld [vmem:[#allocation2 + $0x48] sm:$0xff] }
 0x705   : > { %v3627_v40 = vld [vmem:[#allocation2 + $0x40] sm:$0xff] }
 0x706   : > { %4866 = vmatprep.mubr.f32.mxu1 %v3627_v40 }
 0x707   : > { %4867 = vmatmul.mubr.f32.gmra.mrb[76].mxu1 %v3628_v39 }
 0x708   : > { %v3630_v12 = vld [vmem:[#allocation2 + $0x58] sm:$0xff] }
 0x709   : > { %v3629_v51 = vld [vmem:[#allocation2 + $0x50] sm:$0xff] }
 0x70a   : > { %4869 = vmatprep.mubr.f32.mxu1 %v3629_v51 }
 0x70b   : > { %4870 = vmatmul.mubr.f32.gmra.mrb[78].mxu1 %v3630_v12 }
 0x723   : > { %v3581_v26 = vpop.permute.xlu1 %3580 }
 0x724   : > { %3616 = vst.msk [vmem:[#allocation2 + $0x68] sm:$0xff] %vm3602_vm5, %v3581_v26  ;;  %v3579_v58 = vpop.permute.xlu0 %3578 }
 0x725   : > { %3615 = vst.msk [vmem:[#allocation2 + $0x60] sm:$0xff] %vm3602_vm5, %v3579_v58 }
 0x727   : > { %v3585_v14 = vpop.permute.xlu1 %3584 }
 0x728   : > { %3618 = vst.msk [vmem:[#allocation2 + $0x78] sm:$0xff] %vm3602_vm5, %v3585_v14  ;;  %v3583_v60 = vpop.permute.xlu0 %3582 }
 0x729   : > { %3617 = vst.msk [vmem:[#allocation2 + $0x70] sm:$0xff] %vm3602_vm5, %v3583_v60 }
 0x72b   : > { %v3632_v3 = vld [vmem:[#allocation2 + $0x68] sm:$0xff] }
 0x72c   : > { %v3631_v49 = vld [vmem:[#allocation2 + $0x60] sm:$0xff] }
 0x72d   : > { %4872 = vmatprep.mubr.f32.mxu1 %v3631_v49 }
 0x72e   : > { %4873 = vmatmul.mubr.f32.gmra.mrb[80].mxu1 %v3632_v3 }
 0x72f   : > { %v3634_v50 = vld [vmem:[#allocation2 + $0x78] sm:$0xff] }
 0x730   : > { %v3633_v21 = vld [vmem:[#allocation2 + $0x70] sm:$0xff] }
 0x731   : > { %4875 = vmatprep.mubr.f32.mxu1 %v3633_v21 }
 0x732   : > { %4876 = vmatmul.mubr.f32.gmra.mrb[82].mxu1 %v3634_v50 }
 0x7ca   : > { %v4856_v48 = vpop.f32.mrb[68].mxu1 }
 0x7cb   : > { %v3730_v1 = vadd.f32 %v4856_v48, %v4210_v46  ;;  %v3724_v18 = vpop.f32.mrb[69].mxu1 }
 0x7cc   : > { %v3725_v4 = vadd.f32 %v4210_v46, %v3724_v18 }
 0x7cd   : > { %3804 = vst [vmem:[%s7676_s10 + $0x8] sm:$0xff] %v3730_v1 }
 0x7ce   : > { %3803 = vst [vmem:[%s7676_s10] sm:$0xff] %v3725_v4  ;;  %v4859_v23 = vpop.f32.mrb[70].mxu1 }
 0x7cf   : > { %v3740_v42 = vadd.f32 %v4859_v23, %v4210_v46  ;;  %v3734_v0 = vpop.f32.mrb[71].mxu1 }
 0x7d0   : > { %v3735_v20 = vadd.f32 %v4210_v46, %v3734_v0 }
 0x7d1   : > { %3806 = vst [vmem:[%s7676_s10 + $0x18] sm:$0xff] %v3740_v42 }
 0x7d2   : > { %3805 = vst [vmem:[%s7676_s10 + $0x10] sm:$0xff] %v3735_v20  ;;  %v4862_v61 = vpop.f32.mrb[72].mxu1 }
 0x7d3   : > { %v3750_v57 = vadd.f32 %v4862_v61, %v4210_v46  ;;  %v3744_v45 = vpop.f32.mrb[73].mxu1 }
 0x7d4   : > { %v3745_v16 = vadd.f32 %v4210_v46, %v3744_v45 }
 0x7d5   : > { %3808 = vst [vmem:[%s7676_s10 + $0x28] sm:$0xff] %v3750_v57 }
 0x7d6   : > { %3807 = vst [vmem:[%s7676_s10 + $0x20] sm:$0xff] %v3745_v16  ;;  %v4865_v59 = vpop.f32.mrb[74].mxu1 }
 0x7d7   : > { %v3760_v53 = vadd.f32 %v4865_v59, %v4210_v46  ;;  %v3754_v34 = vpop.f32.mrb[75].mxu1 }
 0x7d8   : > { %v3755_v13 = vadd.f32 %v4210_v46, %v3754_v34 }
 0x7d9   : > { %3810 = vst [vmem:[%s7676_s10 + $0x38] sm:$0xff] %v3760_v53 }
 0x7da   : > { %3809 = vst [vmem:[%s7676_s10 + $0x30] sm:$0xff] %v3755_v13  ;;  %v4868_v19 = vpop.f32.mrb[76].mxu1 }
 0x7db   : > { %v3770_v54 = vadd.f32 %v4868_v19, %v4210_v46  ;;  %v3764_v44 = vpop.f32.mrb[77].mxu1 }
 0x7dc   : > { %v3765_v37 = vadd.f32 %v4210_v46, %v3764_v44 }
 0x7dd   : > { %3812 = vst [vmem:[%s7676_s10 + $0x48] sm:$0xff] %v3770_v54 }
 0x7de   : > { %3811 = vst [vmem:[%s7676_s10 + $0x40] sm:$0xff] %v3765_v37  ;;  %v4871_v5 = vpop.f32.mrb[78].mxu1 }
 0x7df   : > { %v3780_v33 = vadd.f32 %v4871_v5, %v4210_v46  ;;  %v3774_v38 = vpop.f32.mrb[79].mxu1 }
 0x7e0   : > { %v3775_v10 = vadd.f32 %v4210_v46, %v3774_v38 }
 0x7e1   : > { %3814 = vst [vmem:[%s7676_s10 + $0x58] sm:$0xff] %v3780_v33 }
 0x7e2   : > { %3813 = vst [vmem:[%s7676_s10 + $0x50] sm:$0xff] %v3775_v10 }
 0x801   : > { %v4874_v11 = vpop.f32.mrb[80].mxu1 }
 0x802   : > { %v3790_v22 = vadd.f32 %v4874_v11, %v4210_v46  ;;  %v3784_v27 = vpop.f32.mrb[81].mxu1 }
 0x803   : > { %v3785_v31 = vadd.f32 %v4210_v46, %v3784_v27 }
 0x804   : > { %3816 = vst [vmem:[%s7676_s10 + $0x68] sm:$0xff] %v3790_v22 }
 0x805   : > { %3815 = vst [vmem:[%s7676_s10 + $0x60] sm:$0xff] %v3785_v31  ;;  %v4877_v7 = vpop.f32.mrb[82].mxu1 }
 0x806   : > { %v3800_v6 = vadd.f32 %v4877_v7, %v4210_v46  ;;  %v3794_v32 = vpop.f32.mrb[83].mxu1 }
 0x807   : > { %v3795_v2 = vadd.f32 %v4210_v46, %v3794_v32 }
 0x808   : > { %3818 = vst [vmem:[%s7676_s10 + $0x78] sm:$0xff] %v3800_v6 }
 0x809   : > { %3817 = vst [vmem:[%s7676_s10 + $0x70] sm:$0xff] %v3795_v2 }
 0x80a   : > { %5862 = shalt.err (!%p5859_p10)
}
 0x80b   : > { %s5863_s10 = scalar_lea.hbm %s7698_s3, 2048  ;;  %s5867_s7 = scalar_lea.hbm %s7921_s26, 8192 }
 0x80c   : > { %p5864_p12 = scmp.ne.s32.totalorder %s7698_s3, %s5863_s10  ;;  %p5868_p5 = scmp.lt.u32.totalorder %s7698_s3, %s7921_s26 }
 0x80d   : > { %p5869_p6 = scmp.lt.u32.totalorder %s5867_s7, %s5863_s10  ;;  %p5871_p4 = scmp.lt.u32.totalorder %s5863_s10, %s7698_s3 }
 0x80e   : > { %p5865_p13 = pnand %p5864_p12, %p7922_p8 }
 0x80f   : > { %p5870_p3 = por %p5869_p6, %p5868_p5 }
 0x810   : > { %p5866_p1 = pneg %p5865_p13 }
 0x811   : > { %p5872_p0 = por %p5871_p4, %p5870_p3 }
 0x813   : > { %p5873_p9 = pnand %p5872_p0, %p5866_p1 }
 0x815   : > { %5876 = shalt.err (!%p5873_p9)
}
 0x816   : > { %s6013_s11 = smov 128   ;;  %s6014_s25 = smov 8  }
 0x817   : > { %5090 = dma.vmem_to_hbm [thread:$0]  (%p7922_p8), %s7700_s6, 2048, %s7698_s3, %s3820_s15, %s6013_s11, %s6013_s11, %s6014_s25  }
 0x818 PF: > { %p5145_p11 = scmp.ge.s32.totalorder %s5995_s23, 2  ;;  %s3850_s5 = sand.u32 1, %s5967_s16  }
 0x819   : > { %p7923_p7 = scmp.ne.s32.totalorder %s7847_s12, 0  ;;  %s3851_s1 = scalar_lea.sflag [#allocation5], %s3850_s5 }
 0x81b   : > { %p5125_p2 = pnand %p5145_p11, %p7923_p7 }
 0x81d   : > { %5950 = dma.done.wait (!%p5125_p2), %s3851_s1, 2048  }
 0x81e   : > { %5952 = vsyncadd (!%p5125_p2), %s3851_s1, 4294965248  ;;  %s33_s23 = sadd.s32 1, %s5995_s23   ;;  %s7924_s13 = sld [smem:[#allocation30_spill]] }
 0x81f   : > { %p30_p10 = scmp.ge.s32.totalorder %s33_s23, 6   ;;  %s7925_s24 = sld [smem:[#allocation31_spill]] }
 0x820   : > { %s7926_s9 = smov %s6369_s14  ;;  %s7928_s15 = smov %s6425_s29 }
 0x821   : > { %s7929_s16 = smov %s5971_s17  ;;  %s7930_s17 = smov %s5975_s18 }
 0x822   : > { %s7931_s18 = smov %s7926_s9  ;;  %s7932_s19 = smov %s5987_s21 }
 0x823   : > { %s7933_s20 = smov %s5991_s22  ;;  %s7934_s21 = smov %s7937_s28 }
 0x824   : > { %s7935_s22 = smov %s7941_s2  ;;  %32 = sbr.rel (!%p30_p10) target bundleno = 27 (0x1b), region = 150 }
 0x825   : > { %s7927_s14 = smov %s7925_s24 }
 0x82b   :  { %3856 = vsyncpa [#allocation4], 1 }
 0x82c   :  { %3858 = vsyncpa [#allocation4 + $0x1], 1 }
 0x82d   :  { %3859 = vsyncpa [#allocation7], 1 }
 0x82e   :  { %3861 = vsyncpa [#allocation7 + $0x1], 1 }
 0x82f   :  { %3862 = vsyncpa [#allocation10], 1 }
 0x830   :  { %3863 = vsyncpa [#allocation13], 1 }
 0x831   :  { %3864 = vsyncpa [#allocation16], 1 }
 0x832   :  { %3865 = vsyncpa [#allocation19], 1 }
 0x833   :  { %3866 = vsyncpa [#allocation5], 1 }
 0x834   :  { %3868 = vsyncpa [#allocation5 + $0x1], 1 }

</bundles_post_ra>
